<compile_context>
chip_gen: v5e
topology: v5e:2x2
jax: 0.10.0
libtpu: 0.0.40
codegen_flags: <defaults>
</compile_context>

<pallas_src>
import functools

import jax
import jax.numpy as jnp
from jax.experimental import pallas as pl
from jax.experimental.pallas import tpu as pltpu


VMEM_LIMIT = 48 * 1024 * 1024     # raised scoped-VMEM limit (defaults: 16/32 MiB)


def _round_up(x, m):
    return (x + m - 1) // m * m


def _pick_strip(h, cap=32):
    """Largest even divisor of h that is <= cap (strip of pre-pool output rows)."""
    for s in (32, 16, 8, 4, 2):
        if s <= cap and h % s == 0:
            return s
    return h


# ---------------------------------------------------------------------------
# Fused conv1(1->32) + ReLU + conv2(32->64) + ReLU + MaxPool2x2/2.
# Grid = (batch, H-strips).  conv1 runs on an im2col'd (rows*Wc1, 9) slice of
# the single-channel input (one K=9 matmul); its output stays in VMEM with the
# 1-pixel halo rows/cols masked to zero; conv2 is one K=9*32 bf16 MXU matmul;
# bias + ReLU + pool are fused into the epilogue and the result is stored as a
# dense bf16 tile.
# ---------------------------------------------------------------------------
def _fused_conv12_kernel(p_ref, w1_ref, b1_ref, w2_ref, b2_ref, o_ref, *,
                         SH, H, W, Wc1, C1):
    s = pl.program_id(1)
    r0 = s * SH                                    # first conv2 output row of strip
    C2 = o_ref.shape[-1]

    # ---- conv1 for output rows r0-1 .. r0+SH (the +-1 halo conv2 needs).
    n1 = (SH + 2) * Wc1
    start = pl.multiple_of(r0 * Wc1, 8)            # Wc1 is a multiple of 8
    p1 = p_ref[0, pl.ds(start, n1), :]             # ((SH+2)*Wc1, 9) bf16
    a = jnp.dot(p1, w1_ref[...], preferred_element_type=jnp.float32)
    a = jnp.maximum(a + b1_ref[...], 0.0)
    a = a.reshape(SH + 2, Wc1, C1)                 # f32, channels on lanes

    # Zero the positions that are conv1's zero padding (rows -1 / H, cols -1 / W)
    shape3 = (SH + 2, Wc1, C1)
    gr = r0 - 1 + jax.lax.broadcasted_iota(jnp.int32, shape3, 0)
    gc = jax.lax.broadcasted_iota(jnp.int32, shape3, 1) - 1
    valid = (gr >= 0) & (gr < H) & (gc >= 0) & (gc < W)
    a1 = jnp.where(valid, a, 0.0)                  # (SH+2, Wc1, C1) f32

    # ---- conv2: im2col (K = 9*C1) -> single bf16 MXU matmul, f32 accumulate.
    pats = [a1[dy:dy + SH, dx:dx + W, :] for dy in range(3) for dx in range(3)]
    p2 = jnp.concatenate(pats, axis=-1).reshape(SH * W, 9 * C1)
    acc = jnp.dot(p2.astype(jnp.bfloat16), w2_ref[...],
                  preferred_element_type=jnp.float32)
    r = jnp.maximum(acc + b2_ref[...], 0.0)        # (SH*W, C2) f32

    # ---- fused 2x2/2 max pool, dense store.
    r = r.reshape(SH, W // 2, 2, C2)
    r = jnp.maximum(r[:, :, 0, :], r[:, :, 1, :])
    r = r.reshape(SH // 2, 2, W // 2, C2)
    r = jnp.maximum(r[:, 0], r[:, 1])
    o_ref[0] = r.astype(o_ref.dtype)


def fused_conv12_pool(patches, w1, b1, w2, b2, *, H, W, Wc1):
    B = patches.shape[0]
    C1 = w1.shape[1]
    C2 = w2.shape[1]
    SH = _pick_strip(H)
    NS = H // SH
    H2, W2 = H // 2, W // 2
    kern = functools.partial(_fused_conv12_kernel,
                             SH=SH, H=H, W=W, Wc1=Wc1, C1=C1)
    return pl.pallas_call(
        kern,
        out_shape=jax.ShapeDtypeStruct((B, H2, W2, C2), jnp.bfloat16),
        grid=(B, NS),
        in_specs=[
            # per-image patches stay resident across the strip axis
            pl.BlockSpec((1, (H + 2) * Wc1, 9), lambda b, s: (b, 0, 0)),
            pl.BlockSpec((9, C1), lambda b, s: (0, 0)),
            pl.BlockSpec((1, C1), lambda b, s: (0, 0)),
            pl.BlockSpec((9 * C1, C2), lambda b, s: (0, 0)),
            pl.BlockSpec((1, C2), lambda b, s: (0, 0)),
        ],
        out_specs=pl.BlockSpec((1, SH // 2, W2, C2), lambda b, s: (b, s, 0, 0)),
        compiler_params=pltpu.CompilerParams(
            dimension_semantics=("parallel", "parallel"),
            vmem_limit_bytes=VMEM_LIMIT),
    )(patches, w1, b1.reshape(1, C1), w2, b2.reshape(1, C2))


# ---------------------------------------------------------------------------
# conv3(64->128) + ReLU + MaxPool2x2/2.  Grid = (batch, H-strips).  The dense
# bf16 conv2 output is resident per image; each strip slices its rows plus a
# clamped 1-row halo (masked to zero via an iota compare), builds the W halo
# with explicit zero-column shifts, and runs one K = 9*64 bf16 MXU matmul.
# ---------------------------------------------------------------------------
def _conv3_pool_kernel(y_ref, w3_ref, b3_ref, o_ref, *, S3, H2, W2, C2):
    s = pl.program_id(1)
    r0 = s * S3
    C3 = o_ref.shape[-1]

    body_start = pl.multiple_of(r0, 8) if S3 % 8 == 0 else r0
    top = y_ref[0, pl.ds(jnp.maximum(r0 - 1, 0), 1), :, :].astype(jnp.float32)
    body = y_ref[0, pl.ds(body_start, S3), :, :].astype(jnp.float32)
    bot = y_ref[0, pl.ds(jnp.minimum(r0 + S3, H2 - 1), 1), :, :].astype(jnp.float32)
    xh = jnp.concatenate([top, body, bot], axis=0)        # (S3+2, W2, C2) f32
    gr = r0 - 1 + jax.lax.broadcasted_iota(jnp.int32, xh.shape, 0)
    xh = jnp.where((gr >= 0) & (gr < H2), xh, 0.0)

    # W halo via zero-column shifts (keeps every load/store dense).
    zc = jnp.zeros((S3 + 2, 1, C2), jnp.float32)
    shifts = [
        jnp.concatenate([zc, xh[:, :W2 - 1, :]], axis=1),  # dx = 0
        xh,                                                # dx = 1
        jnp.concatenate([xh[:, 1:, :], zc], axis=1),       # dx = 2
    ]
    pats = [shifts[dx][dy:dy + S3] for dy in range(3) for dx in range(3)]
    p3 = jnp.concatenate(pats, axis=-1).reshape(S3 * W2, 9 * C2)
    acc = jnp.dot(p3.astype(jnp.bfloat16), w3_ref[...],
                  preferred_element_type=jnp.float32)
    r = jnp.maximum(acc + b3_ref[...], 0.0)                # (S3*W2, C3) f32

    r = r.reshape(S3, W2 // 2, 2, C3)
    r = jnp.maximum(r[:, :, 0, :], r[:, :, 1, :])
    r = r.reshape(S3 // 2, 2, W2 // 2, C3)
    r = jnp.maximum(r[:, 0], r[:, 1])
    o_ref[0] = r.astype(o_ref.dtype)


def conv3_relu_pool(y2, w3, b3):
    B, H2, W2, C2 = y2.shape
    C3 = w3.shape[1]
    S3 = _pick_strip(H2)
    NS = H2 // S3
    H4, W4 = H2 // 2, W2 // 2
    kern = functools.partial(_conv3_pool_kernel, S3=S3, H2=H2, W2=W2, C2=C2)
    return pl.pallas_call(
        kern,
        out_shape=jax.ShapeDtypeStruct((B, H4, W4, C3), jnp.bfloat16),
        grid=(B, NS),
        in_specs=[
            pl.BlockSpec((1, H2, W2, C2), lambda b, s: (b, 0, 0, 0)),
            pl.BlockSpec((9 * C2, C3), lambda b, s: (0, 0)),
            pl.BlockSpec((1, C3), lambda b, s: (0, 0)),
        ],
        out_specs=pl.BlockSpec((1, S3 // 2, W4, C3), lambda b, s: (b, s, 0, 0)),
        compiler_params=pltpu.CompilerParams(
            dimension_semantics=("parallel", "parallel"),
            vmem_limit_bytes=VMEM_LIMIT),
    )(y2, w3, b3.reshape(1, C3))


# ---------------------------------------------------------------------------
# FC head: Linear -> ReLU -> Linear.  fc1_w (bf16) is streamed in large,
# byte-budgeted K tiles into an f32 VMEM accumulator.
# ---------------------------------------------------------------------------
def _fc_head_kernel(x_ref, w1_ref, b1_ref, w2_ref, b2_ref, o_ref, acc_ref):
    k = pl.program_id(0)

    @pl.when(k == 0)
    def _():
        acc_ref[...] = jnp.zeros_like(acc_ref)

    acc_ref[...] += jnp.dot(x_ref[...], w1_ref[...],
                            preferred_element_type=jnp.float32)

    @pl.when(k == pl.num_programs(0) - 1)
    def _():
        h = jnp.maximum(acc_ref[...] + b1_ref[...], 0.0)
        o_ref[...] = (jnp.dot(h, w2_ref[...],
                              preferred_element_type=jnp.float32)
                      + b2_ref[...])


def _pick_tk(K, E, itemsize, budget=8 * 1024 * 1024):
    for tk in (32768, 16384, 8192, 4096, 2048, 1024, 512, 256, 128):
        if K % tk == 0 and tk * E * itemsize <= budget:
            return tk
    return K      # fallback: whole K in one tile (only hit for small/odd K)


def fc_head(x_flat, w1, b1, w2, b2):
    B, K = x_flat.shape
    E = w1.shape[1]
    C = w2.shape[1]
    tk = _pick_tk(K, E, w1.dtype.itemsize)
    nk = max(K // tk, 1)
    return pl.pallas_call(
        _fc_head_kernel,
        out_shape=jax.ShapeDtypeStruct((B, C), jnp.float32),
        grid=(nk,),
        in_specs=[
            pl.BlockSpec((B, tk), lambda k: (0, k)),
            pl.BlockSpec((tk, E), lambda k: (k, 0)),
            pl.BlockSpec((1, E), lambda k: (0, 0)),
            pl.BlockSpec((E, C), lambda k: (0, 0)),
            pl.BlockSpec((1, C), lambda k: (0, 0)),
        ],
        out_specs=pl.BlockSpec((B, C), lambda k: (0, 0)),
        scratch_shapes=[pltpu.VMEM((B, E), jnp.float32)],
        compiler_params=pltpu.CompilerParams(
            dimension_semantics=("arbitrary",),
            vmem_limit_bytes=VMEM_LIMIT),
    )(x_flat, w1, b1.reshape(1, E), w2, b2.reshape(1, C))


# ---------------------------------------------------------------------------
# Full forward pass (mirrors FingerprintClassifier.forward).
# `params` must be the kernel-ready params from prepare_params().
# ---------------------------------------------------------------------------
def forward(params, x_nchw):
    B, _, H, W = x_nchw.shape
    # TODO(synk): generalize to image sizes that are not multiples of 16.
    assert H == W and H % 16 == 0, "image_size must be a multiple of 16"
    x = x_nchw[:, 0]                              # (B, H, W): Cin == 1

    # Tiny XLA-side im2col for the single-channel conv1 (K = 9), flattened and
    # width-aligned (Wc1 % 8 == 0) so the fused kernel uses it directly as a
    # 2-D matmul LHS.  ~0.3 MB/img bf16 at image_size=128.
    Wc1 = _round_up(W + 2, 8)
    xp = jnp.pad(x, ((0, 0), (2, 2), (2, Wc1 - W)))
    patches = jnp.stack(
        [xp[:, dy:dy + H + 2, dx:dx + Wc1]
         for dy in range(3) for dx in range(3)],
        axis=-1).reshape(B, (H + 2) * Wc1, 9).astype(jnp.bfloat16)

    y2 = fused_conv12_pool(patches, params["w1"], params["b1"],
                           params["w2"], params["b2"],
                           H=H, W=W, Wc1=Wc1)              # (B, H/2, W/2, 64) bf16
    y3 = conv3_relu_pool(y2, params["w3"], params["b3"])   # (B, H/4, W/4, 128) bf16
    y = y3.reshape(B, -1)     # NHWC flatten; fc1_w rows were pre-permuted
    return fc_head(y, params["fc1_w"], params["fc1_b"],
                   params["fc2_w"], params["fc2_b"])       # (B, num_classes) f32


# ---------------------------------------------------------------------------
# Parameter setup.
# ---------------------------------------------------------------------------
def init_params(key, image_size=16, embedding_size=32, num_classes=3):
    ks = jax.random.split(key, 9)
    conv_out = 128 * (image_size // 4) ** 2      # == module's conv_output_size

    def conv_w(k, cin, cout):   # HWIO (a torch OIHW weight maps via transpose(2,3,1,0))
        return jax.random.normal(k, (3, 3, cin, cout), jnp.float32) / jnp.sqrt(9.0 * cin)

    return {
        "w1": conv_w(ks[0], 1, 32),
        "b1": 0.1 * jax.random.normal(ks[1], (32,), jnp.float32),
        "w2": conv_w(ks[2], 32, 64),
        "b2": 0.1 * jax.random.normal(ks[3], (64,), jnp.float32),
        "w3": conv_w(ks[4], 64, 128),
        "b3": 0.1 * jax.random.normal(ks[5], (128,), jnp.float32),
        # fc1_w rows are in the torch Flatten order (C, H, W) here.
        "fc1_w": jax.random.normal(ks[6], (conv_out, embedding_size),
                                   jnp.float32) / jnp.sqrt(1.0 * conv_out),
        "fc1_b": 0.1 * jax.random.normal(ks[7], (embedding_size,), jnp.float32),
        "fc2_w": jax.random.normal(ks[8], (embedding_size, num_classes),
                                   jnp.float32) / jnp.sqrt(1.0 * embedding_size),
        "fc2_b": jnp.zeros((num_classes,), jnp.float32),
    }


def prepare_params(params, image_size):
    """One-time repack of torch-layout weights into the kernels' layouts."""
    H4 = W4 = image_size // 4
    C3 = params["w3"].shape[-1]
    E = params["fc1_w"].shape[1]
    p = {}
    # conv weights: HWIO (3,3,Cin,Cout) -> (9*Cin, Cout), bf16 MXU operands.
    p["w1"] = params["w1"].reshape(-1, params["w1"].shape[-1]).astype(jnp.bfloat16)
    p["w2"] = params["w2"].reshape(-1, params["w2"].shape[-1]).astype(jnp.bfloat16)
    p["w3"] = params["w3"].reshape(-1, params["w3"].shape[-1]).astype(jnp.bfloat16)
    p["b1"] = params["b1"]
    p["b2"] = params["b2"]
    p["b3"] = params["b3"]
    # fc1: permute rows from torch (C,H,W) flatten order to NHWC (H,W,C) order
    # so the activation flatten needs no runtime transpose; bf16 for streaming.
    p["fc1_w"] = (params["fc1_w"].reshape(C3, H4, W4, E)
                  .transpose(1, 2, 0, 3).reshape(H4 * W4 * C3, E)
                  .astype(jnp.bfloat16))
    p["fc1_b"] = params["fc1_b"]
    p["fc2_w"] = params["fc2_w"]          # tiny; stays f32
    p["fc2_b"] = params["fc2_b"]
    return p


# ---------------------------------------------------------------------------
# Pure-XLA f32 reference mirroring the PyTorch module exactly (NCHW flatten).
# ---------------------------------------------------------------------------
def reference_forward(raw_params, x_nchw):
    hp = jax.lax.Precision.HIGHEST
    dn = ("NHWC", "HWIO", "NHWC")

    def conv(t, w, b):
        y = jax.lax.conv_general_dilated(t, w, (1, 1), ((1, 1), (1, 1)),
                                         dimension_numbers=dn, precision=hp)
        return jax.nn.relu(y + b)

    def pool(t):
        Bq, Hq, Wq, Cq = t.shape
        return t.reshape(Bq, Hq // 2, 2, Wq // 2, 2, Cq).max(axis=(2, 4))

    x = jnp.transpose(x_nchw, (0, 2, 3, 1))
    y = conv(x, raw_params["w1"], raw_params["b1"])
    y = conv(y, raw_params["w2"], raw_params["b2"])
    y = pool(y)
    y = conv(y, raw_params["w3"], raw_params["b3"])
    y = pool(y)
    B = y.shape[0]
    y = jnp.transpose(y, (0, 3, 1, 2)).reshape(B, -1)   # torch Flatten (C,H,W)
    h = jax.nn.relu(jnp.dot(y, raw_params["fc1_w"], precision=hp)
                    + raw_params["fc1_b"])
    return jnp.dot(h, raw_params["fc2_w"], precision=hp) + raw_params["fc2_b"]


if __name__ == "__main__":
    IMAGE_SIZE = 16        # small stand-in for the module default of 128
    EMBEDDING = 32
    NUM_CLASSES = 3
    BATCH = 2

    key = jax.random.PRNGKey(0)
    k_params, k_x = jax.random.split(key)
    raw_params = init_params(k_params, IMAGE_SIZE, EMBEDDING, NUM_CLASSES)
    params = prepare_params(raw_params, IMAGE_SIZE)
    # Input in PyTorch NCHW convention: (B, 1, H, W)
    x = jax.random.normal(k_x, (BATCH, 1, IMAGE_SIZE, IMAGE_SIZE), jnp.float32)

    out = jax.jit(forward)(params, x)
    out = jax.block_until_ready(out)
    assert out.shape == (BATCH, NUM_CLASSES)
    assert bool(jnp.all(jnp.isfinite(out)))

    ref = reference_forward(raw_params, x)
    max_err = float(jnp.max(jnp.abs(out - ref)))
    assert bool(jnp.allclose(out, ref, atol=5e-2, rtol=5e-2)), (
        f"mismatch vs XLA reference: max abs err {max_err}")
    print("KERNEL_OK")
</pallas_src>

<mosaic_0001>
module attributes {stable_mosaic.version = 11 : i64} {
  func.func @_fused_conv12_kernel(%arg0: i32, %arg1: i32, %arg2: memref<1x432x9xbf16, #tpu.memory_space<vmem>>, %arg3: memref<9x32xbf16, #tpu.memory_space<vmem>>, %arg4: memref<1x32xf32, #tpu.memory_space<vmem>>, %arg5: memref<288x64xbf16, #tpu.memory_space<vmem>>, %arg6: memref<1x64xf32, #tpu.memory_space<vmem>>, %arg7: memref<1x8x8x64xbf16, #tpu.memory_space<vmem>>) attributes {dimension_semantics = [#tpu.dimension_semantics<parallel>, #tpu.dimension_semantics<parallel>], iteration_bounds = array<i64: 2, 1>, scalar_prefetch = 0 : i64, scratch_operands = 0 : i64, tpu.core_type = #tpu.core_type<tc>, window_params = [{transform_indices = @transform_0, window_bounds = array<i64: 1, 432, 9>}, {pipeline_mode = #tpu.pipeline_mode<synchronous>, transform_indices = @transform_1, window_bounds = array<i64: 9, 32>}, {pipeline_mode = #tpu.pipeline_mode<synchronous>, transform_indices = @transform_2, window_bounds = array<i64: 1, 32>}, {pipeline_mode = #tpu.pipeline_mode<synchronous>, transform_indices = @transform_3, window_bounds = array<i64: 288, 64>}, {pipeline_mode = #tpu.pipeline_mode<synchronous>, transform_indices = @transform_4, window_bounds = array<i64: 1, 64>}, {transform_indices = @transform_5, window_bounds = array<i64: 1, 8, 8, 64>}]} {
    %c16_i32 = arith.constant 16 : i32
    %0 = arith.muli %arg1, %c16_i32 : i32
    %c24_i32 = arith.constant 24 : i32
    %1 = arith.muli %0, %c24_i32 : i32
    %2 = tpu.assume_multiple %1, 8 : i32
    %c0 = arith.constant 0 : index
    %3 = arith.index_cast %2 : i32 to index
    %c0_0 = arith.constant 0 : index
    %4 = vector.load %arg2[%c0, %3, %c0_0] : memref<1x432x9xbf16, #tpu.memory_space<vmem>>, vector<1x432x9xbf16>
    %5 = vector.shape_cast %4 : vector<1x432x9xbf16> to vector<432x9xbf16>
    %c0_1 = arith.constant 0 : index
    %c0_2 = arith.constant 0 : index
    %6 = vector.load %arg3[%c0_1, %c0_2] : memref<9x32xbf16, #tpu.memory_space<vmem>>, vector<9x32xbf16>
    %cst = arith.constant dense<0.000000e+00> : vector<432x32xf32>
    %7 = tpu.matmul %5, %6, %cst {dimension_numbers = #tpu.dot_dimension_numbers<[1], [0], [0], [1], [0, 0, 1, 1], [], []>} : vector<432x9xbf16>, vector<9x32xbf16>, vector<432x32xf32> -> vector<432x32xf32>
    %c0_3 = arith.constant 0 : index
    %c0_4 = arith.constant 0 : index
    %8 = vector.load %arg4[%c0_3, %c0_4] : memref<1x32xf32, #tpu.memory_space<vmem>>, vector<1x32xf32>
    %9 = vector.broadcast %8 : vector<1x32xf32> to vector<432x32xf32>
    %10 = arith.addf %7, %9 : vector<432x32xf32>
    %cst_5 = arith.constant 0.000000e+00 : f32
    %11 = vector.broadcast %cst_5 : f32 to vector<432x32xf32>
    %12 = arith.maximumf %10, %11 : vector<432x32xf32>
    %13 = vector.shape_cast %12 : vector<432x32xf32> to vector<18x24x32xf32>
    %c1_i32 = arith.constant 1 : i32
    %14 = arith.subi %0, %c1_i32 : i32
    %15 = tpu.iota {dimensions = array<i32: 0>} : vector<18x24x32xi32>
    %16 = vector.broadcast %14 : i32 to vector<18x24x32xi32>
    %17 = arith.addi %16, %15 : vector<18x24x32xi32>
    %18 = tpu.iota {dimensions = array<i32: 1>} : vector<18x24x32xi32>
    %c1_i32_6 = arith.constant 1 : i32
    %19 = vector.broadcast %c1_i32_6 : i32 to vector<18x24x32xi32>
    %20 = arith.subi %18, %19 : vector<18x24x32xi32>
    %c0_i32 = arith.constant 0 : i32
    %21 = vector.broadcast %c0_i32 : i32 to vector<18x24x32xi32>
    %22 = arith.cmpi sge, %17, %21 : vector<18x24x32xi32>
    %c16_i32_7 = arith.constant 16 : i32
    %23 = vector.broadcast %c16_i32_7 : i32 to vector<18x24x32xi32>
    %24 = arith.cmpi slt, %17, %23 : vector<18x24x32xi32>
    %25 = arith.andi %22, %24 : vector<18x24x32xi1>
    %c0_i32_8 = arith.constant 0 : i32
    %26 = vector.broadcast %c0_i32_8 : i32 to vector<18x24x32xi32>
    %27 = arith.cmpi sge, %20, %26 : vector<18x24x32xi32>
    %28 = arith.andi %25, %27 : vector<18x24x32xi1>
    %c16_i32_9 = arith.constant 16 : i32
    %29 = vector.broadcast %c16_i32_9 : i32 to vector<18x24x32xi32>
    %30 = arith.cmpi slt, %20, %29 : vector<18x24x32xi32>
    %31 = arith.andi %28, %30 : vector<18x24x32xi1>
    %cst_10 = arith.constant 0.000000e+00 : f32
    %32 = vector.broadcast %cst_10 : f32 to vector<18x24x32xf32>
    %33 = arith.select %31, %13, %32 : vector<18x24x32xi1>, vector<18x24x32xf32>
    %34 = vector.extract_strided_slice %33 {offsets = [0, 0, 0], sizes = [16, 16, 32], strides = [1, 1, 1]} : vector<18x24x32xf32> to vector<16x16x32xf32>
    %35 = vector.extract_strided_slice %33 {offsets = [0, 1, 0], sizes = [16, 16, 32], strides = [1, 1, 1]} : vector<18x24x32xf32> to vector<16x16x32xf32>
    %36 = vector.extract_strided_slice %33 {offsets = [0, 2, 0], sizes = [16, 16, 32], strides = [1, 1, 1]} : vector<18x24x32xf32> to vector<16x16x32xf32>
    %37 = vector.extract_strided_slice %33 {offsets = [1, 0, 0], sizes = [16, 16, 32], strides = [1, 1, 1]} : vector<18x24x32xf32> to vector<16x16x32xf32>
    %38 = vector.extract_strided_slice %33 {offsets = [1, 1, 0], sizes = [16, 16, 32], strides = [1, 1, 1]} : vector<18x24x32xf32> to vector<16x16x32xf32>
    %39 = vector.extract_strided_slice %33 {offsets = [1, 2, 0], sizes = [16, 16, 32], strides = [1, 1, 1]} : vector<18x24x32xf32> to vector<16x16x32xf32>
    %40 = vector.extract_strided_slice %33 {offsets = [2, 0, 0], sizes = [16, 16, 32], strides = [1, 1, 1]} : vector<18x24x32xf32> to vector<16x16x32xf32>
    %41 = vector.extract_strided_slice %33 {offsets = [2, 1, 0], sizes = [16, 16, 32], strides = [1, 1, 1]} : vector<18x24x32xf32> to vector<16x16x32xf32>
    %42 = vector.extract_strided_slice %33 {offsets = [2, 2, 0], sizes = [16, 16, 32], strides = [1, 1, 1]} : vector<18x24x32xf32> to vector<16x16x32xf32>
    %43 = tpu.concatenate %34, %35, %36, %37, %38, %39, %40, %41, %42 in 2 : vector<16x16x32xf32>, vector<16x16x32xf32>, vector<16x16x32xf32>, vector<16x16x32xf32>, vector<16x16x32xf32>, vector<16x16x32xf32>, vector<16x16x32xf32>, vector<16x16x32xf32>, vector<16x16x32xf32> -> vector<16x16x288xf32>
    %44 = vector.shape_cast %43 : vector<16x16x288xf32> to vector<256x288xf32>
    %45 = arith.truncf %44 : vector<256x288xf32> to vector<256x288xbf16>
    %c0_11 = arith.constant 0 : index
    %c0_12 = arith.constant 0 : index
    %46 = vector.load %arg5[%c0_11, %c0_12] : memref<288x64xbf16, #tpu.memory_space<vmem>>, vector<288x64xbf16>
    %cst_13 = arith.constant dense<0.000000e+00> : vector<256x64xf32>
    %47 = tpu.matmul %45, %46, %cst_13 {dimension_numbers = #tpu.dot_dimension_numbers<[1], [0], [0], [1], [0, 0, 1, 1], [], []>} : vector<256x288xbf16>, vector<288x64xbf16>, vector<256x64xf32> -> vector<256x64xf32>
    %c0_14 = arith.constant 0 : index
    %c0_15 = arith.constant 0 : index
    %48 = vector.load %arg6[%c0_14, %c0_15] : memref<1x64xf32, #tpu.memory_space<vmem>>, vector<1x64xf32>
    %49 = vector.broadcast %48 : vector<1x64xf32> to vector<256x64xf32>
    %50 = arith.addf %47, %49 : vector<256x64xf32>
    %cst_16 = arith.constant 0.000000e+00 : f32
    %51 = vector.broadcast %cst_16 : f32 to vector<256x64xf32>
    %52 = arith.maximumf %50, %51 : vector<256x64xf32>
    %53 = vector.shape_cast %52 : vector<256x64xf32> to vector<16x8x2x64xf32>
    %54 = vector.extract_strided_slice %53 {offsets = [0, 0, 0, 0], sizes = [16, 8, 1, 64], strides = [1, 1, 1, 1]} : vector<16x8x2x64xf32> to vector<16x8x1x64xf32>
    %55 = vector.shape_cast %54 : vector<16x8x1x64xf32> to vector<16x8x64xf32>
    %56 = vector.extract_strided_slice %53 {offsets = [0, 0, 1, 0], sizes = [16, 8, 1, 64], strides = [1, 1, 1, 1]} : vector<16x8x2x64xf32> to vector<16x8x1x64xf32>
    %57 = vector.shape_cast %56 : vector<16x8x1x64xf32> to vector<16x8x64xf32>
    %58 = arith.maximumf %55, %57 : vector<16x8x64xf32>
    %59 = vector.shape_cast %58 : vector<16x8x64xf32> to vector<8x2x8x64xf32>
    %60 = vector.extract_strided_slice %59 {offsets = [0, 0, 0, 0], sizes = [8, 1, 8, 64], strides = [1, 1, 1, 1]} : vector<8x2x8x64xf32> to vector<8x1x8x64xf32>
    %61 = vector.shape_cast %60 : vector<8x1x8x64xf32> to vector<8x8x64xf32>
    %62 = vector.extract_strided_slice %59 {offsets = [0, 1, 0, 0], sizes = [8, 1, 8, 64], strides = [1, 1, 1, 1]} : vector<8x2x8x64xf32> to vector<8x1x8x64xf32>
    %63 = vector.shape_cast %62 : vector<8x1x8x64xf32> to vector<8x8x64xf32>
    %64 = arith.maximumf %61, %63 : vector<8x8x64xf32>
    %65 = arith.truncf %64 : vector<8x8x64xf32> to vector<8x8x64xbf16>
    %c0_17 = arith.constant 0 : index
    %c0_18 = arith.constant 0 : index
    %c0_19 = arith.constant 0 : index
    %c0_20 = arith.constant 0 : index
    %66 = vector.load %arg7[%c0_17, %c0_18, %c0_19, %c0_20] : memref<1x8x8x64xbf16, #tpu.memory_space<vmem>>, vector<1x8x8x64xbf16>
    %67 = vector.shape_cast %66 : vector<1x8x8x64xbf16> to vector<8x8x64xbf16>
    %68 = vector.shape_cast %65 : vector<8x8x64xbf16> to vector<1x8x8x64xbf16>
    tpu.vector_store %arg7[%c0_17, %c0_18, %c0_19, %c0_20], %68 {strides = array<i32>} : memref<1x8x8x64xbf16, #tpu.memory_space<vmem>>, vector<1x8x8x64xbf16>,
    return
  }
  func.func @transform_0(%arg0: i32, %arg1: i32) -> (i32, i32, i32) {
    %c0_i32 = arith.constant 0 : i32
    %c0_i32_0 = arith.constant 0 : i32
    %c0_i32_1 = arith.constant 0 : i32
    return %arg0, %c0_i32, %c0_i32_0 : i32, i32, i32
  }
  func.func @transform_1(%arg0: i32, %arg1: i32) -> (i32, i32) {
    %c0_i32 = arith.constant 0 : i32
    %c0_i32_0 = arith.constant 0 : i32
    %c0_i32_1 = arith.constant 0 : i32
    return %c0_i32, %c0_i32_0 : i32, i32
  }
  func.func @transform_2(%arg0: i32, %arg1: i32) -> (i32, i32) {
    %c0_i32 = arith.constant 0 : i32
    %c0_i32_0 = arith.constant 0 : i32
    %c0_i32_1 = arith.constant 0 : i32
    return %c0_i32, %c0_i32_0 : i32, i32
  }
  func.func @transform_3(%arg0: i32, %arg1: i32) -> (i32, i32) {
    %c0_i32 = arith.constant 0 : i32
    %c0_i32_0 = arith.constant 0 : i32
    %c0_i32_1 = arith.constant 0 : i32
    return %c0_i32, %c0_i32_0 : i32, i32
  }
  func.func @transform_4(%arg0: i32, %arg1: i32) -> (i32, i32) {
    %c0_i32 = arith.constant 0 : i32
    %c0_i32_0 = arith.constant 0 : i32
    %c0_i32_1 = arith.constant 0 : i32
    return %c0_i32, %c0_i32_0 : i32, i32
  }
  func.func @transform_5(%arg0: i32, %arg1: i32) -> (i32, i32, i32, i32) {
    %c0_i32 = arith.constant 0 : i32
    %c0_i32_0 = arith.constant 0 : i32
    %c0_i32_1 = arith.constant 0 : i32
    return %arg0, %arg1, %c0_i32, %c0_i32_0 : i32, i32, i32, i32
  }
}

module attributes {stable_mosaic.version = 11 : i64} {
  func.func @_conv3_pool_kernel(%arg0: i32, %arg1: i32, %arg2: memref<1x8x8x64xbf16, #tpu.memory_space<vmem>>, %arg3: memref<576x128xbf16, #tpu.memory_space<vmem>>, %arg4: memref<1x128xf32, #tpu.memory_space<vmem>>, %arg5: memref<1x4x4x128xbf16, #tpu.memory_space<vmem>>) attributes {dimension_semantics = [#tpu.dimension_semantics<parallel>, #tpu.dimension_semantics<parallel>], iteration_bounds = array<i64: 2, 1>, scalar_prefetch = 0 : i64, scratch_operands = 0 : i64, tpu.core_type = #tpu.core_type<tc>, window_params = [{transform_indices = @transform_0, window_bounds = array<i64: 1, 8, 8, 64>}, {pipeline_mode = #tpu.pipeline_mode<synchronous>, transform_indices = @transform_1, window_bounds = array<i64: 576, 128>}, {pipeline_mode = #tpu.pipeline_mode<synchronous>, transform_indices = @transform_2, window_bounds = array<i64: 1, 128>}, {transform_indices = @transform_3, window_bounds = array<i64: 1, 4, 4, 128>}]} {
    %c8_i32 = arith.constant 8 : i32
    %0 = arith.muli %arg1, %c8_i32 : i32
    %1 = tpu.assume_multiple %0, 8 : i32
    %c1_i32 = arith.constant 1 : i32
    %2 = arith.subi %0, %c1_i32 : i32
    %c0_i32 = arith.constant 0 : i32
    %3 = arith.maxsi %2, %c0_i32 : i32
    %c0 = arith.constant 0 : index
    %4 = arith.index_cast %3 : i32 to index
    %c0_0 = arith.constant 0 : index
    %c0_1 = arith.constant 0 : index
    %5 = vector.load %arg2[%c0, %4, %c0_0, %c0_1] : memref<1x8x8x64xbf16, #tpu.memory_space<vmem>>, vector<1x1x8x64xbf16>
    %6 = vector.shape_cast %5 : vector<1x1x8x64xbf16> to vector<1x8x64xbf16>
    %7 = arith.extf %6 : vector<1x8x64xbf16> to vector<1x8x64xf32>
    %c0_2 = arith.constant 0 : index
    %8 = arith.index_cast %1 : i32 to index
    %c0_3 = arith.constant 0 : index
    %c0_4 = arith.constant 0 : index
    %9 = vector.load %arg2[%c0_2, %8, %c0_3, %c0_4] : memref<1x8x8x64xbf16, #tpu.memory_space<vmem>>, vector<1x8x8x64xbf16>
    %10 = vector.shape_cast %9 : vector<1x8x8x64xbf16> to vector<8x8x64xbf16>
    %11 = arith.extf %10 : vector<8x8x64xbf16> to vector<8x8x64xf32>
    %c8_i32_5 = arith.constant 8 : i32
    %12 = arith.addi %0, %c8_i32_5 : i32
    %c7_i32 = arith.constant 7 : i32
    %13 = arith.minsi %12, %c7_i32 : i32
    %c0_6 = arith.constant 0 : index
    %14 = arith.index_cast %13 : i32 to index
    %c0_7 = arith.constant 0 : index
    %c0_8 = arith.constant 0 : index
    %15 = vector.load %arg2[%c0_6, %14, %c0_7, %c0_8] : memref<1x8x8x64xbf16, #tpu.memory_space<vmem>>, vector<1x1x8x64xbf16>
    %16 = vector.shape_cast %15 : vector<1x1x8x64xbf16> to vector<1x8x64xbf16>
    %17 = arith.extf %16 : vector<1x8x64xbf16> to vector<1x8x64xf32>
    %18 = tpu.concatenate %7, %11, %17 in 0 : vector<1x8x64xf32>, vector<8x8x64xf32>, vector<1x8x64xf32> -> vector<10x8x64xf32>
    %c1_i32_9 = arith.constant 1 : i32
    %19 = arith.subi %0, %c1_i32_9 : i32
    %20 = tpu.iota {dimensions = array<i32: 0>} : vector<10x8x64xi32>
    %21 = vector.broadcast %19 : i32 to vector<10x8x64xi32>
    %22 = arith.addi %21, %20 : vector<10x8x64xi32>
    %c0_i32_10 = arith.constant 0 : i32
    %23 = vector.broadcast %c0_i32_10 : i32 to vector<10x8x64xi32>
    %24 = arith.cmpi sge, %22, %23 : vector<10x8x64xi32>
    %c8_i32_11 = arith.constant 8 : i32
    %25 = vector.broadcast %c8_i32_11 : i32 to vector<10x8x64xi32>
    %26 = arith.cmpi slt, %22, %25 : vector<10x8x64xi32>
    %27 = arith.andi %24, %26 : vector<10x8x64xi1>
    %cst = arith.constant 0.000000e+00 : f32
    %28 = vector.broadcast %cst : f32 to vector<10x8x64xf32>
    %29 = arith.select %27, %18, %28 : vector<10x8x64xi1>, vector<10x8x64xf32>
    %cst_12 = arith.constant 0.000000e+00 : f32
    %30 = vector.broadcast %cst_12 : f32 to vector<10x1x64xf32>
    %31 = vector.extract_strided_slice %29 {offsets = [0, 0, 0], sizes = [10, 7, 64], strides = [1, 1, 1]} : vector<10x8x64xf32> to vector<10x7x64xf32>
    %32 = tpu.concatenate %30, %31 in 1 : vector<10x1x64xf32>, vector<10x7x64xf32> -> vector<10x8x64xf32>
    %33 = vector.extract_strided_slice %29 {offsets = [0, 1, 0], sizes = [10, 7, 64], strides = [1, 1, 1]} : vector<10x8x64xf32> to vector<10x7x64xf32>
    %34 = tpu.concatenate %33, %30 in 1 : vector<10x7x64xf32>, vector<10x1x64xf32> -> vector<10x8x64xf32>
    %35 = vector.extract_strided_slice %32 {offsets = [0, 0, 0], sizes = [8, 8, 64], strides = [1, 1, 1]} : vector<10x8x64xf32> to vector<8x8x64xf32>
    %36 = vector.extract_strided_slice %29 {offsets = [0, 0, 0], sizes = [8, 8, 64], strides = [1, 1, 1]} : vector<10x8x64xf32> to vector<8x8x64xf32>
    %37 = vector.extract_strided_slice %34 {offsets = [0, 0, 0], sizes = [8, 8, 64], strides = [1, 1, 1]} : vector<10x8x64xf32> to vector<8x8x64xf32>
    %38 = vector.extract_strided_slice %32 {offsets = [1, 0, 0], sizes = [8, 8, 64], strides = [1, 1, 1]} : vector<10x8x64xf32> to vector<8x8x64xf32>
    %39 = vector.extract_strided_slice %29 {offsets = [1, 0, 0], sizes = [8, 8, 64], strides = [1, 1, 1]} : vector<10x8x64xf32> to vector<8x8x64xf32>
    %40 = vector.extract_strided_slice %34 {offsets = [1, 0, 0], sizes = [8, 8, 64], strides = [1, 1, 1]} : vector<10x8x64xf32> to vector<8x8x64xf32>
    %41 = vector.extract_strided_slice %32 {offsets = [2, 0, 0], sizes = [8, 8, 64], strides = [1, 1, 1]} : vector<10x8x64xf32> to vector<8x8x64xf32>
    %42 = vector.extract_strided_slice %29 {offsets = [2, 0, 0], sizes = [8, 8, 64], strides = [1, 1, 1]} : vector<10x8x64xf32> to vector<8x8x64xf32>
    %43 = vector.extract_strided_slice %34 {offsets = [2, 0, 0], sizes = [8, 8, 64], strides = [1, 1, 1]} : vector<10x8x64xf32> to vector<8x8x64xf32>
    %44 = tpu.concatenate %35, %36, %37, %38, %39, %40, %41, %42, %43 in 2 : vector<8x8x64xf32>, vector<8x8x64xf32>, vector<8x8x64xf32>, vector<8x8x64xf32>, vector<8x8x64xf32>, vector<8x8x64xf32>, vector<8x8x64xf32>, vector<8x8x64xf32>, vector<8x8x64xf32> -> vector<8x8x576xf32>
    %45 = vector.shape_cast %44 : vector<8x8x576xf32> to vector<64x576xf32>
    %46 = arith.truncf %45 : vector<64x576xf32> to vector<64x576xbf16>
    %c0_13 = arith.constant 0 : index
    %c0_14 = arith.constant 0 : index
    %47 = vector.load %arg3[%c0_13, %c0_14] : memref<576x128xbf16, #tpu.memory_space<vmem>>, vector<576x128xbf16>
    %cst_15 = arith.constant dense<0.000000e+00> : vector<64x128xf32>
    %48 = tpu.matmul %46, %47, %cst_15 {dimension_numbers = #tpu.dot_dimension_numbers<[1], [0], [0], [1], [0, 0, 1, 1], [], []>} : vector<64x576xbf16>, vector<576x128xbf16>, vector<64x128xf32> -> vector<64x128xf32>
    %c0_16 = arith.constant 0 : index
    %c0_17 = arith.constant 0 : index
    %49 = vector.load %arg4[%c0_16, %c0_17] : memref<1x128xf32, #tpu.memory_space<vmem>>, vector<1x128xf32>
    %50 = vector.broadcast %49 : vector<1x128xf32> to vector<64x128xf32>
    %51 = arith.addf %48, %50 : vector<64x128xf32>
    %cst_18 = arith.constant 0.000000e+00 : f32
    %52 = vector.broadcast %cst_18 : f32 to vector<64x128xf32>
    %53 = arith.maximumf %51, %52 : vector<64x128xf32>
    %54 = vector.shape_cast %53 : vector<64x128xf32> to vector<8x4x2x128xf32>
    %55 = vector.extract_strided_slice %54 {offsets = [0, 0, 0, 0], sizes = [8, 4, 1, 128], strides = [1, 1, 1, 1]} : vector<8x4x2x128xf32> to vector<8x4x1x128xf32>
    %56 = vector.shape_cast %55 : vector<8x4x1x128xf32> to vector<8x4x128xf32>
    %57 = vector.extract_strided_slice %54 {offsets = [0, 0, 1, 0], sizes = [8, 4, 1, 128], strides = [1, 1, 1, 1]} : vector<8x4x2x128xf32> to vector<8x4x1x128xf32>
    %58 = vector.shape_cast %57 : vector<8x4x1x128xf32> to vector<8x4x128xf32>
    %59 = arith.maximumf %56, %58 : vector<8x4x128xf32>
    %60 = vector.shape_cast %59 : vector<8x4x128xf32> to vector<4x2x4x128xf32>
    %61 = vector.extract_strided_slice %60 {offsets = [0, 0, 0, 0], sizes = [4, 1, 4, 128], strides = [1, 1, 1, 1]} : vector<4x2x4x128xf32> to vector<4x1x4x128xf32>
    %62 = vector.shape_cast %61 : vector<4x1x4x128xf32> to vector<4x4x128xf32>
    %63 = vector.extract_strided_slice %60 {offsets = [0, 1, 0, 0], sizes = [4, 1, 4, 128], strides = [1, 1, 1, 1]} : vector<4x2x4x128xf32> to vector<4x1x4x128xf32>
    %64 = vector.shape_cast %63 : vector<4x1x4x128xf32> to vector<4x4x128xf32>
    %65 = arith.maximumf %62, %64 : vector<4x4x128xf32>
    %66 = arith.truncf %65 : vector<4x4x128xf32> to vector<4x4x128xbf16>
    %c0_19 = arith.constant 0 : index
    %c0_20 = arith.constant 0 : index
    %c0_21 = arith.constant 0 : index
    %c0_22 = arith.constant 0 : index
    %67 = vector.load %arg5[%c0_19, %c0_20, %c0_21, %c0_22] : memref<1x4x4x128xbf16, #tpu.memory_space<vmem>>, vector<1x4x4x128xbf16>
    %68 = vector.shape_cast %67 : vector<1x4x4x128xbf16> to vector<4x4x128xbf16>
    %69 = vector.shape_cast %66 : vector<4x4x128xbf16> to vector<1x4x4x128xbf16>
    tpu.vector_store %arg5[%c0_19, %c0_20, %c0_21, %c0_22], %69 {strides = array<i32>} : memref<1x4x4x128xbf16, #tpu.memory_space<vmem>>, vector<1x4x4x128xbf16>,
    return
  }
  func.func @transform_0(%arg0: i32, %arg1: i32) -> (i32, i32, i32, i32) {
    %c0_i32 = arith.constant 0 : i32
    %c0_i32_0 = arith.constant 0 : i32
    %c0_i32_1 = arith.constant 0 : i32
    %c0_i32_2 = arith.constant 0 : i32
    return %arg0, %c0_i32, %c0_i32_0, %c0_i32_1 : i32, i32, i32, i32
  }
  func.func @transform_1(%arg0: i32, %arg1: i32) -> (i32, i32) {
    %c0_i32 = arith.constant 0 : i32
    %c0_i32_0 = arith.constant 0 : i32
    %c0_i32_1 = arith.constant 0 : i32
    return %c0_i32, %c0_i32_0 : i32, i32
  }
  func.func @transform_2(%arg0: i32, %arg1: i32) -> (i32, i32) {
    %c0_i32 = arith.constant 0 : i32
    %c0_i32_0 = arith.constant 0 : i32
    %c0_i32_1 = arith.constant 0 : i32
    return %c0_i32, %c0_i32_0 : i32, i32
  }
  func.func @transform_3(%arg0: i32, %arg1: i32) -> (i32, i32, i32, i32) {
    %c0_i32 = arith.constant 0 : i32
    %c0_i32_0 = arith.constant 0 : i32
    %c0_i32_1 = arith.constant 0 : i32
    return %arg0, %arg1, %c0_i32, %c0_i32_0 : i32, i32, i32, i32
  }
}

module attributes {stable_mosaic.version = 11 : i64} {
  func.func @_fc_head_kernel(%arg0: i32, %arg1: memref<2x2048xbf16, #tpu.memory_space<vmem>>, %arg2: memref<2048x32xbf16, #tpu.memory_space<vmem>>, %arg3: memref<1x32xf32, #tpu.memory_space<vmem>>, %arg4: memref<32x3xf32, #tpu.memory_space<vmem>>, %arg5: memref<1x3xf32, #tpu.memory_space<vmem>>, %arg6: memref<2x3xf32, #tpu.memory_space<vmem>>, %arg7: memref<2x32xf32, #tpu.memory_space<vmem>>) attributes {dimension_semantics = [#tpu.dimension_semantics<arbitrary>], iteration_bounds = array<i64: 1>, scalar_prefetch = 0 : i64, scratch_operands = 1 : i64, tpu.core_type = #tpu.core_type<tc>, window_params = [{transform_indices = @transform_0, window_bounds = array<i64: 2, 2048>}, {transform_indices = @transform_1, window_bounds = array<i64: 2048, 32>}, {pipeline_mode = #tpu.pipeline_mode<synchronous>, transform_indices = @transform_2, window_bounds = array<i64: 1, 32>}, {pipeline_mode = #tpu.pipeline_mode<synchronous>, transform_indices = @transform_3, window_bounds = array<i64: 32, 3>}, {pipeline_mode = #tpu.pipeline_mode<synchronous>, transform_indices = @transform_4, window_bounds = array<i64: 1, 3>}, {pipeline_mode = #tpu.pipeline_mode<synchronous>, transform_indices = @transform_5, window_bounds = array<i64: 2, 3>}]} {
    %c0_i32 = arith.constant 0 : i32
    %0 = arith.cmpi eq, %arg0, %c0_i32 : i32
    %1 = arith.extui %0 : i1 to i32
    %c0_i32_0 = arith.constant 0 : i32
    %2 = arith.cmpi ne, %1, %c0_i32_0 : i32
    scf.if %2 {
      %cst_10 = arith.constant 0.000000e+00 : f32
      %12 = vector.broadcast %cst_10 : f32 to vector<2x32xf32>
      %c0_11 = arith.constant 0 : index
      %c0_12 = arith.constant 0 : index
      %13 = vector.load %arg7[%c0_11, %c0_12] : memref<2x32xf32, #tpu.memory_space<vmem>>, vector<2x32xf32>
      tpu.vector_store %arg7[%c0_11, %c0_12], %12 {strides = array<i32>} : memref<2x32xf32, #tpu.memory_space<vmem>>, vector<2x32xf32>,
    } else {
    }
    %c0 = arith.constant 0 : index
    %c0_1 = arith.constant 0 : index
    %3 = vector.load %arg7[%c0, %c0_1] : memref<2x32xf32, #tpu.memory_space<vmem>>, vector<2x32xf32>
    %c0_2 = arith.constant 0 : index
    %c0_3 = arith.constant 0 : index
    %4 = vector.load %arg1[%c0_2, %c0_3] : memref<2x2048xbf16, #tpu.memory_space<vmem>>, vector<2x2048xbf16>
    %c0_4 = arith.constant 0 : index
    %c0_5 = arith.constant 0 : index
    %5 = vector.load %arg2[%c0_4, %c0_5] : memref<2048x32xbf16, #tpu.memory_space<vmem>>, vector<2048x32xbf16>
    %cst = arith.constant dense<0.000000e+00> : vector<2x32xf32>
    %6 = tpu.matmul %4, %5, %cst {dimension_numbers = #tpu.dot_dimension_numbers<[1], [0], [0], [1], [0, 0, 1, 1], [], []>} : vector<2x2048xbf16>, vector<2048x32xbf16>, vector<2x32xf32> -> vector<2x32xf32>
    %7 = arith.addf %3, %6 : vector<2x32xf32>
    %c0_6 = arith.constant 0 : index
    %c0_7 = arith.constant 0 : index
    %8 = vector.load %arg7[%c0_6, %c0_7] : memref<2x32xf32, #tpu.memory_space<vmem>>, vector<2x32xf32>
    tpu.vector_store %arg7[%c0_6, %c0_7], %7 {strides = array<i32>} : memref<2x32xf32, #tpu.memory_space<vmem>>, vector<2x32xf32>,
    %c0_i32_8 = arith.constant 0 : i32
    %9 = arith.cmpi eq, %arg0, %c0_i32_8 : i32
    %10 = arith.extui %9 : i1 to i32
    %c0_i32_9 = arith.constant 0 : i32
    %11 = arith.cmpi ne, %10, %c0_i32_9 : i32
    scf.if %11 {
      %c0_10 = arith.constant 0 : index
      %c0_11 = arith.constant 0 : index
      %12 = vector.load %arg7[%c0_10, %c0_11] : memref<2x32xf32, #tpu.memory_space<vmem>>, vector<2x32xf32>
      %c0_12 = arith.constant 0 : index
      %c0_13 = arith.constant 0 : index
      %13 = vector.load %arg3[%c0_12, %c0_13] : memref<1x32xf32, #tpu.memory_space<vmem>>, vector<1x32xf32>
      %14 = vector.broadcast %13 : vector<1x32xf32> to vector<2x32xf32>
      %15 = arith.addf %12, %14 : vector<2x32xf32>
      %cst_14 = arith.constant 0.000000e+00 : f32
      %16 = vector.broadcast %cst_14 : f32 to vector<2x32xf32>
      %17 = arith.maximumf %15, %16 : vector<2x32xf32>
      %c0_15 = arith.constant 0 : index
      %c0_16 = arith.constant 0 : index
      %18 = vector.load %arg4[%c0_15, %c0_16] : memref<32x3xf32, #tpu.memory_space<vmem>>, vector<32x3xf32>
      %cst_17 = arith.constant dense<0.000000e+00> : vector<2x3xf32>
      %19 = tpu.matmul %17, %18, %cst_17 {dimension_numbers = #tpu.dot_dimension_numbers<[1], [0], [0], [1], [0, 0, 1, 1], [], []>} : vector<2x32xf32>, vector<32x3xf32>, vector<2x3xf32> -> vector<2x3xf32>
      %c0_18 = arith.constant 0 : index
      %c0_19 = arith.constant 0 : index
      %20 = vector.load %arg5[%c0_18, %c0_19] : memref<1x3xf32, #tpu.memory_space<vmem>>, vector<1x3xf32>
      %21 = vector.broadcast %20 : vector<1x3xf32> to vector<2x3xf32>
      %22 = arith.addf %19, %21 : vector<2x3xf32>
      %c0_20 = arith.constant 0 : index
      %c0_21 = arith.constant 0 : index
      %23 = vector.load %arg6[%c0_20, %c0_21] : memref<2x3xf32, #tpu.memory_space<vmem>>, vector<2x3xf32>
      tpu.vector_store %arg6[%c0_20, %c0_21], %22 {strides = array<i32>} : memref<2x3xf32, #tpu.memory_space<vmem>>, vector<2x3xf32>,
    } else {
    }
    return
  }
  func.func @transform_0(%arg0: i32) -> (i32, i32) {
    %c0_i32 = arith.constant 0 : i32
    %c0_i32_0 = arith.constant 0 : i32
    return %c0_i32, %arg0 : i32, i32
  }
  func.func @transform_1(%arg0: i32) -> (i32, i32) {
    %c0_i32 = arith.constant 0 : i32
    %c0_i32_0 = arith.constant 0 : i32
    return %arg0, %c0_i32 : i32, i32
  }
  func.func @transform_2(%arg0: i32) -> (i32, i32) {
    %c0_i32 = arith.constant 0 : i32
    %c0_i32_0 = arith.constant 0 : i32
    %c0_i32_1 = arith.constant 0 : i32
    return %c0_i32, %c0_i32_0 : i32, i32
  }
  func.func @transform_3(%arg0: i32) -> (i32, i32) {
    %c0_i32 = arith.constant 0 : i32
    %c0_i32_0 = arith.constant 0 : i32
    %c0_i32_1 = arith.constant 0 : i32
    return %c0_i32, %c0_i32_0 : i32, i32
  }
  func.func @transform_4(%arg0: i32) -> (i32, i32) {
    %c0_i32 = arith.constant 0 : i32
    %c0_i32_0 = arith.constant 0 : i32
    %c0_i32_1 = arith.constant 0 : i32
    return %c0_i32, %c0_i32_0 : i32, i32
  }
  func.func @transform_5(%arg0: i32) -> (i32, i32) {
    %c0_i32 = arith.constant 0 : i32
    %c0_i32_0 = arith.constant 0 : i32
    %c0_i32_1 = arith.constant 0 : i32
    return %c0_i32, %c0_i32_0 : i32, i32
  }
}

</mosaic_0001>

<bundles_post_ra>
// kernel: forward.4
= control target key start
LH: loop header
LB: loop body
LE: loop exit
PB: predicated region body
PF: predicated region fallthrough
CT: control target
= control target key end

     0   :  { %s1854_s12 = smov 0   ;;  %s1856_s13 = smov 0   ;;  %s2241_s0 = inlined_call_operand.vmem [shape: bf16[2,8,8,64], index: 0, kind: input, shape index: {}]   ;;  %s2242_s1 = inlined_call_operand.vmem [shape: bf16[576,128], index: 1, kind: input, shape index: {}]   ;;  %s2243_s2 = inlined_call_operand.vmem [shape: f32[1,128], index: 2, kind: input, shape index: {}]   ;;  %s2244_s3 = inlined_call_operand.vmem [shape: bf16[2,4,4,128], index: 3, kind: output, shape index: {}]  }
   0x1   :  { %s1858_s14 = smov 0  }
   0x2 LB: > { %s25_s15 = sadd.s32 1, %s1826_s13  ;;  %p1455_p0 = scmp.ge.s32.totalorder %s1830_s14, 1  ;;  %s1830_s14 = sphi %s1858_s14, %s13_s14   ;;  %s1826_s13 = sphi %s1856_s13, %s2246_s13   ;;  %s1822_s12 = sphi %s1854_s12, %s2245_s12  }
   0x3   : > { %p27_p1 = scmp.ge.s32.totalorder %s25_s15, 2  ;;  %p151_p2 = scmp.lt.s32.totalorder %s1830_s14, 3 }
   0x5   : > { %s2248_s15 = smov (%p27_p1, %s25_s15), 0  ;;  %p152_p3 = pnand %p1455_p0, %p151_p2 }
   0x6   : > { %p179_p4 = scmp.lt.s32.totalorder (!%p152_p3), %s1822_s12, 1  ;;  %s1832_s20 = smov (!%p152_p3), 64  }
   0x7   : > { %155 = sbr.rel (%p152_p3) target bundleno = 400 (0x190), region = 32 }
   0xc   : > { %s2250_s12 = smov (!%p179_p4, %s1822_s12), 1  ;;  %v1652_v15 = vld [vmem:[%s2242_s1 + $0x38] sm:$0xff]  ;;  %vm339_vm0 = vcmask 1046528   ;;  %v1651_v21 = vld [vmem:[%s2242_s1 + $0x30] sm:$0xff]  ;;  %vm308_vm1 = vcmask 1040384   ;;  %v1650_v31 = vld [vmem:[%s2242_s1 + $0x28] sm:$0xff] }
   0xd   : > { %s1643_s16 = sshll.u32 %s2250_s12, 5  ;;  %v1676_v16 = vld [vmem:[%s2242_s1 + $0xf8] sm:$0xff]  ;;  %1701 = vmatpush.bf16.msra.mxu2 %v1652_v15  ;;  %1700 = vmatpush.bf16.msra.mxu1 %v1652_v15  ;;  %v1675_v23 = vld [vmem:[%s2242_s1 + $0xf0] sm:$0xff]  ;;  %v1674_v32 = vld [vmem:[%s2242_s1 + $0xe8] sm:$0xff]  ;;  %vm444_vm2 = vcmask 523264   ;;  %vm1193_vm3 = vcmask 1041408  }
   0xe   : > { %s183_s19 = scalar_lea.vmem %s2241_s0, %s1643_s16  ;;  %879 = vmatpush.bf16.msra.mxu3 %v1676_v16  ;;  %792 = vmatpush.bf16.msra.mxu0 %v1652_v15  ;;  %v1649_v41 = vld [vmem:[%s2242_s1 + $0x20] sm:$0xff]  ;;  %v1648_v51 = vld [vmem:[%s2242_s1 + $0x18] sm:$0xff]  ;;  %v1647_v58 = vld [vmem:[%s2242_s1 + $0x10] sm:$0xff]  ;;  %vm1310_vm4 = vcmask 1041409   ;;  %vm1313_vm5 = vcmask 1042434   ;;  %vm1316_vm6 = vcmask 1043459  }
   0xf   : > { %v1682_v0 = vld [vmem:[%s183_s19] sm:$0xff]   ;;  %v1697_v1 = vld [vmem:[%s183_s19 + $0x8] sm:$0xff]   ;;  %v1698_v2 = vld [vmem:[%s183_s19 + $0x10] sm:$0xff]   ;;  %s1644_s27 = sshll.u32 %s2250_s12, 3 }
  0x10   : > { %v1878_v3 = vunpack.c.h.bf16 %v1682_v0  ;;  %v1880_v4 = vunpack.c.l.bf16 %v1697_v1  ;;  %v1882_v5 = vunpack.c.h.bf16 %v1697_v1  ;;  %v1884_v6 = vunpack.c.l.bf16 %v1698_v2  ;;  %v1699_v7 = vld [vmem:[%s183_s19 + $0x18] sm:$0xff]   ;;  %v1673_v42 = vld [vmem:[%s2242_s1 + $0xe0] sm:$0xff]  ;;  %v1671_v59 = vld [vmem:[%s2242_s1 + $0xd0] sm:$0xff]  ;;  %s2203_s29 = scalar_lea.vmem %s2244_s3, %s1644_s27 }
  0x11   : > { %v1888_v9 = vunpack.c.l.bf16 %v1682_v0  ;;  %v1893_v11 = vunpack.c.h.bf16 %v1698_v2  ;;  %v1895_v12 = vunpack.c.l.bf16 %v1699_v7  ;;  %1703 = vmatpush.bf16.msra.mxu2 %v1651_v21  ;;  %1702 = vmatpush.bf16.msra.mxu1 %v1651_v21  ;;  %v1942_v33 = vunpack.c.h.bf16 %v1699_v7  ;;  %v1672_v52 = vld [vmem:[%s2242_s1 + $0xd8] sm:$0xff]  ;;  %v1646_v0 = vld [vmem:[%s2242_s1 + $0x8] sm:$0xff]  ;;  %v1667_v15 = vld [vmem:[%s2242_s1 + $0xb0] sm:$0xff] }
  0x12   : > { %v1742_v8 = vpack.i.bf16 %v1880_v4, %v1878_v3  ;;  %v1752_v10 = vpack.i.bf16 %v1884_v6, %v1882_v5  ;;  %v321_v14 = vrot.slane %v1878_v3, 1  ;;  %v290_v20 = vrot.slane %v1878_v3, 7  ;;  %880 = vmatpush.bf16.msra.mxu3 %v1675_v23  ;;  %793 = vmatpush.bf16.msra.mxu0 %v1651_v21  ;;  %v1670_v1 = vld [vmem:[%s2242_s1 + $0xc8] sm:$0xff]  ;;  %v1669_v16 = vld [vmem:[%s2242_s1 + $0xc0] sm:$0xff]  ;;  %v1659_v21 = vld [vmem:[%s2242_s1 + $0x70] sm:$0xff] }
  0x13   : > { %v320_v13 = vrot.slane %v1888_v9, 1  ;;  %v289_v19 = vrot.slane %v1888_v9, 7  ;;  %v1747_v24 = vpack.i.bf16 %v1895_v12, %v1893_v11  ;;  %v322_v25 = vrot.slane %v1880_v4, 1  ;;  %v1658_v23 = vld [vmem:[%s2242_s1 + $0x68] sm:$0xff] }
  0x14   : > { %1743 = vrot.lane.b32.xlu0 %v1742_v8, %s1832_s20  ;;  %1753 = vrot.lane.b32.xlu1 %v1752_v10, %s1832_s20  ;;  %v1910_v18 = vsel %vm339_vm0, %v321_v14, 0.0  ;;  %v323_v26 = vrot.slane %v1882_v5, 1  ;;  %v291_v27 = vrot.slane %v1880_v4, 7  ;;  %v292_v28 = vrot.slane %v1882_v5, 7  ;;  %v1645_v10 = vld [vmem:[%s2242_s1] sm:$0xff] }
  0x15   : > { %v1907_v17 = vsel %vm339_vm0, %v320_v13, 0.0  ;;  %v1930_v29 = vsel %vm308_vm1, 0.0, %v289_v19  ;;  %v1933_v30 = vsel %vm308_vm1, 0.0, %v290_v20  ;;  %v1947_v34 = vsel %vm339_vm0, %v322_v25, 0.0  ;;  %1705 = vmatpush.bf16.msra.mxu2 %v1650_v31  ;;  %1704 = vmatpush.bf16.msra.mxu1 %v1650_v31  ;;  %v1668_v13 = vld [vmem:[%s2242_s1 + $0xb8] sm:$0xff]  ;;  %v1666_v20 = vld [vmem:[%s2242_s1 + $0xa8] sm:$0xff] }
  0x16   : > { %v1762_v22 = vpack.i.bf16 %v1910_v18, %v1907_v17  ;;  %v1950_v35 = vsel %vm339_vm0, %v323_v26, 0.0  ;;  %v1767_v36 = vpack.i.bf16 %v1933_v30, %v1930_v29  ;;  %v1955_v37 = vsel %vm308_vm1, 0.0, %v291_v27  ;;  %881 = vmatpush.bf16.msra.mxu3 %v1674_v32  ;;  %794 = vmatpush.bf16.msra.mxu0 %v1650_v31  ;;  %v1660_v19 = vld [vmem:[%s2242_s1 + $0x78] sm:$0xff]  ;;  %v1657_v25 = vld [vmem:[%s2242_s1 + $0x60] sm:$0xff]  ;;  %v1663_v26 = vld [vmem:[%s2242_s1 + $0x90] sm:$0xff] }
  0x17   : > { %v1958_v38 = vsel %vm308_vm1, 0.0, %v292_v28  ;;  %v324_v39 = vrot.slane %v1884_v6, 1  ;;  %v325_v40 = vrot.slane %v1893_v11, 1  ;;  %v1772_v43 = vpack.i.bf16 %v1950_v35, %v1947_v34  ;;  %v1680_v27 = vld [vmem:[%s2242_s1 + $0x118] sm:$0xff]  ;;  %v1662_v31 = vld [vmem:[%s2242_s1 + $0x88] sm:$0xff]  ;;  %v1679_v32 = vld [vmem:[%s2242_s1 + $0x110] sm:$0xff] }
  0x18   : > { %1763 = vrot.lane.b32.xlu2 %v1762_v22, %s1832_s20  ;;  %v1777_v44 = vpack.i.bf16 %v1958_v38, %v1955_v37  ;;  %v293_v45 = vrot.slane %v1884_v6, 7  ;;  %v294_v46 = vrot.slane %v1893_v11, 7  ;;  %v326_v47 = vrot.slane %v1895_v12, 1  ;;  %v1665_v22 = vld [vmem:[%s2242_s1 + $0xa0] sm:$0xff]  ;;  %v1656_v28 = vld [vmem:[%s2242_s1 + $0x58] sm:$0xff] }
  0x19   : > { %v327_v48 = vrot.slane %v1942_v33, 1  ;;  %v1978_v49 = vsel %vm339_vm0, %v324_v39, 0.0  ;;  %v1981_v50 = vsel %vm339_vm0, %v325_v40, 0.0  ;;  %1707 = vmatpush.bf16.msra.mxu2 %v1649_v41  ;;  %1706 = vmatpush.bf16.msra.mxu1 %v1649_v41  ;;  %v295_v62 = vrot.slane %v1895_v12, 7  ;;  %v1661_v39 = vld [vmem:[%s2242_s1 + $0x80] sm:$0xff]  ;;  %v1678_v40 = vld [vmem:[%s2242_s1 + $0x108] sm:$0xff] }
  0x1a   : > { %882 = vmatpush.bf16.msra.mxu3 %v1673_v42  ;;  %795 = vmatpush.bf16.msra.mxu0 %v1649_v41  ;;  %v1992_v53 = vsel %vm308_vm1, 0.0, %v293_v45  ;;  %v1995_v54 = vsel %vm308_vm1, 0.0, %v294_v46  ;;  %v1782_v55 = vpack.i.bf16 %v1981_v50, %v1978_v49  ;;  %v2000_v56 = vsel %vm339_vm0, %v326_v47, 0.0  ;;  %v1654_v41 = vld [vmem:[%s2242_s1 + $0x48] sm:$0xff]  ;;  %v1677_v42 = vld [vmem:[%s2242_s1 + $0x100] sm:$0xff] }
  0x1b   : > { %v2003_v57 = vsel %vm339_vm0, %v327_v48, 0.0  ;;  %v1787_v60 = vpack.i.bf16 %v1995_v54, %v1992_v53  ;;  %v296_v63 = vrot.slane %v1942_v33, 7  ;;  %v2027_v2 = vsel %vm308_vm1, 0.0, %v295_v62 }
  0x1c   : > { %1748 = vrot.lane.b32.xlu0 %v1747_v24, %s1832_s20  ;;  %1758 = vrot.lane.b32.xlu1 %v1888_v9, %s1832_s20  ;;  %v1792_v61 = vpack.i.bf16 %v2003_v57, %v2000_v56  ;;  %v1797_v8 = vpack.i.bf16 0.0, %v1942_v33  ;;  %v1664_v24 = vld [vmem:[%s2242_s1 + $0x98] sm:$0xff] }
  0x1d   : > { %1709 = vmatpush.bf16.msra.mxu2 %v1648_v51  ;;  %1708 = vmatpush.bf16.msra.mxu1 %v1648_v51  ;;  %v2030_v7 = vsel %vm308_vm1, 0.0, %v296_v63 }
  0x1e   : > { %883 = vmatpush.bf16.msra.mxu3 %v1672_v52  ;;  %796 = vmatpush.bf16.msra.mxu0 %v1648_v51  ;;  %v1802_v14 = vpack.i.bf16 %v2030_v7, %v2027_v2 }
  0x20   : > { %1768 = vrot.lane.b32.xlu2 %v1767_v36, %s1832_s20  ;;  %v1655_v36 = vld [vmem:[%s2242_s1 + $0x50] sm:$0xff] }
  0x21   : > { %1711 = vmatpush.bf16.msra.mxu2 %v1647_v58  ;;  %1710 = vmatpush.bf16.msra.mxu1 %v1647_v58 }
  0x22   : > { %884 = vmatpush.bf16.msra.mxu3 %v1671_v59  ;;  %797 = vmatpush.bf16.msra.mxu0 %v1647_v58 }
  0x24   : > { %1773 = vrot.lane.b32.xlu0 %v1772_v43, %s1832_s20  ;;  %1778 = vrot.lane.b32.xlu1 %v1777_v44, %s1832_s20  ;;  %v1653_v43 = vld [vmem:[%s2242_s1 + $0x40] sm:$0xff] }
  0x25   : > { %1713 = vmatpush.bf16.msra.mxu2 %v1646_v0  ;;  %1712 = vmatpush.bf16.msra.mxu1 %v1646_v0 }
  0x26   : > { %885 = vmatpush.bf16.msra.mxu3 %v1670_v1  ;;  %798 = vmatpush.bf16.msra.mxu0 %v1646_v0 }
  0x28   : > { %1783 = vrot.lane.b32.xlu2 %v1782_v55, %s1832_s20  ;;  %v1833_v55 = vmov 0.0  }
  0x29   : > { %1715 = vmatpush.bf16.msra.mxu2 %v1645_v10  ;;  %1714 = vmatpush.bf16.msra.mxu1 %v1645_v10  ;;  %v288_v58 = vrot.slane %v1833_v55, 7 }
  0x2a   : > { %799 = vmatpush.bf16.msra.mxu0 %v1645_v10  ;;  %886 = vmatpush.bf16.msra.mxu3 %v1669_v16 }
  0x2b   : > { %v309_v63 = vsel %vm308_vm1, 0.0, %v288_v58 }
  0x2c   : > { %1788 = vrot.lane.b32.xlu0 %v1787_v60, %s1832_s20  ;;  %1793 = vrot.lane.b32.xlu1 %v1792_v61, %s1832_s20 }
  0x2d   : > { %850 = vmatpush.bf16.msrb.mxu2 %v1668_v13  ;;  %821 = vmatpush.bf16.msrb.mxu1 %v1660_v19 }
  0x2e   : > { %912 = vmatpush.bf16.msrb.mxu0 %v1680_v27 }
  0x30   : > { %1798 = vrot.lane.b32.xlu2 %v1797_v8, %s1832_s20 }
  0x31   : > { %851 = vmatpush.bf16.msrb.mxu2 %v1667_v15  ;;  %822 = vmatpush.bf16.msrb.mxu1 %v1659_v21 }
  0x32   : > { %913 = vmatpush.bf16.msrb.mxu0 %v1679_v32 }
  0x34   : > { %1803 = vrot.lane.b32.xlu0 %v1802_v14, %s1832_s20 }
  0x35   : > { %852 = vmatpush.bf16.msrb.mxu2 %v1666_v20  ;;  %823 = vmatpush.bf16.msrb.mxu1 %v1658_v23 }
  0x36   : > { %914 = vmatpush.bf16.msrb.mxu0 %v1678_v40 }
  0x39   : > { %853 = vmatpush.bf16.msrb.mxu2 %v1665_v22  ;;  %824 = vmatpush.bf16.msrb.mxu1 %v1657_v25  ;;  %v319_v25 = vrot.slane %v1833_v55, 1 }
  0x3a   : > { %915 = vmatpush.bf16.msrb.mxu0 %v1677_v42 }
  0x3d   : > { %854 = vmatpush.bf16.msrb.mxu2 %v1664_v24  ;;  %825 = vmatpush.bf16.msrb.mxu1 %v1656_v28 }
  0x41   : > { %855 = vmatpush.bf16.msrb.mxu2 %v1663_v26  ;;  %826 = vmatpush.bf16.msrb.mxu1 %v1655_v36 }
  0x45   : > { %856 = vmatpush.bf16.msrb.mxu2 %v1662_v31  ;;  %827 = vmatpush.bf16.msrb.mxu1 %v1654_v41 }
  0x49   : > { %857 = vmatpush.bf16.msrb.mxu2 %v1661_v39  ;;  %828 = vmatpush.bf16.msrb.mxu1 %v1653_v43 }
  0x72   : > { %v1764_v19 = vpop.permute.xlu2 %1763 }
  0x73   : > { %v1766_v21 = vunpack.i.h.bf16 %v1764_v19 }
  0x75   : > { %v462_v23 = vsel %vm444_vm2, %v1878_v3, %v1766_v21 }
  0x7a   : > { %v1769_v24 = vpop.permute.xlu2 %1768 }
  0x7b   : > { %v1771_v27 = vunpack.i.h.bf16 %v1769_v24  ;;  %v1770_v28 = vunpack.i.l.bf16 %v1769_v24 }
  0x82   : > { %v1784_v3 = vpop.permute.xlu2 %1783 }
  0x86   : > { %v1744_v44 = vpop.permute.xlu0 %1743  ;;  %v1754_v47 = vpop.permute.xlu1 %1753 }
  0x87   : > { %v1746_v45 = vunpack.i.h.bf16 %v1744_v44  ;;  %v1745_v46 = vunpack.i.l.bf16 %v1744_v44  ;;  %v1756_v14 = vunpack.i.h.bf16 %v1754_v47  ;;  %v1755_v15 = vunpack.i.l.bf16 %v1754_v47 }
  0x89   : > { %v447_v48 = vsel %vm444_vm2, %v1933_v30, %v1745_v46  ;;  %v448_v51 = vsel %vm444_vm2, %v1955_v37, %v1746_v45  ;;  %v449_v20 = vsel %vm444_vm2, %v1958_v38, %v1755_v15  ;;  %v475_v38 = vpack.c.bf16 %v1947_v34, %v1910_v18 }
  0x8a   : > { %v474_v52 = vpack.c.bf16 %v448_v51, %v447_v48  ;;  %v1799_v44 = vpop.permute.xlu2 %1798  ;;  %v479_v46 = vpack.c.bf16 %v1978_v49, %v1950_v35 }
  0x8b   : > { %v1801_v48 = vunpack.i.h.bf16 %v1799_v44  ;;  %v1800_v51 = vunpack.i.l.bf16 %v1799_v44 }
  0x8c   : > { %805 = vmatmul.bf16.vlgmr.msra.gmra.mxu1 %v474_v52  ;;  %887 = vmatmul.bf16.vlgmr.msra.gmra.mxu3 %v474_v52 }
  0x8d   : > { %v470_v55 = vsel %vm444_vm2, %v309_v63, %v1801_v48 }
  0x8e   : > { %v1749_v59 = vpop.permute.xlu0 %1748  ;;  %v1759_v62 = vpop.permute.xlu1 %1758 }
  0x8f   : > { %v1751_v60 = vunpack.i.h.bf16 %v1749_v59  ;;  %v1750_v61 = vunpack.i.l.bf16 %v1749_v59  ;;  %v1761_v0 = vunpack.i.h.bf16 %v1759_v62  ;;  %v1760_v1 = vunpack.i.l.bf16 %v1759_v62 }
  0x91   : > { %v451_v30 = vsel %vm444_vm2, %v1995_v54, %v1750_v61  ;;  %v452_v37 = vsel %vm444_vm2, %v2027_v2, %v1751_v60  ;;  %v445_v10 = vsel %vm444_vm2, %v309_v63, %v1760_v1  ;;  %v446_v13 = vsel %vm444_vm2, %v1930_v29, %v1761_v0 }
  0x92   : > { %v482_v8 = vpack.c.bf16 %v452_v37, %v451_v30  ;;  %v471_v16 = vpack.c.bf16 %v446_v13, %v445_v10  ;;  %v450_v54 = vsel %vm444_vm2, %v1992_v53, %v1756_v14  ;;  %v1765_v2 = vunpack.i.l.bf16 %v1764_v19 }
  0x93   : > { %v478_v22 = vpack.c.bf16 %v450_v54, %v449_v20  ;;  %v340_v53 = vsel %vm339_vm0, %v319_v25, 0.0  ;;  %v1786_v60 = vunpack.i.h.bf16 %v1784_v3  ;;  %v1785_v61 = vunpack.i.l.bf16 %v1784_v3 }
  0x94   : > { %815 = vmatmul.bf16.vlgmr.msra.gmra.mxu2 %v482_v8  ;;  %800 = vmatmul.bf16.vlgmr.msra.gmra.mxu0 %v471_v16  ;;  %v461_v29 = vsel %vm444_vm2, %v1888_v9, %v1765_v2  ;;  %v453_v31 = vsel %vm444_vm2, %v340_v53, %v1770_v28  ;;  %v454_v9 = vsel %vm444_vm2, %v1907_v17, %v1771_v27 }
  0x95   : > { %v473_v26 = vpack.c.bf16 %v462_v23, %v461_v29  ;;  %v472_v36 = vpack.c.bf16 %v454_v9, %v453_v31  ;;  %v465_v62 = vsel %vm444_vm2, %v1884_v6, %v1785_v61 }
  0x96   : > { %v1774_v32 = vpop.permute.xlu0 %1773  ;;  %v1779_v43 = vpop.permute.xlu1 %1778 }
  0x97   : > { %v1776_v39 = vunpack.i.h.bf16 %v1774_v32  ;;  %v1775_v40 = vunpack.i.l.bf16 %v1774_v32  ;;  %v1781_v17 = vunpack.i.h.bf16 %v1779_v43  ;;  %v1780_v47 = vunpack.i.l.bf16 %v1779_v43 }
  0x99   : > { %v463_v41 = vsel %vm444_vm2, %v1880_v4, %v1775_v40  ;;  %v464_v42 = vsel %vm444_vm2, %v1882_v5, %v1776_v39  ;;  %v455_v52 = vsel %vm444_vm2, %v1910_v18, %v1780_v47  ;;  %v456_v4 = vsel %vm444_vm2, %v1947_v34, %v1781_v17 }
  0x9a   : > { %v477_v45 = vpack.c.bf16 %v464_v42, %v463_v41  ;;  %v469_v5 = vsel %vm444_vm2, %v2030_v7, %v1800_v51  ;;  %v476_v58 = vpack.c.bf16 %v456_v4, %v455_v52  ;;  %v466_v18 = vsel %vm444_vm2, %v1893_v11, %v1786_v60 }
  0x9b   : > { %v486_v59 = vpack.c.bf16 %v470_v55, %v469_v5  ;;  %v481_v1 = vpack.c.bf16 %v466_v18, %v465_v62  ;;  %v483_v7 = vpack.c.bf16 %v2000_v56, %v1981_v50 }
  0x9c   : > { %810 = vmatmul.bf16.gmra.mxu1 %v478_v22  ;;  %892 = vmatmul.bf16.gmra.mxu3 %v478_v22 }
  0x9e   : > { %v1789_v0 = vpop.permute.xlu0 %1788  ;;  %v1794_v6 = vpop.permute.xlu1 %1793 }
  0x9f   : > { %v1791_v34 = vunpack.i.h.bf16 %v1789_v0  ;;  %v1790_v30 = vunpack.i.l.bf16 %v1789_v0  ;;  %v1796_v10 = vunpack.i.h.bf16 %v1794_v6  ;;  %v1795_v11 = vunpack.i.l.bf16 %v1794_v6 }
  0xa1   : > { %v457_v63 = vsel %vm444_vm2, %v1950_v35, %v1790_v30  ;;  %v458_v37 = vsel %vm444_vm2, %v1978_v49, %v1791_v34  ;;  %v467_v13 = vsel %vm444_vm2, %v1895_v12, %v1795_v11  ;;  %v468_v14 = vsel %vm444_vm2, %v1942_v33, %v1796_v10 }
  0xa2   : > { %v485_v16 = vpack.c.bf16 %v468_v14, %v467_v13  ;;  %v487_v35 = vpack.c.bf16 %v340_v53, %v2003_v57 }
  0xa4   : > { %858 = vmatmul.bf16.vlgmr.msrb.gmra.mxu2 %v473_v26  ;;  %1605 = vmatmul.msk.bf16.vlgmr.msrb.gmra.mxu0 %vm444_vm2, %v475_v38 }
  0xa6   : > { %v1804_v15 = vpop.permute.xlu0 %1803 }
  0xa7   : > { %v1806_v19 = vunpack.i.h.bf16 %v1804_v15  ;;  %v1805_v20 = vunpack.i.l.bf16 %v1804_v15 }
  0xa9   : > { %v459_v49 = vsel %vm444_vm2, %v1981_v50, %v1805_v20  ;;  %v460_v54 = vsel %vm444_vm2, %v2000_v56, %v1806_v19  ;;  %v2176_v50 = vld [vmem:[%s2243_s2] ss:$0 sm:$0xff] }
  0xaa   : > { %v484_v21 = vpack.c.bf16 %v460_v54, %v459_v49 }
  0xac   : > { %829 = vmatmul.bf16.vlgmr.msrb.gmra.mxu1 %v472_v36  ;;  %897 = vmatmul.bf16.gmra.mxu3 %v482_v8  ;;  %v480_v8 = vpack.c.bf16 %v458_v37, %v457_v63 }
  0xb4   : > { %863 = vmatmul.bf16.gmra.mxu2 %v477_v45  ;;  %1606 = vmatmul.msk.bf16.gmra.mxu0 %vm444_vm2, %v479_v46 }
  0xbc   : > { %834 = vmatmul.bf16.gmra.mxu1 %v476_v58  ;;  %902 = vmatmul.bf16.gmra.mxu3 %v486_v59 }
  0xc4   : > { %868 = vmatmul.bf16.gmra.mxu2 %v481_v1  ;;  %1607 = vmatmul.msk.bf16.gmra.mxu0 %vm444_vm2, %v483_v7 }
  0xcc   : > { %839 = vmatmul.bf16.gmra.mxu1 %v480_v8 }
  0xd4   : > { %873 = vmatmul.bf16.gmra.mxu2 %v485_v16  ;;  %1608 = vmatmul.msk.bf16.gmra.mxu0 %vm444_vm2, %v487_v35 }
  0xdc   : > { %844 = vmatmul.bf16.gmra.mxu1 %v484_v21 }
 0x109   : > { %v806_v12 = vpop.f32.mrf.mxu1 }
 0x10a   : > { %v807_v46 = vadd.f32 %v2176_v50, %v806_v12 }
 0x10f   : > { %v888_v56 = vpop.f32.mrf.mxu3 }
 0x111   : > { %v808_v2 = vpop.f32.mrf.mxu1  ;;  %v801_v33 = vpop.f32.mrf.mxu0 }
 0x112   : > { %v802_v26 = vadd.f32 %v2176_v50, %v801_v33  ;;  %v809_v21 = vadd.f32 %v2176_v50, %v808_v2 }
 0x117   : > { %v2165_v22 = vpop.f32.mrf.mxu2  ;;  %v890_v32 = vpop.f32.mrf.mxu3 }
 0x119   : > { %v2167_v29 = vpop.f32.mrf.mxu1  ;;  %v803_v57 = vpop.f32.mrf.mxu0 }
 0x11a   : > { %v804_v3 = vadd.f32 %v2176_v50, %v803_v57  ;;  %v812_v2 = vadd.f32 %v2176_v50, %v2167_v29 }
 0x11f   : > { %v2169_v23 = vpop.f32.mrf.mxu2  ;;  %v893_v4 = vpop.f32.mrf.mxu3 }
 0x121   : > { %v2171_v24 = vpop.f32.mrf.mxu1  ;;  %v917_v27 = vpop.f32.mrf.mxu0 }
 0x127   : > { %v859_v25 = vpop.f32.mrf.mxu2 }
 0x129   : > { %v830_v38 = vpop.f32.mrf.mxu1  ;;  %v919_v42 = vpop.f32.mrf.mxu0 }
 0x12a   : > { %v831_v28 = vadd.f32 %v830_v38, %v802_v26 }
 0x12c   : > { %v860_v53 = vadd.f32 %v859_v25, %v831_v28  ;;  %v895_v25 = vpop.f32.mrf.mxu3 }
 0x12e   : > { %v889_v31 = vadd.f32 %v888_v56, %v860_v53 }
 0x12f   : > { %v861_v9 = vpop.f32.mrf.mxu2 }
 0x130   : > { %v918_v36 = vadd.f32 %v917_v27, %v889_v31 }
 0x131   : > { %v832_v39 = vpop.f32.mrf.mxu1  ;;  %v922_v7 = vpop.f32.mrf.mxu0 }
 0x132   : > { %v833_v40 = vadd.f32 %v832_v39, %v804_v3  ;;  %v937_v41 = vmax.f32 %v918_v36, 0.0 }
 0x134   : > { %v862_v43 = vadd.f32 %v861_v9, %v833_v40  ;;  %v953_v17 = vrot.slane %v937_v41, 2  ;;  %v954_v47 = vrot.slane %v937_v41, 4  ;;  %v955_v48 = vrot.slane %v937_v41, 6 }
 0x135   : > { %v1609_v5 = vrot.slane %v937_v41, 9 }
 0x136   : > { %v891_v44 = vadd.f32 %v890_v32, %v862_v43  ;;  %v1610_v59 = vrot.slane %v953_v17, 9  ;;  %v1611_v60 = vrot.slane %v954_v47, 9  ;;  %v1612_v61 = vrot.slane %v955_v48, 9 }
 0x137   : > { %v864_v45 = vpop.f32.mrf.mxu2  ;;  %v1097_v30 = vmax.f32 %v937_v41, %v1609_v5 }
 0x138   : > { %v920_v51 = vadd.f32 %v919_v42, %v891_v44  ;;  %v1098_v11 = vmax.f32 %v953_v17, %v1610_v59  ;;  %v1099_v13 = vmax.f32 %v954_v47, %v1611_v60  ;;  %v1100_v14 = vmax.f32 %v955_v48, %v1612_v61 }
 0x139   : > { %v835_v52 = vpop.f32.mrf.mxu1  ;;  %v924_v40 = vpop.f32.mrf.mxu0 }
 0x13a   : > { %v836_v55 = vadd.f32 %v835_v52, %v807_v46  ;;  %v938_v58 = vmax.f32 %v920_v51, 0.0 }
 0x13c   : > { %v865_v62 = vadd.f32 %v864_v45, %v836_v55  ;;  %v956_v18 = vrot.slane %v938_v58, 2  ;;  %v957_v0 = vrot.slane %v938_v58, 4  ;;  %v958_v1 = vrot.slane %v938_v58, 6 }
 0x13d   : > { %v1613_v34 = vrot.slane %v938_v58, 9 }
 0x13e   : > { %v894_v63 = vadd.f32 %v893_v4, %v865_v62  ;;  %v1614_v37 = vrot.slane %v956_v18, 9  ;;  %v1615_v6 = vrot.slane %v957_v0, 9  ;;  %v1616_v8 = vrot.slane %v958_v1, 9 }
 0x13f   : > { %v1101_v10 = vmax.f32 %v938_v58, %v1613_v34  ;;  %v866_v49 = vpop.f32.mrf.mxu2  ;;  %v898_v58 = vpop.f32.mrf.mxu3 }
 0x140   : > { %v923_v15 = vadd.f32 %v922_v7, %v894_v63  ;;  %v1102_v16 = vmax.f32 %v956_v18, %v1614_v37  ;;  %v1103_v19 = vmax.f32 %v957_v0, %v1615_v6  ;;  %v1104_v20 = vmax.f32 %v958_v1, %v1616_v8 }
 0x141   : > { %v1129_v35 = vmax.f32 %v1097_v30, %v1101_v10  ;;  %v837_v54 = vpop.f32.mrf.mxu1 }
 0x142   : > { %v1130_v12 = vmax.f32 %v1098_v11, %v1102_v16  ;;  %v1131_v33 = vmax.f32 %v1099_v13, %v1103_v19  ;;  %v1132_v57 = vmax.f32 %v1100_v14, %v1104_v20  ;;  %v939_v26 = vmax.f32 %v923_v15, 0.0  ;;  %v927_v15 = vpop.f32.mrf.mxu0 }
 0x143   : > { %v1145_v56 = vpack.c.bf16 %v1129_v35, %v1129_v35  ;;  %v838_v38 = vadd.f32 %v837_v54, %v809_v21 }
 0x144   : > { %v1146_v27 = vpack.c.bf16 %v1130_v12, %v1130_v12  ;;  %v1147_v28 = vpack.c.bf16 %v1131_v33, %v1131_v33  ;;  %v1148_v53 = vpack.c.bf16 %v1132_v57, %v1132_v57  ;;  %v959_v39 = vrot.slane %v939_v26, 2 }
 0x145   : > { %v1177_v31 = vrot.slane %v1145_v56, 2  ;;  %v867_v41 = vadd.f32 %v866_v49, %v838_v38  ;;  %v960_v45 = vrot.slane %v939_v26, 4  ;;  %v961_v48 = vrot.slane %v939_v26, 6 }
 0x146   : > { %v1178_v9 = vrot.slane %v1146_v27, 2  ;;  %v1179_v32 = vrot.slane %v1147_v28, 2  ;;  %v1180_v3 = vrot.slane %v1148_v53, 2  ;;  %v1617_v4 = vrot.slane %v939_v26, 9 }
 0x147   : > { %v1196_v36 = vsel %vm1193_vm3, %v1145_v56, %v1177_v31  ;;  %v896_v17 = vadd.f32 %v895_v25, %v867_v41  ;;  %v869_v51 = vpop.f32.mrf.mxu2  ;;  %v1618_v5 = vrot.slane %v959_v39, 9  ;;  %v1619_v55 = vrot.slane %v960_v45, 9 }
 0x148   : > { %1242 = vst [vmem:[#allocation1] ss:$2 sm:$0xff] %v1196_v36  ;;  %v1199_v42 = vsel %vm1193_vm3, %v1146_v27, %v1178_v9  ;;  %v1202_v43 = vsel %vm1193_vm3, %v1147_v28, %v1179_v32  ;;  %v1205_v44 = vsel %vm1193_vm3, %v1148_v53, %v1180_v3  ;;  %v1620_v60 = vrot.slane %v961_v48, 9 }
 0x149   : > { %v840_v46 = vpop.f32.mrf.mxu1  ;;  %1246 = vst [vmem:[#allocation1 + $0x10] ss:$2 sm:$0xff] %v1199_v42  ;;  %v925_v29 = vadd.f32 %v924_v40, %v896_v17  ;;  %v1105_v34 = vmax.f32 %v939_v26, %v1617_v4  ;;  %v1106_v30 = vmax.f32 %v959_v39, %v1618_v5  ;;  %v1107_v7 = vmax.f32 %v960_v45, %v1619_v55 }
 0x14a   : > { %v841_v47 = vadd.f32 %v840_v46, %v812_v2  ;;  %1250 = vst [vmem:[#allocation1 + $0x20] ss:$2 sm:$0xff] %v1202_v43  ;;  %v1108_v16 = vmax.f32 %v961_v48, %v1620_v60  ;;  %v814_v9 = vadd.f32 %v2176_v50, %v2171_v24  ;;  %v817_v24 = vadd.f32 %v2176_v50, %v2165_v22  ;;  %v900_v48 = vpop.f32.mrf.mxu3 }
 0x14b   : > { %1254 = vst [vmem:[#allocation1 + $0x30] ss:$2 sm:$0xff] %v1205_v44  ;;  %v940_v59 = vmax.f32 %v925_v29, 0.0 }
 0x14c   : > { %v870_v52 = vadd.f32 %v869_v51, %v841_v47 }
 0x14d   : > { %v962_v62 = vrot.slane %v940_v59, 2  ;;  %v963_v18 = vrot.slane %v940_v59, 4  ;;  %v964_v0 = vrot.slane %v940_v59, 6  ;;  %v1621_v1 = vrot.slane %v940_v59, 9 }
 0x14e   : > { %v899_v61 = vadd.f32 %v898_v58, %v870_v52 }
 0x14f   : > { %v1243_v63 = vld.sshfl [vmem:[#allocation1] sm:$0xff pattern:$0x75643120]  ;;  %v1622_v8 = vrot.slane %v962_v62, 9  ;;  %v1623_v10 = vrot.slane %v963_v18, 9  ;;  %v1624_v11 = vrot.slane %v964_v0, 9  ;;  %v1109_v13 = vmax.f32 %v940_v59, %v1621_v1  ;;  %v871_v38 = vpop.f32.mrf.mxu2  ;;  %v929_v59 = vpop.f32.mrf.mxu0 }
 0x150   : > { %v1247_v37 = vld.sshfl [vmem:[#allocation1 + $0x10] sm:$0xff pattern:$0x75643120]  ;;  %v928_v49 = vadd.f32 %v927_v15, %v899_v61  ;;  %v1293_v57 = vunpack.c.l.b16 %v1243_v63 }
 0x151   : > { %v842_v6 = vpop.f32.mrf.mxu1  ;;  %v1251_v14 = vld.sshfl [vmem:[#allocation1 + $0x20] sm:$0xff pattern:$0x75643120]  ;;  %v1294_v20 = vunpack.c.l.b16 %v1247_v37  ;;  %v1110_v54 = vmax.f32 %v962_v62, %v1622_v8  ;;  %v1111_v21 = vmax.f32 %v963_v18, %v1623_v10  ;;  %v1112_v12 = vmax.f32 %v964_v0, %v1624_v11 }
 0x152   : > { %v1255_v19 = vld.sshfl [vmem:[#allocation1 + $0x30] sm:$0xff pattern:$0x75643120]  ;;  %v1295_v35 = vunpack.c.l.b16 %v1251_v14  ;;  %v1133_v33 = vmax.f32 %v1105_v34, %v1109_v13  ;;  %v941_v3 = vmax.f32 %v928_v49, 0.0  ;;  %v843_v43 = vadd.f32 %v842_v6, %v814_v9  ;;  %v903_v13 = vpop.f32.mrf.mxu3 }
 0x153   : > { %v1296_v56 = vunpack.c.l.b16 %v1255_v19  ;;  %v1309_v25 = vrot.slane %v1294_v20, 7  ;;  %v1134_v27 = vmax.f32 %v1106_v30, %v1110_v54  ;;  %v1135_v28 = vmax.f32 %v1107_v7, %v1111_v21 }
 0x154   : > { %v1312_v26 = vrot.slane %v1295_v35, 6  ;;  %v1136_v53 = vmax.f32 %v1108_v16, %v1112_v12  ;;  %v1149_v31 = vpack.c.bf16 %v1133_v33, %v1133_v33  ;;  %v965_v29 = vrot.slane %v941_v3, 2 }
 0x155   : > { %v1311_v32 = vsel %vm1310_vm4, %v1309_v25, %v1293_v57  ;;  %v1150_v36 = vpack.c.bf16 %v1134_v27, %v1134_v27  ;;  %v1151_v2 = vpack.c.bf16 %v1135_v28, %v1135_v28  ;;  %v1315_v42 = vrot.slane %v1296_v56, 5 }
 0x156   : > { %v1152_v39 = vpack.c.bf16 %v1136_v53, %v1136_v53  ;;  %v1181_v40 = vrot.slane %v1149_v31, 2  ;;  %v1314_v41 = vsel %vm1313_vm5, %v1312_v26, %v1311_v32  ;;  %v966_v52 = vrot.slane %v941_v3, 4 }
 0x157   : > { %v1182_v45 = vrot.slane %v1150_v36, 2  ;;  %v1183_v46 = vrot.slane %v1151_v2, 2  ;;  %v1317_v51 = vsel %vm1316_vm6, %v1315_v42, %v1314_v41  ;;  %v872_v60 = vadd.f32 %v871_v38, %v843_v43  ;;  %v874_v1 = vpop.f32.mrf.mxu2  ;;  %v932_v53 = vpop.f32.mrf.mxu0 }
 0x158   : > { %v1184_v17 = vrot.slane %v1152_v39, 2  ;;  %v1208_v47 = vsel %vm1193_vm3, %v1149_v31, %v1181_v40  ;;  %v1336_v58 = vpack.c.b16 %v1317_v51, %v1317_v51  ;;  %v967_v62 = vrot.slane %v941_v3, 6 }
 0x159   : > { %v845_v44 = vpop.f32.mrf.mxu1  ;;  %1257 = vst [vmem:[#allocation1] ss:$2 sm:$0xff] %v1208_v47  ;;  %v1211_v4 = vsel %vm1193_vm3, %v1150_v36, %v1182_v45  ;;  %v1214_v5 = vsel %vm1193_vm3, %v1151_v2, %v1183_v46  ;;  %v1625_v18 = vrot.slane %v941_v3, 9  ;;  %v901_v0 = vadd.f32 %v900_v48, %v872_v60 }
 0x15a   : > { %v1217_v55 = vsel %vm1193_vm3, %v1152_v39, %v1184_v17  ;;  %1260 = vst [vmem:[#allocation1 + $0x10] ss:$2 sm:$0xff] %v1211_v4  ;;  %v846_v61 = vadd.f32 %v845_v44, %v817_v24  ;;  %v1340_v22 = vrot.slane %v1336_v58, 2  ;;  %v1626_v30 = vrot.slane %v965_v29, 9 }
 0x15b   : > { %1263 = vst [vmem:[#allocation1 + $0x20] ss:$2 sm:$0xff] %v1214_v5  ;;  %v1627_v7 = vrot.slane %v966_v52, 9  ;;  %v930_v37 = vadd.f32 %v929_v59, %v901_v0  ;;  %v1628_v6 = vrot.slane %v967_v62, 9  ;;  %v819_v8 = vadd.f32 %v2176_v50, %v2169_v23 }
 0x15c   : > { %1266 = vst [vmem:[#allocation1 + $0x30] ss:$2 sm:$0xff] %v1217_v55  ;;  %v1346_v34 = vsel %vm1193_vm3, %v1336_v58, %v1340_v22  ;;  %v875_v63 = vadd.f32 %v874_v1, %v846_v61  ;;  %v1113_v15 = vmax.f32 %v941_v3, %v1625_v18  ;;  %v1114_v16 = vmax.f32 %v965_v29, %v1626_v30  ;;  %v905_v55 = vpop.f32.mrf.mxu3 }
 0x15d   : > { %1360 = vst [vmem:[%s2203_s29] sm:$0x3] %v1346_v34  ;;  %v942_v10 = vmax.f32 %v930_v37, 0.0  ;;  %v1115_v19 = vmax.f32 %v966_v52, %v1627_v7  ;;  %v1116_v33 = vmax.f32 %v967_v62, %v1628_v6 }
 0x15e   : > { %v904_v35 = vadd.f32 %v903_v13, %v875_v63 }
 0x15f   : > { %v968_v49 = vrot.slane %v942_v10, 2  ;;  %v969_v54 = vrot.slane %v942_v10, 4  ;;  %v970_v21 = vrot.slane %v942_v10, 6  ;;  %v1629_v12 = vrot.slane %v942_v10, 9  ;;  %v876_v41 = vpop.f32.mrf.mxu2  ;;  %v934_v37 = vpop.f32.mrf.mxu0 }
 0x160   : > { %v1258_v11 = vld.sshfl [vmem:[#allocation1] sm:$0xff pattern:$0x75643120]  ;;  %v933_v3 = vadd.f32 %v932_v53, %v904_v35 }
 0x161   : > { %v847_v14 = vpop.f32.mrf.mxu1  ;;  %v1261_v20 = vld.sshfl [vmem:[#allocation1 + $0x10] sm:$0xff pattern:$0x75643120]  ;;  %v1297_v25 = vunpack.c.l.b16 %v1258_v11  ;;  %v1630_v23 = vrot.slane %v968_v49, 9  ;;  %v1631_v50 = vrot.slane %v969_v54, 9  ;;  %v1632_v27 = vrot.slane %v970_v21, 9 }
 0x162   : > { %v1264_v57 = vld.sshfl [vmem:[#allocation1 + $0x20] sm:$0xff pattern:$0x75643120]  ;;  %v1298_v26 = vunpack.c.l.b16 %v1261_v20  ;;  %v848_v38 = vadd.f32 %v847_v14, %v819_v8  ;;  %v1117_v28 = vmax.f32 %v942_v10, %v1629_v12  ;;  %v943_v51 = vmax.f32 %v933_v3, 0.0 }
 0x163   : > { %v1267_v56 = vld.sshfl [vmem:[#allocation1 + $0x30] sm:$0xff pattern:$0x75643120]  ;;  %v1299_v31 = vunpack.c.l.b16 %v1264_v57  ;;  %v1118_v36 = vmax.f32 %v968_v49, %v1630_v23  ;;  %v1119_v2 = vmax.f32 %v969_v54, %v1631_v50  ;;  %v1120_v39 = vmax.f32 %v970_v21, %v1632_v27 }
 0x164   : > { %v1300_v9 = vunpack.c.l.b16 %v1267_v56  ;;  %v1318_v32 = vrot.slane %v1298_v26, 7  ;;  %v1137_v40 = vmax.f32 %v1113_v15, %v1117_v28  ;;  %v877_v44 = vadd.f32 %v876_v41, %v848_v38 }
 0x165   : > { %v1320_v43 = vrot.slane %v1299_v31, 6  ;;  %v1138_v45 = vmax.f32 %v1114_v16, %v1118_v36  ;;  %v1139_v46 = vmax.f32 %v1115_v19, %v1119_v2  ;;  %v1140_v17 = vmax.f32 %v1116_v33, %v1120_v39 }
 0x166   : > { %v1319_v42 = vsel %vm1310_vm4, %v1318_v32, %v1297_v25  ;;  %v1153_v47 = vpack.c.bf16 %v1137_v40, %v1137_v40  ;;  %v1322_v48 = vrot.slane %v1300_v9, 5  ;;  %v906_v59 = vadd.f32 %v905_v55, %v877_v44 }
 0x167   : > { %v1321_v24 = vsel %vm1313_vm5, %v1320_v43, %v1319_v42  ;;  %v1154_v29 = vpack.c.bf16 %v1138_v45, %v1138_v45  ;;  %v1155_v52 = vpack.c.bf16 %v1139_v46, %v1139_v46  ;;  %v1156_v4 = vpack.c.bf16 %v1140_v17, %v1140_v17 }
 0x168   : > { %v1185_v5 = vrot.slane %v1153_v47, 2  ;;  %v1323_v58 = vsel %vm1316_vm6, %v1322_v48, %v1321_v24  ;;  %v971_v0 = vrot.slane %v943_v51, 2  ;;  %v972_v1 = vrot.slane %v943_v51, 4 }
 0x169   : > { %v1186_v60 = vrot.slane %v1154_v29, 2  ;;  %v1187_v61 = vrot.slane %v1155_v52, 2  ;;  %v1188_v22 = vrot.slane %v1156_v4, 2  ;;  %v1337_v18 = vpack.c.b16 %v1323_v58, %v1323_v58 }
 0x16a   : > { %v1220_v62 = vsel %vm1193_vm3, %v1153_v47, %v1185_v5  ;;  %v973_v63 = vrot.slane %v943_v51, 6  ;;  %v935_v8 = vadd.f32 %v934_v37, %v906_v59  ;;  %v1633_v10 = vrot.slane %v943_v51, 9 }
 0x16b   : > { %1269 = vst [vmem:[#allocation1] ss:$2 sm:$0xff] %v1220_v62  ;;  %v1223_v34 = vsel %vm1193_vm3, %v1154_v29, %v1186_v60  ;;  %v1226_v30 = vsel %vm1193_vm3, %v1155_v52, %v1187_v61  ;;  %v1229_v7 = vsel %vm1193_vm3, %v1156_v4, %v1188_v22  ;;  %v1341_v6 = vrot.slane %v1337_v18, 2 }
 0x16c   : > { %1272 = vst [vmem:[#allocation1 + $0x10] ss:$2 sm:$0xff] %v1223_v34  ;;  %v944_v13 = vmax.f32 %v935_v8, 0.0  ;;  %v1634_v14 = vrot.slane %v971_v0, 9  ;;  %v1635_v15 = vrot.slane %v972_v1, 9  ;;  %v1636_v16 = vrot.slane %v973_v63, 9 }
 0x16d   : > { %1275 = vst [vmem:[#allocation1 + $0x20] ss:$2 sm:$0xff] %v1226_v30  ;;  %v1349_v11 = vsel %vm1193_vm3, %v1337_v18, %v1341_v6  ;;  %v1121_v54 = vmax.f32 %v943_v51, %v1633_v10 }
 0x16e   : > { %1278 = vst [vmem:[#allocation1 + $0x30] ss:$2 sm:$0xff] %v1229_v7  ;;  %v974_v19 = vrot.slane %v944_v13, 2  ;;  %v975_v20 = vrot.slane %v944_v13, 4  ;;  %v976_v35 = vrot.slane %v944_v13, 6  ;;  %v1637_v49 = vrot.slane %v944_v13, 9 }
 0x16f   : > { %1361 = vst [vmem:[%s2203_s29 + $0x2] sm:$0x3] %v1349_v11  ;;  %v1122_v56 = vmax.f32 %v971_v0, %v1634_v14  ;;  %v1123_v25 = vmax.f32 %v972_v1, %v1635_v15  ;;  %v1124_v26 = vmax.f32 %v973_v63, %v1636_v16 }
 0x170   : > { %v1638_v21 = vrot.slane %v974_v19, 9  ;;  %v1639_v12 = vrot.slane %v975_v20, 9  ;;  %v1640_v33 = vrot.slane %v976_v35, 9  ;;  %v1125_v57 = vmax.f32 %v944_v13, %v1637_v49 }
 0x172   : > { %v1126_v23 = vmax.f32 %v974_v19, %v1638_v21  ;;  %v1127_v50 = vmax.f32 %v975_v20, %v1639_v12  ;;  %v1128_v27 = vmax.f32 %v976_v35, %v1640_v33  ;;  %v1141_v28 = vmax.f32 %v1121_v54, %v1125_v57  ;;  %v1270_v53 = vld.sshfl [vmem:[#allocation1] sm:$0xff pattern:$0x75643120] }
 0x173   : > { %v1273_v38 = vld.sshfl [vmem:[#allocation1 + $0x10] sm:$0xff pattern:$0x75643120]  ;;  %v1301_v41 = vunpack.c.l.b16 %v1270_v53 }
 0x174   : > { %v1276_v31 = vld.sshfl [vmem:[#allocation1 + $0x20] sm:$0xff pattern:$0x75643120]  ;;  %v1302_v32 = vunpack.c.l.b16 %v1273_v38  ;;  %v1142_v36 = vmax.f32 %v1122_v56, %v1126_v23  ;;  %v1143_v2 = vmax.f32 %v1123_v25, %v1127_v50  ;;  %v1144_v39 = vmax.f32 %v1124_v26, %v1128_v27 }
 0x175   : > { %v1279_v9 = vld.sshfl [vmem:[#allocation1 + $0x30] sm:$0xff pattern:$0x75643120]  ;;  %v1303_v3 = vunpack.c.l.b16 %v1276_v31  ;;  %v1157_v40 = vpack.c.bf16 %v1141_v28, %v1141_v28 }
 0x176   : > { %v1304_v42 = vunpack.c.l.b16 %v1279_v9  ;;  %v1324_v43 = vrot.slane %v1302_v32, 7  ;;  %v1158_v45 = vpack.c.bf16 %v1142_v36, %v1142_v36  ;;  %v1159_v46 = vpack.c.bf16 %v1143_v2, %v1143_v2 }
 0x177   : > { %v1326_v44 = vrot.slane %v1303_v3, 6  ;;  %v1160_v17 = vpack.c.bf16 %v1144_v39, %v1144_v39  ;;  %v1189_v47 = vrot.slane %v1157_v40, 2 }
 0x178   : > { %v1325_v24 = vsel %vm1310_vm4, %v1324_v43, %v1301_v41  ;;  %v1328_v48 = vrot.slane %v1304_v42, 5  ;;  %v1190_v51 = vrot.slane %v1158_v45, 2  ;;  %v1191_v29 = vrot.slane %v1159_v46, 2 }
 0x179   : > { %v1192_v52 = vrot.slane %v1160_v17, 2  ;;  %v1232_v4 = vsel %vm1193_vm3, %v1157_v40, %v1189_v47  ;;  %v1327_v5 = vsel %vm1313_vm5, %v1326_v44, %v1325_v24 }
 0x17a   : > { %1281 = vst [vmem:[#allocation1] ss:$2 sm:$0xff] %v1232_v4  ;;  %v1235_v55 = vsel %vm1193_vm3, %v1158_v45, %v1190_v51  ;;  %v1238_v58 = vsel %vm1193_vm3, %v1159_v46, %v1191_v29  ;;  %v1329_v60 = vsel %vm1316_vm6, %v1328_v48, %v1327_v5 }
 0x17b   : > { %v1241_v59 = vsel %vm1193_vm3, %v1160_v17, %v1192_v52  ;;  %1284 = vst [vmem:[#allocation1 + $0x10] ss:$2 sm:$0xff] %v1235_v55  ;;  %v1338_v61 = vpack.c.b16 %v1329_v60, %v1329_v60 }
 0x17c   : > { %1287 = vst [vmem:[#allocation1 + $0x20] ss:$2 sm:$0xff] %v1238_v58 }
 0x17d   : > { %1290 = vst [vmem:[#allocation1 + $0x30] ss:$2 sm:$0xff] %v1241_v59  ;;  %v1342_v22 = vrot.slane %v1338_v61, 2 }
 0x17f   : > { %v1352_v62 = vsel %vm1193_vm3, %v1338_v61, %v1342_v22 }
 0x180   : > { %1362 = vst [vmem:[%s2203_s29 + $0x4] sm:$0x3] %v1352_v62 }
 0x181   : > { %v1282_v18 = vld.sshfl [vmem:[#allocation1] sm:$0xff pattern:$0x75643120] }
 0x182   : > { %v1285_v0 = vld.sshfl [vmem:[#allocation1 + $0x10] sm:$0xff pattern:$0x75643120]  ;;  %v1305_v63 = vunpack.c.l.b16 %v1282_v18 }
 0x183   : > { %v1288_v1 = vld.sshfl [vmem:[#allocation1 + $0x20] sm:$0xff pattern:$0x75643120]  ;;  %v1306_v34 = vunpack.c.l.b16 %v1285_v0 }
 0x184   : > { %v1291_v30 = vld.sshfl [vmem:[#allocation1 + $0x30] sm:$0xff pattern:$0x75643120]  ;;  %v1307_v7 = vunpack.c.l.b16 %v1288_v1 }
 0x185   : > { %v1308_v37 = vunpack.c.l.b16 %v1291_v30  ;;  %v1330_v6 = vrot.slane %v1306_v34, 7 }
 0x186   : > { %v1332_v8 = vrot.slane %v1307_v7, 6 }
 0x187   : > { %v1331_v10 = vsel %vm1310_vm4, %v1330_v6, %v1305_v63  ;;  %v1334_v11 = vrot.slane %v1308_v37, 5 }
 0x188   : > { %v1333_v13 = vsel %vm1313_vm5, %v1332_v8, %v1331_v10 }
 0x189   : > { %v1335_v14 = vsel %vm1316_vm6, %v1334_v11, %v1333_v13 }
 0x18a   : > { %v1339_v15 = vpack.c.b16 %v1335_v14, %v1335_v14 }
 0x18c   : > { %v1343_v16 = vrot.slane %v1339_v15, 2 }
 0x18e   : > { %v1355_v19 = vsel %vm1193_vm3, %v1339_v15, %v1343_v16 }
 0x18f   : > { %1363 = vst [vmem:[%s2203_s29 + $0x6] sm:$0x3] %v1355_v19 }
 0x190 PF: > { %s13_s14 = sadd.s32 1, %s1830_s14   ;;  %s2245_s12 = smov %s1826_s13 }
 0x191   : > { %p10_p5 = scmp.ge.s32.totalorder %s13_s14, 4   ;;  %s2246_s13 = smov %s2248_s15 }
 0x193   :  { %12 = sbr.rel (!%p10_p5) target bundleno = 2 (0x2), region = 68 }

// kernel: forward.5
= control target key start
LH: loop header
LB: loop body
LE: loop exit
PB: predicated region body
PF: predicated region fallthrough
CT: control target
= control target key end

     0   :  { %s2477_s0 = inlined_call_operand.vmem [shape: bf16[2,2048], index: 0, kind: input, shape index: {}]   ;;  %s2478_s1 = inlined_call_operand.vmem [shape: bf16[2048,32], index: 1, kind: input, shape index: {}]   ;;  %s2479_s2 = inlined_call_operand.vmem [shape: f32[1,32], index: 2, kind: input, shape index: {}]   ;;  %s2480_s3 = inlined_call_operand.vmem [shape: f32[32,3], index: 3, kind: input, shape index: {}]   ;;  %s2481_s4 = inlined_call_operand.vmem [shape: f32[1,3], index: 4, kind: input, shape index: {}]   ;;  %s2482_s5 = inlined_call_operand.hbm [shape: f32[2,3], index: 5, kind: output, shape index: {}]  }
   0x1   :  { %v1881_v0 = vld [vmem:[%s2478_s1 + $0x38] sm:$0xff]  ;;  %v1880_v4 = vld [vmem:[%s2478_s1 + $0x30] sm:$0xff]  ;;  %v1879_v8 = vld [vmem:[%s2478_s1 + $0x28] sm:$0xff] }
   0x2   :  { %v1889_v1 = vld [vmem:[%s2478_s1 + $0x78] sm:$0xff]  ;;  %1090 = vmatpush.bf16.msra.mxu0 %v1881_v0  ;;  %v1888_v5 = vld [vmem:[%s2478_s1 + $0x70] sm:$0xff]  ;;  %v1887_v9 = vld [vmem:[%s2478_s1 + $0x68] sm:$0xff] }
   0x3   :  { %v1897_v2 = vld [vmem:[%s2478_s1 + $0xb8] sm:$0xff]  ;;  %1103 = vmatpush.bf16.msra.mxu1 %v1889_v1  ;;  %v1896_v6 = vld [vmem:[%s2478_s1 + $0xb0] sm:$0xff]  ;;  %v1895_v10 = vld [vmem:[%s2478_s1 + $0xa8] sm:$0xff] }
   0x4   :  { %v1905_v3 = vld [vmem:[%s2478_s1 + $0xf8] sm:$0xff]  ;;  %1116 = vmatpush.bf16.msra.mxu2 %v1897_v2  ;;  %v1904_v7 = vld [vmem:[%s2478_s1 + $0xf0] sm:$0xff]  ;;  %v1903_v11 = vld [vmem:[%s2478_s1 + $0xe8] sm:$0xff] }
   0x5   :  { %1129 = vmatpush.bf16.msra.mxu3 %v1905_v3  ;;  %v1878_v12 = vld [vmem:[%s2478_s1 + $0x20] sm:$0xff]  ;;  %v1877_v16 = vld [vmem:[%s2478_s1 + $0x18] sm:$0xff]  ;;  %v1876_v20 = vld [vmem:[%s2478_s1 + $0x10] sm:$0xff] }
   0x6   :  { %1091 = vmatpush.bf16.msra.mxu0 %v1880_v4  ;;  %v1886_v13 = vld [vmem:[%s2478_s1 + $0x60] sm:$0xff]  ;;  %v1885_v17 = vld [vmem:[%s2478_s1 + $0x58] sm:$0xff]  ;;  %v1884_v21 = vld [vmem:[%s2478_s1 + $0x50] sm:$0xff] }
   0x7   :  { %1104 = vmatpush.bf16.msra.mxu1 %v1888_v5  ;;  %v1894_v14 = vld [vmem:[%s2478_s1 + $0xa0] sm:$0xff]  ;;  %v1893_v18 = vld [vmem:[%s2478_s1 + $0x98] sm:$0xff]  ;;  %v1892_v23 = vld [vmem:[%s2478_s1 + $0x90] sm:$0xff] }
   0x8   :  { %1117 = vmatpush.bf16.msra.mxu2 %v1896_v6  ;;  %v1902_v15 = vld [vmem:[%s2478_s1 + $0xe0] sm:$0xff]  ;;  %v1901_v19 = vld [vmem:[%s2478_s1 + $0xd8] sm:$0xff]  ;;  %v1900_v24 = vld [vmem:[%s2478_s1 + $0xd0] sm:$0xff] }
   0x9   :  { %1130 = vmatpush.bf16.msra.mxu3 %v1904_v7  ;;  %v28_v22 = vld [vmem:[%s2477_s0] sm:$0xff] }
   0xa   :  { %1092 = vmatpush.bf16.msra.mxu0 %v1879_v8  ;;  %287 = vst [vmem:[#allocation1] ss:$9 sm:$0xff] %v28_v22 }
   0xb   :  { %1105 = vmatpush.bf16.msra.mxu1 %v1887_v9 }
   0xc   :  { %1118 = vmatpush.bf16.msra.mxu2 %v1895_v10 }
   0xd   :  { %1131 = vmatpush.bf16.msra.mxu3 %v1903_v11 }
   0xe   :  { %1093 = vmatpush.bf16.msra.mxu0 %v1878_v12 }
   0xf   :  { %1106 = vmatpush.bf16.msra.mxu1 %v1886_v13 }
  0x10   :  { %1119 = vmatpush.bf16.msra.mxu2 %v1894_v14 }
  0x11   :  { %1132 = vmatpush.bf16.msra.mxu3 %v1902_v15 }
  0x12   :  { %1094 = vmatpush.bf16.msra.mxu0 %v1877_v16 }
  0x13   :  { %1107 = vmatpush.bf16.msra.mxu1 %v1885_v17 }
  0x14   :  { %1120 = vmatpush.bf16.msra.mxu2 %v1893_v18 }
  0x15   :  { %1133 = vmatpush.bf16.msra.mxu3 %v1901_v19 }
  0x16   :  { %10 = vsyncpa [#allocation4], 0  ;;  %1095 = vmatpush.bf16.msra.mxu0 %v1876_v20  ;;  %v1875_v25 = vld [vmem:[%s2478_s1 + $0x8] sm:$0xff]  ;;  %v1874_v29 = vld [vmem:[%s2478_s1] sm:$0xff]  ;;  %vm25_vm0 = vcmask 254976   ;;  %vm1319_vm1 = vcmask 261120  }
  0x17   :  { %1108 = vmatpush.bf16.msra.mxu1 %v1884_v21  ;;  %v1883_v26 = vld [vmem:[%s2478_s1 + $0x48] sm:$0xff]  ;;  %v1882_v30 = vld [vmem:[%s2478_s1 + $0x40] sm:$0xff]  ;;  %v1913_v33 = vld [vmem:[%s2478_s1 + $0x138] sm:$0xff]  ;;  %s2033_s6 = smov [#allocation3]   ;;  %s1352_s10 = sshll.u32 %s2482_s5, 4  ;;  %vm1343_vm2 = vcmask 17408   ;;  %s1353_s10 = int_to_ptr.hbm [resolvable:$true] %s1352_s10 }
  0x18   :  { %1121 = vmatpush.bf16.msra.mxu2 %v1892_v23  ;;  %v1891_v27 = vld [vmem:[%s2478_s1 + $0x88] sm:$0xff]  ;;  %v1890_v31 = vld [vmem:[%s2478_s1 + $0x80] sm:$0xff]  ;;  %v1921_v34 = vld [vmem:[%s2478_s1 + $0x178] sm:$0xff]  ;;  %s1350_s7 = sshll.u32 %s2033_s6, 4  ;;  %s1351_s7 = int_to_ptr.vmem [resolvable:$true] %s1350_s7 }
  0x19   :  { %1134 = vmatpush.bf16.msra.mxu3 %v1900_v24  ;;  %v1899_v28 = vld [vmem:[%s2478_s1 + $0xc8] sm:$0xff]  ;;  %v1898_v32 = vld [vmem:[%s2478_s1 + $0xc0] sm:$0xff]  ;;  %v1929_v35 = vld [vmem:[%s2478_s1 + $0x1b8] sm:$0xff] }
  0x1a   :  { %1096 = vmatpush.bf16.msra.mxu0 %v1875_v25  ;;  %v1937_v36 = vld [vmem:[%s2478_s1 + $0x1f8] sm:$0xff]  ;;  %v1912_v37 = vld [vmem:[%s2478_s1 + $0x130] sm:$0xff]  ;;  %v288_v39 = vld [vmem:[#allocation1] sm:$0xff] }
  0x1b   :  { %1109 = vmatpush.bf16.msra.mxu1 %v1883_v26  ;;  %v290_v38 = vld [vmem:[#allocation1 + $0x12] sm:$0xff]  ;;  %v291_v41 = vld [vmem:[#allocation1 + $0x1b] sm:$0xff]  ;;  %v289_v42 = vld [vmem:[#allocation1 + $0x9] sm:$0xff] }
  0x1c   :  { %1122 = vmatpush.bf16.msra.mxu2 %v1891_v27  ;;  %v1920_v40 = vld [vmem:[%s2478_s1 + $0x170] sm:$0xff]  ;;  %v1911_v45 = vld [vmem:[%s2478_s1 + $0x128] sm:$0xff]  ;;  %v295_v51 = vld [vmem:[#allocation1 + $0x3f] sm:$0xff] }
  0x1d   :  { %1135 = vmatpush.bf16.msra.mxu3 %v1899_v28  ;;  %v1928_v43 = vld [vmem:[%s2478_s1 + $0x1b0] sm:$0xff]  ;;  %v1919_v46 = vld [vmem:[%s2478_s1 + $0x168] sm:$0xff]  ;;  %v1910_v54 = vld [vmem:[%s2478_s1 + $0x120] sm:$0xff] }
  0x1e   :  { %1097 = vmatpush.bf16.msra.mxu0 %v1874_v29  ;;  %v1936_v44 = vld [vmem:[%s2478_s1 + $0x1f0] sm:$0xff]  ;;  %v1927_v47 = vld [vmem:[%s2478_s1 + $0x1a8] sm:$0xff]  ;;  %v1918_v55 = vld [vmem:[%s2478_s1 + $0x160] sm:$0xff] }
  0x1f   :  { %1110 = vmatpush.bf16.msra.mxu1 %v1882_v30  ;;  %v1935_v48 = vld [vmem:[%s2478_s1 + $0x1e8] sm:$0xff]  ;;  %v294_v49 = vld [vmem:[#allocation1 + $0x36] sm:$0xff]  ;;  %v1926_v56 = vld [vmem:[%s2478_s1 + $0x1a0] sm:$0xff] }
  0x20   :  { %1123 = vmatpush.bf16.msra.mxu2 %v1890_v31  ;;  %v292_v50 = vld [vmem:[#allocation1 + $0x24] sm:$0xff]  ;;  %v293_v53 = vld [vmem:[#allocation1 + $0x2d] sm:$0xff]  ;;  %v1909_v58 = vld [vmem:[%s2478_s1 + $0x118] sm:$0xff] }
  0x21   :  { %1136 = vmatpush.bf16.msra.mxu3 %v1898_v32  ;;  %1098 = vmatmul.bf16.vlgmr.msra.gmra.mxu0 %v288_v39  ;;  %v29_v52 = vld [vmem:[%s2477_s0 + $0x8] sm:$0xff]  ;;  %v1934_v57 = vld [vmem:[%s2478_s1 + $0x1e0] sm:$0xff]  ;;  %v1917_v59 = vld [vmem:[%s2478_s1 + $0x158] sm:$0xff] }
  0x22   :  { %1142 = vmatpush.bf16.msrb.mxu0 %v1913_v33  ;;  %1111 = vmatmul.bf16.vlgmr.msra.gmra.mxu1 %v289_v42  ;;  %297 = vst [vmem:[#allocation1] ss:$9 sm:$0xff] %v29_v52  ;;  %v1925_v60 = vld [vmem:[%s2478_s1 + $0x198] sm:$0xff]  ;;  %v1908_v62 = vld [vmem:[%s2478_s1 + $0x110] sm:$0xff]  ;;  %v1907_v2 = vld [vmem:[%s2478_s1 + $0x108] sm:$0xff] }
  0x23   :  { %1155 = vmatpush.bf16.msrb.mxu1 %v1921_v34  ;;  %1124 = vmatmul.bf16.vlgmr.msra.gmra.mxu2 %v290_v38  ;;  %v1933_v61 = vld [vmem:[%s2478_s1 + $0x1d8] sm:$0xff]  ;;  %v1916_v63 = vld [vmem:[%s2478_s1 + $0x150] sm:$0xff]  ;;  %v1915_v3 = vld [vmem:[%s2478_s1 + $0x148] sm:$0xff] }
  0x24   :  { %1168 = vmatpush.bf16.msrb.mxu2 %v1929_v35  ;;  %1137 = vmatmul.bf16.vlgmr.msra.gmra.mxu3 %v291_v41  ;;  %v1924_v0 = vld [vmem:[%s2478_s1 + $0x190] sm:$0xff]  ;;  %v1923_v4 = vld [vmem:[%s2478_s1 + $0x188] sm:$0xff]  ;;  %v1906_v6 = vld [vmem:[%s2478_s1 + $0x100] sm:$0xff] }
  0x25   :  { %1181 = vmatpush.bf16.msrb.mxu3 %v1937_v36  ;;  %v1932_v1 = vld [vmem:[%s2478_s1 + $0x1d0] sm:$0xff]  ;;  %v1931_v5 = vld [vmem:[%s2478_s1 + $0x1c8] sm:$0xff]  ;;  %v1914_v7 = vld [vmem:[%s2478_s1 + $0x140] sm:$0xff] }
  0x26   :  { %1143 = vmatpush.bf16.msrb.mxu0 %v1912_v37  ;;  %v1922_v8 = vld [vmem:[%s2478_s1 + $0x180] sm:$0xff]  ;;  %v1945_v10 = vld [vmem:[%s2478_s1 + $0x238] sm:$0xff]  ;;  %v1944_v14 = vld [vmem:[%s2478_s1 + $0x230] sm:$0xff] }
  0x27   :  { %1156 = vmatpush.bf16.msrb.mxu1 %v1920_v40  ;;  %v1930_v9 = vld [vmem:[%s2478_s1 + $0x1c0] sm:$0xff]  ;;  %v1953_v11 = vld [vmem:[%s2478_s1 + $0x278] sm:$0xff]  ;;  %v1952_v15 = vld [vmem:[%s2478_s1 + $0x270] sm:$0xff] }
  0x28   :  { %1169 = vmatpush.bf16.msrb.mxu2 %v1928_v43  ;;  %v1961_v12 = vld [vmem:[%s2478_s1 + $0x2b8] sm:$0xff]  ;;  %v1960_v16 = vld [vmem:[%s2478_s1 + $0x2b0] sm:$0xff]  ;;  %v1943_v18 = vld [vmem:[%s2478_s1 + $0x228] sm:$0xff] }
  0x29   :  { %1182 = vmatpush.bf16.msrb.mxu3 %v1936_v44  ;;  %v1969_v13 = vld [vmem:[%s2478_s1 + $0x2f8] sm:$0xff]  ;;  %v1968_v17 = vld [vmem:[%s2478_s1 + $0x2f0] sm:$0xff]  ;;  %v1951_v19 = vld [vmem:[%s2478_s1 + $0x268] sm:$0xff] }
  0x2a   :  { %1144 = vmatpush.bf16.msrb.mxu0 %v1911_v45  ;;  %v1959_v20 = vld [vmem:[%s2478_s1 + $0x2a8] sm:$0xff]  ;;  %v1942_v22 = vld [vmem:[%s2478_s1 + $0x220] sm:$0xff]  ;;  %v1941_v26 = vld [vmem:[%s2478_s1 + $0x218] sm:$0xff] }
  0x2b   :  { %1157 = vmatpush.bf16.msrb.mxu1 %v1919_v46  ;;  %v1967_v21 = vld [vmem:[%s2478_s1 + $0x2e8] sm:$0xff]  ;;  %v1950_v23 = vld [vmem:[%s2478_s1 + $0x260] sm:$0xff]  ;;  %v1949_v27 = vld [vmem:[%s2478_s1 + $0x258] sm:$0xff] }
  0x2c   :  { %1170 = vmatpush.bf16.msrb.mxu2 %v1927_v47  ;;  %v1958_v24 = vld [vmem:[%s2478_s1 + $0x2a0] sm:$0xff]  ;;  %v1957_v28 = vld [vmem:[%s2478_s1 + $0x298] sm:$0xff]  ;;  %v1940_v30 = vld [vmem:[%s2478_s1 + $0x210] sm:$0xff] }
  0x2d   :  { %1183 = vmatpush.bf16.msrb.mxu3 %v1935_v48  ;;  %v1966_v25 = vld [vmem:[%s2478_s1 + $0x2e0] sm:$0xff]  ;;  %v1965_v29 = vld [vmem:[%s2478_s1 + $0x2d8] sm:$0xff]  ;;  %v1948_v31 = vld [vmem:[%s2478_s1 + $0x250] sm:$0xff] }
  0x2e   :  { %1145 = vmatpush.bf16.msrb.mxu0 %v1910_v54  ;;  %v1956_v32 = vld [vmem:[%s2478_s1 + $0x290] sm:$0xff]  ;;  %v1939_v34 = vld [vmem:[%s2478_s1 + $0x208] sm:$0xff]  ;;  %v1938_v38 = vld [vmem:[%s2478_s1 + $0x200] sm:$0xff] }
  0x2f   :  { %1158 = vmatpush.bf16.msrb.mxu1 %v1918_v55  ;;  %v1964_v33 = vld [vmem:[%s2478_s1 + $0x2d0] sm:$0xff]  ;;  %v1947_v35 = vld [vmem:[%s2478_s1 + $0x248] sm:$0xff]  ;;  %v1946_v39 = vld [vmem:[%s2478_s1 + $0x240] sm:$0xff] }
  0x30   :  { %1171 = vmatpush.bf16.msrb.mxu2 %v1926_v56  ;;  %v1955_v36 = vld [vmem:[%s2478_s1 + $0x288] sm:$0xff]  ;;  %v1954_v40 = vld [vmem:[%s2478_s1 + $0x280] sm:$0xff]  ;;  %v1977_v42 = vld [vmem:[%s2478_s1 + $0x338] sm:$0xff] }
  0x31   :  { %1184 = vmatpush.bf16.msrb.mxu3 %v1934_v57  ;;  %v1963_v37 = vld [vmem:[%s2478_s1 + $0x2c8] sm:$0xff]  ;;  %v1962_v41 = vld [vmem:[%s2478_s1 + $0x2c0] sm:$0xff]  ;;  %v1985_v43 = vld [vmem:[%s2478_s1 + $0x378] sm:$0xff] }
  0x32   :  { %1146 = vmatpush.bf16.msrb.mxu0 %v1909_v58  ;;  %v1993_v44 = vld [vmem:[%s2478_s1 + $0x3b8] sm:$0xff]  ;;  %v298_v46 = vld [vmem:[#allocation1] sm:$0xff]  ;;  %v299_v48 = vld [vmem:[#allocation1 + $0x9] sm:$0xff] }
  0x33   :  { %1159 = vmatpush.bf16.msrb.mxu1 %v1917_v59  ;;  %v2001_v45 = vld [vmem:[%s2478_s1 + $0x3f8] sm:$0xff]  ;;  %v1992_v52 = vld [vmem:[%s2478_s1 + $0x3b0] sm:$0xff]  ;;  %v1975_v54 = vld [vmem:[%s2478_s1 + $0x328] sm:$0xff] }
  0x34   :  { %1172 = vmatpush.bf16.msrb.mxu2 %v1925_v60  ;;  %v300_v47 = vld [vmem:[#allocation1 + $0x12] sm:$0xff]  ;;  %v1983_v55 = vld [vmem:[%s2478_s1 + $0x368] sm:$0xff]  ;;  %v1974_v58 = vld [vmem:[%s2478_s1 + $0x320] sm:$0xff] }
  0x35   :  { %1185 = vmatpush.bf16.msrb.mxu3 %v1933_v61  ;;  %v1991_v56 = vld [vmem:[%s2478_s1 + $0x3a8] sm:$0xff]  ;;  %v1982_v59 = vld [vmem:[%s2478_s1 + $0x360] sm:$0xff] }
  0x36   :  { %1147 = vmatpush.bf16.msrb.mxu0 %v1908_v62  ;;  %v1999_v57 = vld [vmem:[%s2478_s1 + $0x3e8] sm:$0xff]  ;;  %v1990_v60 = vld [vmem:[%s2478_s1 + $0x3a0] sm:$0xff]  ;;  %v1973_v62 = vld [vmem:[%s2478_s1 + $0x318] sm:$0xff] }
  0x37   :  { %1160 = vmatpush.bf16.msrb.mxu1 %v1916_v63  ;;  %v1998_v61 = vld [vmem:[%s2478_s1 + $0x3e0] sm:$0xff]  ;;  %v1981_v63 = vld [vmem:[%s2478_s1 + $0x358] sm:$0xff] }
  0x38   :  { %1173 = vmatpush.bf16.msrb.mxu2 %v1924_v0  ;;  %v1989_v0 = vld [vmem:[%s2478_s1 + $0x398] sm:$0xff] }
  0x39   :  { %1186 = vmatpush.bf16.msrb.mxu3 %v1932_v1  ;;  %v1997_v1 = vld [vmem:[%s2478_s1 + $0x3d8] sm:$0xff] }
  0x3a   :  { %1148 = vmatpush.bf16.msrb.mxu0 %v1907_v2  ;;  %v1972_v2 = vld [vmem:[%s2478_s1 + $0x310] sm:$0xff] }
  0x3b   :  { %1161 = vmatpush.bf16.msrb.mxu1 %v1915_v3  ;;  %v1980_v3 = vld [vmem:[%s2478_s1 + $0x350] sm:$0xff] }
  0x3c   :  { %1174 = vmatpush.bf16.msrb.mxu2 %v1923_v4  ;;  %v1988_v4 = vld [vmem:[%s2478_s1 + $0x390] sm:$0xff] }
  0x3d   :  { %1187 = vmatpush.bf16.msrb.mxu3 %v1931_v5  ;;  %v1996_v5 = vld [vmem:[%s2478_s1 + $0x3d0] sm:$0xff] }
  0x3e   :  { %1149 = vmatpush.bf16.msrb.mxu0 %v1906_v6  ;;  %v1971_v6 = vld [vmem:[%s2478_s1 + $0x308] sm:$0xff] }
  0x3f   :  { %1162 = vmatpush.bf16.msrb.mxu1 %v1914_v7  ;;  %v1979_v7 = vld [vmem:[%s2478_s1 + $0x348] sm:$0xff] }
  0x40   :  { %1175 = vmatpush.bf16.msrb.mxu2 %v1922_v8  ;;  %v1987_v8 = vld [vmem:[%s2478_s1 + $0x388] sm:$0xff] }
  0x41   :  { %1188 = vmatpush.bf16.msrb.mxu3 %v1930_v9  ;;  %1150 = vmatmul.bf16.vlgmr.msrb.gmra.mxu0 %v292_v50  ;;  %v1976_v50 = vld [vmem:[%s2478_s1 + $0x330] sm:$0xff]  ;;  %v1995_v9 = vld [vmem:[%s2478_s1 + $0x3c8] sm:$0xff] }
  0x42   :  { %1194 = vmatpush.bf16.msra.mxu0 %v1945_v10  ;;  %1163 = vmatmul.bf16.vlgmr.msrb.gmra.mxu1 %v293_v53  ;;  %v2000_v53 = vld [vmem:[%s2478_s1 + $0x3f0] sm:$0xff]  ;;  %v1970_v10 = vld [vmem:[%s2478_s1 + $0x300] sm:$0xff] }
  0x43   :  { %1207 = vmatpush.bf16.msra.mxu1 %v1953_v11  ;;  %1176 = vmatmul.bf16.vlgmr.msrb.gmra.mxu2 %v294_v49  ;;  %v301_v49 = vld [vmem:[#allocation1 + $0x1b] sm:$0xff] }
  0x44   :  { %1220 = vmatpush.bf16.msra.mxu2 %v1961_v12  ;;  %1189 = vmatmul.bf16.vlgmr.msrb.gmra.mxu3 %v295_v51  ;;  %v1984_v51 = vld [vmem:[%s2478_s1 + $0x370] sm:$0xff]  ;;  %v1978_v11 = vld [vmem:[%s2478_s1 + $0x340] sm:$0xff] }
  0x45   :  { %1233 = vmatpush.bf16.msra.mxu3 %v1969_v13  ;;  %v1986_v12 = vld [vmem:[%s2478_s1 + $0x380] sm:$0xff] }
  0x46   :  { %1195 = vmatpush.bf16.msra.mxu0 %v1944_v14  ;;  %v1994_v13 = vld [vmem:[%s2478_s1 + $0x3c0] sm:$0xff] }
  0x47   :  { %1208 = vmatpush.bf16.msra.mxu1 %v1952_v15  ;;  %v302_v14 = vld [vmem:[#allocation1 + $0x24] sm:$0xff]  ;;  %v303_v15 = vld [vmem:[#allocation1 + $0x2d] sm:$0xff] }
  0x48   :  { %1221 = vmatpush.bf16.msra.mxu2 %v1960_v16  ;;  %v304_v16 = vld [vmem:[#allocation1 + $0x36] sm:$0xff] }
  0x49   :  { %1234 = vmatpush.bf16.msra.mxu3 %v1968_v17  ;;  %v305_v17 = vld [vmem:[#allocation1 + $0x3f] sm:$0xff] }
  0x4a   :  { %1196 = vmatpush.bf16.msra.mxu0 %v1943_v18 }
  0x4b   :  { %1209 = vmatpush.bf16.msra.mxu1 %v1951_v19 }
  0x4c   :  { %1222 = vmatpush.bf16.msra.mxu2 %v1959_v20 }
  0x4d   :  { %1235 = vmatpush.bf16.msra.mxu3 %v1967_v21 }
  0x4e   :  { %1197 = vmatpush.bf16.msra.mxu0 %v1942_v22 }
  0x4f   :  { %1210 = vmatpush.bf16.msra.mxu1 %v1950_v23 }
  0x50   :  { %1223 = vmatpush.bf16.msra.mxu2 %v1958_v24 }
  0x51   :  { %1236 = vmatpush.bf16.msra.mxu3 %v1966_v25 }
  0x52   :  { %1198 = vmatpush.bf16.msra.mxu0 %v1941_v26 }
  0x53   :  { %1211 = vmatpush.bf16.msra.mxu1 %v1949_v27 }
  0x54   :  { %1224 = vmatpush.bf16.msra.mxu2 %v1957_v28 }
  0x55   :  { %1237 = vmatpush.bf16.msra.mxu3 %v1965_v29 }
  0x56   :  { %1199 = vmatpush.bf16.msra.mxu0 %v1940_v30 }
  0x57   :  { %1212 = vmatpush.bf16.msra.mxu1 %v1948_v31 }
  0x58   :  { %1225 = vmatpush.bf16.msra.mxu2 %v1956_v32 }
  0x59   :  { %1238 = vmatpush.bf16.msra.mxu3 %v1964_v33 }
  0x5a   :  { %1200 = vmatpush.bf16.msra.mxu0 %v1939_v34 }
  0x5b   :  { %1213 = vmatpush.bf16.msra.mxu1 %v1947_v35 }
  0x5c   :  { %1226 = vmatpush.bf16.msra.mxu2 %v1955_v36 }
  0x5d   :  { %1239 = vmatpush.bf16.msra.mxu3 %v1963_v37 }
  0x5e   :  { %1201 = vmatpush.bf16.msra.mxu0 %v1938_v38 }
  0x5f   :  { %1214 = vmatpush.bf16.msra.mxu1 %v1946_v39  ;;  %v2032_v39 = vmov 0.0  }
  0x60   :  { %1227 = vmatpush.bf16.msra.mxu2 %v1954_v40  ;;  %26 = vst.msk [vmem:[#allocation2] sm:$0x3] %vm25_vm0, %v2032_v39 }
  0x61   :  { %1240 = vmatpush.bf16.msra.mxu3 %v1962_v41  ;;  %1202 = vmatmul.bf16.vlgmr.msra.gmra.mxu0 %v298_v46  ;;  %v1314_v46 = vld [vmem:[%s2480_s3 + $0x18] sm:$0xff] }
  0x62   :  { %1246 = vmatpush.bf16.msrb.mxu0 %v1977_v42  ;;  %1215 = vmatmul.bf16.vlgmr.msra.gmra.mxu1 %v299_v48 }
  0x63   :  { %1259 = vmatpush.bf16.msrb.mxu1 %v1985_v43  ;;  %1228 = vmatmul.bf16.vlgmr.msra.gmra.mxu2 %v300_v47  ;;  %v1313_v47 = vld [vmem:[%s2480_s3 + $0x10] sm:$0xff] }
  0x64   :  { %1272 = vmatpush.bf16.msrb.mxu2 %v1993_v44  ;;  %1241 = vmatmul.bf16.vlgmr.msra.gmra.mxu3 %v301_v49  ;;  %v1312_v49 = vld [vmem:[%s2480_s3 + $0x8] sm:$0xff] }
  0x65   :  { %1285 = vmatpush.bf16.msrb.mxu3 %v2001_v45 }
  0x66   :  { %1247 = vmatpush.bf16.msrb.mxu0 %v1976_v50 }
  0x67   :  { %1260 = vmatpush.bf16.msrb.mxu1 %v1984_v51 }
  0x68   :  { %1273 = vmatpush.bf16.msrb.mxu2 %v1992_v52  ;;  %v1311_v52 = vld [vmem:[%s2480_s3] sm:$0xff] }
  0x69   :  { %1286 = vmatpush.bf16.msrb.mxu3 %v2000_v53 }
  0x6a   :  { %1248 = vmatpush.bf16.msrb.mxu0 %v1975_v54 }
  0x6b   :  { %1261 = vmatpush.bf16.msrb.mxu1 %v1983_v55 }
  0x6c   :  { %1274 = vmatpush.bf16.msrb.mxu2 %v1991_v56 }
  0x6d   :  { %1287 = vmatpush.bf16.msrb.mxu3 %v1999_v57 }
  0x6e   :  { %1249 = vmatpush.bf16.msrb.mxu0 %v1974_v58 }
  0x6f   :  { %1262 = vmatpush.bf16.msrb.mxu1 %v1982_v59 }
  0x70   :  { %1275 = vmatpush.bf16.msrb.mxu2 %v1990_v60 }
  0x71   :  { %1288 = vmatpush.bf16.msrb.mxu3 %v1998_v61 }
  0x72   :  { %1250 = vmatpush.bf16.msrb.mxu0 %v1973_v62 }
  0x73   :  { %1263 = vmatpush.bf16.msrb.mxu1 %v1981_v63 }
  0x74   :  { %1276 = vmatpush.bf16.msrb.mxu2 %v1989_v0 }
  0x75   :  { %1289 = vmatpush.bf16.msrb.mxu3 %v1997_v1 }
  0x76   :  { %1251 = vmatpush.bf16.msrb.mxu0 %v1972_v2 }
  0x77   :  { %1264 = vmatpush.bf16.msrb.mxu1 %v1980_v3  ;;  %v27_v3 = vld [vmem:[#allocation2] sm:$0x3] }
  0x78   :  { %1277 = vmatpush.bf16.msrb.mxu2 %v1988_v4 }
  0x79   :  { %1290 = vmatpush.bf16.msrb.mxu3 %v1996_v5 }
  0x7a   :  { %1252 = vmatpush.bf16.msrb.mxu0 %v1971_v6 }
  0x7b   :  { %1265 = vmatpush.bf16.msrb.mxu1 %v1979_v7 }
  0x7c   :  { %1278 = vmatpush.bf16.msrb.mxu2 %v1987_v8  ;;  %v2004_v8 = vld [vmem:[%s2479_s2] ss:$0 sm:$0xff] }
  0x7d   :  { %1291 = vmatpush.bf16.msrb.mxu3 %v1995_v9 }
  0x7e   :  { %1253 = vmatpush.bf16.msrb.mxu0 %v1970_v10 }
  0x7f   :  { %1266 = vmatpush.bf16.msrb.mxu1 %v1978_v11 }
  0x80   :  { %1279 = vmatpush.bf16.msrb.mxu2 %v1986_v12  ;;  %v2005_v12 = vld [vmem:[%s2481_s4] ss:$0 sm:$0xff] }
  0x81   :  { %1292 = vmatpush.bf16.msrb.mxu3 %v1994_v13  ;;  %1254 = vmatmul.bf16.vlgmr.msrb.gmra.mxu0 %v302_v14 }
  0x82   :  { %1267 = vmatmul.bf16.vlgmr.msrb.gmra.mxu1 %v303_v15  ;;  %1335 = vmatpush.msra.mxu0 %v1314_v46 }
  0x83   :  { %1280 = vmatmul.bf16.vlgmr.msrb.gmra.mxu2 %v304_v16 }
  0x84   :  { %1293 = vmatmul.bf16.vlgmr.msrb.gmra.mxu3 %v305_v17  ;;  %1336 = vmatpush.msra.mxu0 %v1313_v47 }
  0x86   :  { %1337 = vmatpush.msra.mxu0 %v1312_v49 }
  0x88   :  { %1338 = vmatpush.msra.mxu0 %v1311_v52 }
  0x9e   :  { %v1099_v18 = vpop.f32.mrf.mxu0 }
  0x9f   :  { %v1112_v19 = vpop.f32.mrf.mxu1 }
  0xa0   :  { %v1113_v20 = vadd.f32 %v1112_v19, %v1099_v18 }
  0xa6   :  { %v1125_v21 = vpop.f32.mrf.mxu2  ;;  %v1101_v24 = vpop.f32.mrf.mxu0 }
  0xa7   :  { %v1126_v22 = vadd.f32 %v1125_v21, %v1113_v20  ;;  %v1138_v23 = vpop.f32.mrf.mxu3  ;;  %v1114_v26 = vpop.f32.mrf.mxu1 }
  0xa9   :  { %v1139_v25 = vadd.f32 %v1138_v23, %v1126_v22 }
  0xae   :  { %v1127_v27 = vpop.f32.mrf.mxu2 }
  0xaf   :  { %v1140_v28 = vpop.f32.mrf.mxu3 }
  0xbe   :  { %v1151_v29 = vpop.f32.mrf.mxu0 }
  0xbf   :  { %v1164_v30 = vpop.f32.mrf.mxu1  ;;  %v1152_v40 = vadd.f32 %v1151_v29, %v1139_v25 }
  0xc1   :  { %v1165_v44 = vadd.f32 %v1164_v30, %v1152_v40 }
  0xc6   :  { %v1177_v31 = vpop.f32.mrf.mxu2  ;;  %v1153_v33 = vpop.f32.mrf.mxu0 }
  0xc7   :  { %v1190_v32 = vpop.f32.mrf.mxu3  ;;  %v1166_v34 = vpop.f32.mrf.mxu1  ;;  %v1178_v48 = vadd.f32 %v1177_v31, %v1165_v44 }
  0xc9   :  { %v1191_v53 = vadd.f32 %v1190_v32, %v1178_v48 }
  0xce   :  { %v1179_v35 = vpop.f32.mrf.mxu2 }
  0xcf   :  { %v1192_v36 = vpop.f32.mrf.mxu3 }
  0xde   :  { %v1203_v37 = vpop.f32.mrf.mxu0 }
  0xdf   :  { %v1216_v38 = vpop.f32.mrf.mxu1  ;;  %v1204_v54 = vadd.f32 %v1203_v37, %v1191_v53 }
  0xe1   :  { %v1217_v55 = vadd.f32 %v1216_v38, %v1204_v54 }
  0xe6   :  { %v1229_v41 = vpop.f32.mrf.mxu2  ;;  %v1205_v43 = vpop.f32.mrf.mxu0 }
  0xe7   :  { %v1242_v42 = vpop.f32.mrf.mxu3  ;;  %v1218_v45 = vpop.f32.mrf.mxu1  ;;  %v1230_v56 = vadd.f32 %v1229_v41, %v1217_v55 }
  0xe9   :  { %v1243_v57 = vadd.f32 %v1242_v42, %v1230_v56 }
  0xee   :  { %v1231_v50 = vpop.f32.mrf.mxu2 }
  0xef   :  { %v1244_v51 = vpop.f32.mrf.mxu3 }
  0xfe   :  { %v1255_v58 = vpop.f32.mrf.mxu0 }
  0xff   :  { %v1268_v59 = vpop.f32.mrf.mxu1  ;;  %v1256_v60 = vadd.f32 %v1255_v58, %v1243_v57 }
 0x101   :  { %v1269_v61 = vadd.f32 %v1268_v59, %v1256_v60 }
 0x106   :  { %v1281_v62 = vpop.f32.mrf.mxu2  ;;  %v1257_v1 = vpop.f32.mrf.mxu0 }
 0x107   :  { %v1294_v63 = vpop.f32.mrf.mxu3  ;;  %v1282_v0 = vadd.f32 %v1281_v62, %v1269_v61  ;;  %v1270_v2 = vpop.f32.mrf.mxu1 }
 0x109   :  { %v1295_v4 = vadd.f32 %v1294_v63, %v1282_v0 }
 0x10b   :  { %v1298_v5 = vadd.f32 %v1295_v4, %v27_v3 }
 0x10d   :  { %1300 = vst.msk [vmem:[#allocation2] sm:$0x3] %vm25_vm0, %v1298_v5 }
 0x10e   :  { %v1283_v6 = vpop.f32.mrf.mxu2 }
 0x10f   :  { %v1296_v7 = vpop.f32.mrf.mxu3 }
 0x114   :  { %v1304_v9 = vld [vmem:[#allocation2] sm:$0x3] }
 0x115   :  { %v1309_v10 = vadd.f32 %v2004_v8, %v1304_v9 }
 0x117   :  { %v1310_v11 = vmax.f32 %v1309_v10, 0.0 }
 0x119   :  { %1873 = vmatmul.msk.f32.vlgmr.msra.gmra.mxu0 %vm1319_vm1, %v1310_v11 }
 0x196   :  { %v1340_v13 = vpop.f32.mrf.mxu0 }
 0x197   :  { %v1341_v14 = vadd.f32 %v2005_v12, %v1340_v13 }
 0x199   :  { %1344 = vst.msk [vmem:[#allocation3] sm:$0x3] %vm1343_vm2, %v1341_v14 }
 0x19a   :  { %1355 = dma.vmem_to_hbm [thread:$0]  %s1351_s7, 32, %s1353_s10, [#allocation4]  }
 0x19b   :  { %2030 = dma.done.wait [#allocation4], 32  }
 0x19c   :  { %2031 = vsyncadd [#allocation4], 4294967264 }
 0x19d   :  { %1360 = vsyncpa [#allocation4], 1 }

// kernel: forward.3
= control target key start
LH: loop header
LB: loop body
LE: loop exit
PB: predicated region body
PF: predicated region fallthrough
CT: control target
= control target key end

     0   :  { %s4813_s18 = smov 0   ;;  %s4815_s19 = smov 0   ;;  %s6558_s0 = inlined_call_operand.vmem [shape: bf16[2,432,9], index: 0, kind: input, shape index: {}]   ;;  %s6559_s1 = inlined_call_operand.vmem [shape: bf16[9,32], index: 1, kind: input, shape index: {}]   ;;  %s6560_s2 = inlined_call_operand.vmem [shape: f32[1,32], index: 2, kind: input, shape index: {}]   ;;  %s6561_s3 = inlined_call_operand.vmem [shape: bf16[288,64], index: 3, kind: input, shape index: {}]   ;;  %s6562_s4 = inlined_call_operand.vmem [shape: f32[1,64], index: 4, kind: input, shape index: {}]   ;;  %s6563_s5 = inlined_call_operand.vmem [shape: bf16[2,8,8,64], index: 5, kind: output, shape index: {}]  }
   0x1   :  { %s4817_s20 = smov 0  }
   0x2 LB: > { %s27_s21 = sadd.s32 1, %s4772_s19  ;;  %p3827_p0 = scmp.ge.s32.totalorder %s4776_s20, 1  ;;  %s4776_s20 = sphi %s4817_s20, %s15_s20   ;;  %s4772_s19 = sphi %s4815_s19, %s6681_s19   ;;  %s4768_s18 = sphi %s4813_s18, %s6680_s18  }
   0x3   : > { %p29_p1 = scmp.ge.s32.totalorder %s27_s21, 2  ;;  %p201_p2 = scmp.lt.s32.totalorder %s4776_s20, 3 }
   0x5   : > { %s6683_s21 = smov (%p29_p1, %s27_s21), 0  ;;  %p202_p3 = pnand %p3827_p0, %p201_p2 }
   0x7   : > { %205 = sbr.rel (%p202_p3) target bundleno = 848 (0x350), region = 40 }
   0xc   : > { %v3941_v0 = vld [vmem:[%s6559_s1] sm:$0xf]  ;;  %v4219_v1 = vld [vmem:[%s6559_s1] sm:$0x10]  ;;  %vm537_vm0 = vcmask 1043456   ;;  %vm538_vm1 = vcmask 1044480   ;;  %v761_v34 = vlaneseq }
   0xd   : > { %v3942_v2 = vor.u32 %v4219_v1, %v3941_v0  ;;  %p233_p4 = scmp.lt.s32.totalorder %s4768_s18, 1  ;;  %v4778_v3 = vmov 65535   ;;  %vm455_vm2 = vcmask 72704   ;;  %v6564_v23 = vmov 0.0   ;;  %s4780_s30 = smov 64   ;;  %v4237_v58 = vld [vmem:[%s6561_s3 + $0x88] sm:$0xff] }
   0xe   : > { %v539_v4 = vsel %vm537_vm0, 4294967295, %v4778_v3  ;;  %v4876_v24 = vrot.slane %v6564_v23, 2  ;;  %v1039_v25 = vrot.slane %v6564_v23, 1  ;;  %s4781_s6 = smov 32   ;;  %v4895_v35 = vld [vmem:[%s6560_s2] ss:$0 sm:$0xff] }
   0xf   : > { %v540_v5 = vsel %vm538_vm1, %v539_v4, 0  ;;  %s6685_s18 = smov (!%p233_p4, %s4768_s18), 1  ;;  %v762_v36 = vshrl.u32 %v761_v34, 7  ;;  %vm1038_vm5 = vcmask 1046528   ;;  %vm1215_vm6 = vcmask 1045504   ;;  %s4782_s13 = smov 96  }
  0x10   : > { %v542_v6 = vand.u32 %v3942_v2, %v540_v5  ;;  %s4240_s26 = smul.u32 216, %s6685_s18  ;;  %6603 = vst [vmem:[#allocation2_spill] sm:$0xff] %v4876_v24  ;;  %v4275_v28 = vpack.i.bf16 %v4876_v24, %v4876_v24  ;;  %v4883_v29 = vpack.i.bf16 %v1039_v25, %v1039_v25  ;;  %v4236_v2 = vld [vmem:[%s6561_s3 + $0x80] sm:$0xff]  ;;  %vm1866_vm7 = vcmask 261120  }
  0x11   : > { %v764_v41 = vadd.s32 16, %v762_v36  ;;  %v4898_v42 = vadd.s32 4294967295, %v762_v36  ;;  %vm1899_vm8 = vcmask 523264   ;;  %vm1932_vm9 = vcmask 785408  }
  0x12   : > { %551 = vmatpush.bf16.msra.mxu0 %v542_v6  ;;  %4238 = vmatpush.bf16.msra.mxu1 %v542_v6  ;;  %s4843_s29 = scalar_lea.vmem %s6558_s0, %s4240_s26  ;;  %6604 = vst [vmem:[#allocation3_spill] sm:$0xff] %v4883_v29  ;;  %vm3597_vm10 = vcmask 1041409   ;;  %vm3600_vm11 = vcmask 1042434   ;;  %vm3603_vm12 = vcmask 1043459   ;;  %vm3606_vm13 = vcmask 1044484  }
  0x13   : > { %4239 = vmatpush.bf16.msra.mxu3 %v542_v6  ;;  %v4192_v7 = vld [vmem:[%s4843_s29] sm:$0xff]  ;;  %v4215_v9 = vld [vmem:[%s4843_s29 + $0xb8] sm:$0xff]  ;;  %v4193_v10 = vld [vmem:[%s4843_s29 + $0x8] sm:$0xff]  ;;  %4276 = vrot.lane.b32.xlu1 %v4275_v28, %s4780_s30  ;;  %v4903_v46 = vadd.s32 4294967295, %v764_v41  ;;  %vm822_vm3 = vcmp.ge.s32.totalorder %v4898_v42, 0  ;;  %vm3609_vm14 = vcmask 1045509  }
  0x14   : > { %v4212_v8 = vld [vmem:[%s4843_s29 + $0xa0] sm:$0xff]  ;;  %v4213_v11 = vld [vmem:[%s4843_s29 + $0xa8] sm:$0xff]  ;;  %v4194_v12 = vld [vmem:[%s4843_s29 + $0x10] sm:$0xff]  ;;  %4271 = vrot.lane.b32.xlu0 %v4883_v29, %s4781_s6  ;;  %vm3612_vm15 = vcmask 1046534   ;;  %vm3615_vm0 = vcmask 1047559   ;;  %vm3731_vm1 = vcmask 519168  }
  0x15   : > { %3943 = vmatmul.msk.bf16.vlgmr.msra.gmra.mxu0 %vm455_vm2, %v4192_v7  ;;  %3963 = vmatmul.msk.bf16.vlgmr.msra.gmra.mxu1 %vm455_vm2, %v4212_v8  ;;  %v4214_v13 = vld [vmem:[%s4843_s29 + $0xb0] sm:$0xff]  ;;  %v4195_v14 = vld [vmem:[%s4843_s29 + $0x18] sm:$0xff]  ;;  %v4196_v15 = vld [vmem:[%s4843_s29 + $0x20] sm:$0xff]  ;;  %vm881_vm4 = vcmp.lt.s32.totalorder %v4903_v46, 16 }
  0x16   : > { %3966 = vmatmul.msk.bf16.vlgmr.msra.gmra.mxu3 %vm455_vm2, %v4215_v9  ;;  %v4197_v16 = vld [vmem:[%s4843_s29 + $0x28] sm:$0xff]  ;;  %v4198_v17 = vld [vmem:[%s4843_s29 + $0x30] sm:$0xff]  ;;  %v4199_v18 = vld [vmem:[%s4843_s29 + $0x38] sm:$0xff] }
  0x17   : > { %v4216_v19 = vld [vmem:[%s4843_s29 + $0xc0] sm:$0xff]  ;;  %v4217_v30 = vld [vmem:[%s4843_s29 + $0xc8] sm:$0xff]  ;;  %v4218_v44 = vld [vmem:[%s4843_s29 + $0xd0] sm:$0xff]  ;;  %2489 = vmatpush.bf16.msrb.mxu3 %v4237_v58 }
  0x18   : > { %v4200_v20 = vld [vmem:[%s4843_s29 + $0x40] sm:$0xff]  ;;  %v4201_v31 = vld [vmem:[%s4843_s29 + $0x48] sm:$0xff]  ;;  %v4202_v49 = vld [vmem:[%s4843_s29 + $0x50] sm:$0xff] }
  0x1b   : > { %2490 = vmatpush.bf16.msrb.mxu3 %v4236_v2 }
  0x25   : > { %3944 = vmatmul.msk.bf16.gmra.mxu0 %vm455_vm2, %v4193_v10  ;;  %3964 = vmatmul.msk.bf16.gmra.mxu1 %vm455_vm2, %v4213_v11 }
  0x26   : > { %3967 = vmatmul.msk.bf16.gmra.mxu3 %vm455_vm2, %v4216_v19 }
  0x35   : > { %3945 = vmatmul.msk.bf16.gmra.mxu0 %vm455_vm2, %v4194_v12  ;;  %3965 = vmatmul.msk.bf16.gmra.mxu1 %vm455_vm2, %v4214_v13 }
  0x36   : > { %3968 = vmatmul.msk.bf16.gmra.mxu3 %vm455_vm2, %v4217_v30  ;;  %v4203_v30 = vld [vmem:[%s4843_s29 + $0x58] sm:$0xff] }
  0x45   : > { %3946 = vmatmul.msk.bf16.gmra.mxu0 %vm455_vm2, %v4195_v14 }
  0x46   : > { %3969 = vmatmul.msk.bf16.gmra.mxu3 %vm455_vm2, %v4218_v44 }
  0x55   : > { %3947 = vmatmul.msk.bf16.gmra.mxu0 %vm455_vm2, %v4196_v15 }
  0x65   : > { %3948 = vmatmul.msk.bf16.gmra.mxu0 %vm455_vm2, %v4197_v16 }
  0x75   : > { %3949 = vmatmul.msk.bf16.gmra.mxu0 %vm455_vm2, %v4198_v17 }
  0x85   : > { %3950 = vmatmul.msk.bf16.gmra.mxu0 %vm455_vm2, %v4199_v18 }
  0x92   : > { %v553_v21 = vpop.f32.mrf.mxu0  ;;  %v4872_v22 = vpop.f32.mrf.mxu1 }
  0x95   : > { %3951 = vmatmul.msk.bf16.gmra.mxu0 %vm455_vm2, %v4200_v20 }
  0x99   : > { %v668_v38 = vpop.f32.mrf.mxu3 }
  0x9a   : > { %v555_v26 = vpop.f32.mrf.mxu0  ;;  %v4879_v27 = vpop.f32.mrf.mxu1  ;;  %v669_v1 = vadd.f32 %v4895_v35, %v668_v38 }
  0x9c   : > { %v4951_v13 = vmax.f32 %v669_v1, 0.0 }
  0x9e   : > { %6611 = vst [vmem:[#allocation10_spill] sm:$0xff] %v4951_v13 }
  0xa1   : > { %v670_v53 = vpop.f32.mrf.mxu3 }
  0xa2   : > { %v558_v32 = vpop.f32.mrf.mxu0  ;;  %v658_v33 = vpop.f32.mrf.mxu1  ;;  %v671_v60 = vadd.f32 %v4895_v35, %v670_v53 }
  0xa3   : > { %v659_v37 = vadd.f32 %v4895_v35, %v658_v33 }
  0xa4   : > { %v735_v7 = vmax.f32 %v671_v60, 0.0 }
  0xa5   : > { %3952 = vmatmul.msk.bf16.gmra.mxu0 %vm455_vm2, %v4201_v31  ;;  %v730_v45 = vmax.f32 %v659_v37, 0.0  ;;  %v1115_v31 = vrot.slane %v4951_v13, 1 }
  0xa6   : > { %v4959_v17 = vsel %vm881_vm4, %v735_v7, 0.0 }
  0xa7   : > { %v4910_v48 = vsel %vm822_vm3, %v730_v45, 0.0  ;;  %6612 = vst [vmem:[#allocation11_spill] sm:$0xff] %v4959_v17  ;;  %v1117_v28 = vrot.slane %v4959_v17, 1 }
  0xa8   : > { %6606 = vst [vmem:[#allocation5_spill] sm:$0xff] %v4910_v48  ;;  %v1109_v55 = vrot.slane %v4910_v48, 1 }
  0xaa   : > { %v560_v39 = vpop.f32.mrf.mxu0  ;;  %v660_v40 = vpop.f32.mrf.mxu1 }
  0xab   : > { %v661_v43 = vadd.f32 %v4895_v35, %v660_v40  ;;  %v561_v54 = vadd.f32 %v4895_v35, %v560_v39 }
  0xad   : > { %v4906_v47 = vmax.f32 %v661_v43, 0.0  ;;  %v691_v62 = vmax.f32 %v561_v54, 0.0  ;;  %v4991_v43 = vsel %vm1038_vm5, %v1115_v31, %v1117_v28 }
  0xae   : > { %6615 = vst [vmem:[#allocation14_spill] sm:$0xff] %v4991_v43 }
  0xaf   : > { %6605 = vst [vmem:[#allocation4_spill] sm:$0xff] %v4906_v47  ;;  %v1110_v56 = vrot.slane %v4906_v47, 1  ;;  %v4949_v11 = vsel %vm822_vm3, %v691_v62, 0.0 }
  0xb0   : > { %v1044_v18 = vrot.slane %v4949_v11, 1  ;;  %v1221_v20 = vrot.slane %v4949_v11, 2 }
  0xb1   : > { %v4930_v0 = vsel %vm1038_vm5, %v1109_v55, %v1110_v56 }
  0xb2   : > { %v563_v50 = vpop.f32.mrf.mxu0  ;;  %v663_v51 = vpop.f32.mrf.mxu1  ;;  %6608 = vst [vmem:[#allocation7_spill] sm:$0xff] %v4930_v0 }
  0xb3   : > { %v664_v52 = vadd.f32 %v4895_v35, %v663_v51  ;;  %v564_v59 = vadd.f32 %v4895_v35, %v563_v50 }
  0xb5   : > { %v732_v57 = vmax.f32 %v664_v52, 0.0  ;;  %3953 = vmatmul.msk.bf16.gmra.mxu0 %vm455_vm2, %v4202_v49  ;;  %v4936_v3 = vmax.f32 %v564_v59, 0.0  ;;  %v4204_v52 = vld [vmem:[%s4843_s29 + $0x60] sm:$0xff] }
  0xb7   : > { %v4926_v61 = vsel %vm881_vm4, %v732_v57, 0.0  ;;  %v1045_v15 = vrot.slane %v4936_v3, 1  ;;  %v1222_v16 = vrot.slane %v4936_v3, 2 }
  0xb8   : > { %6607 = vst [vmem:[#allocation6_spill] sm:$0xff] %v4926_v61  ;;  %v1112_v63 = vrot.slane %v4926_v61, 1 }
  0xb9   : > { %v1223_v33 = vsel %vm1215_vm6, %v1221_v20, %v1222_v16  ;;  %v4975_v36 = vsel %vm1038_vm5, %v1044_v18, %v1045_v15  ;;  %v4205_v20 = vld [vmem:[%s4843_s29 + $0x68] sm:$0xff] }
  0xba   : > { %v565_v4 = vpop.f32.mrf.mxu0  ;;  %v4939_v5 = vsel %vm1038_vm5, %v1110_v56, %v1112_v63  ;;  %v665_v6 = vpop.f32.mrf.mxu1 }
  0xbb   : > { %6609 = vst [vmem:[#allocation8_spill] sm:$0xff] %v4939_v5  ;;  %v566_v8 = vadd.f32 %v4895_v35, %v565_v4  ;;  %v4944_v9 = vpack.i.bf16 %v4939_v5, %v4930_v0  ;;  %v666_v10 = vadd.f32 %v4895_v35, %v665_v6 }
  0xbd   : > { %6610 = vst [vmem:[#allocation9_spill] sm:$0xff] %v4944_v9  ;;  %v693_v12 = vmax.f32 %v566_v8, 0.0  ;;  %4281 = vrot.lane.b32.xlu2 %v4944_v9, %s4781_s6  ;;  %v733_v14 = vmax.f32 %v666_v10, 0.0 }
  0xbf   : > { %v941_v19 = vsel %vm881_vm4, %v693_v12, 0.0  ;;  %v4967_v26 = vsel %vm822_vm3, %v733_v14, 0.0 }
  0xc0   : > { %v1047_v21 = vrot.slane %v941_v19, 1  ;;  %v1224_v25 = vrot.slane %v941_v19, 2  ;;  %6613 = vst [vmem:[#allocation12_spill] sm:$0xff] %v4967_v26  ;;  %v1114_v38 = vrot.slane %v4967_v26, 1 }
  0xc2   : > { %v568_v32 = vpop.f32.mrf.mxu0  ;;  %v1225_v34 = vsel %vm1215_vm6, %v1222_v16, %v1224_v25  ;;  %v4978_v37 = vsel %vm1038_vm5, %v1045_v15, %v1047_v21  ;;  %v4988_v41 = vsel %vm1038_vm5, %v1114_v38, %v1115_v31  ;;  %v4320_v25 = vpack.i.bf16 %v4936_v3, %v4949_v11 }
  0xc3   : > { %v4300_v39 = vpack.i.bf16 %v1225_v34, %v1223_v33  ;;  %v4285_v40 = vpack.i.bf16 %v4978_v37, %v4975_v36  ;;  %6614 = vst [vmem:[#allocation13_spill] sm:$0xff] %v4988_v41  ;;  %v4995_v45 = vpack.i.bf16 %v4991_v43, %v4988_v41  ;;  %v569_v49 = vadd.f32 %v4895_v35, %v568_v32 }
  0xc5   : > { %3954 = vmatmul.msk.bf16.gmra.mxu0 %vm455_vm2, %v4203_v30  ;;  %4301 = vrot.lane.b32.xlu1 %v4300_v39, %s4781_s6  ;;  %6616 = vst [vmem:[#allocation15_spill] sm:$0xff] %v4995_v45  ;;  %v694_v51 = vmax.f32 %v569_v49, 0.0 }
  0xc6   : > { %4296 = vrot.lane.b32.xlu2 %v4300_v39, %s4780_s30  ;;  %4286 = vrot.lane.b32.xlu0 %v4285_v40, %s4781_s6 }
  0xc7   : > { %v5007_v56 = vsel %vm822_vm3, %v694_v51, 0.0 }
  0xc8   : > { %v1049_v62 = vrot.slane %v5007_v56, 1  ;;  %v1226_v63 = vrot.slane %v5007_v56, 2 }
  0xca   : > { %v570_v44 = vpop.f32.mrf.mxu0 }
  0xcb   : > { %v571_v50 = vadd.f32 %v4895_v35, %v570_v44 }
  0xcd   : > { %v5002_v53 = vmax.f32 %v571_v50, 0.0 }
  0xce   : > { %4291 = vrot.lane.b32.xlu0 %v4995_v45, %s4781_s6 }
  0xcf   : > { %v1227_v58 = vrot.slane %v5002_v53, 2  ;;  %v1050_v59 = vrot.slane %v5002_v53, 1  ;;  %v4350_v34 = vpack.i.bf16 %v5002_v53, %v5007_v56 }
  0xd1   : > { %v1228_v7 = vsel %vm1215_vm6, %v1226_v63, %v1227_v58  ;;  %v5019_v8 = vsel %vm1038_vm5, %v1049_v62, %v1050_v59 }
  0xd2   : > { %v573_v54 = vpop.f32.mrf.mxu0 }
  0xd3   : > { %v574_v55 = vadd.f32 %v4895_v35, %v573_v54  ;;  %v4206_v54 = vld [vmem:[%s4843_s29 + $0x70] sm:$0xff] }
  0xd5   : > { %v696_v57 = vmax.f32 %v574_v55, 0.0  ;;  %3955 = vmatmul.msk.bf16.gmra.mxu0 %vm455_vm2, %v4204_v52 }
  0xd7   : > { %v944_v60 = vsel %vm881_vm4, %v696_v57, 0.0 }
  0xd8   : > { %v1052_v1 = vrot.slane %v944_v60, 1  ;;  %v1229_v2 = vrot.slane %v944_v60, 2 }
  0xda   : > { %v1230_v4 = vsel %vm1215_vm6, %v1227_v58, %v1229_v2  ;;  %v575_v6 = vpop.f32.mrf.mxu0  ;;  %v5022_v10 = vsel %vm1038_vm5, %v1050_v59, %v1052_v1 }
  0xdb   : > { %v576_v12 = vadd.f32 %v4895_v35, %v575_v6  ;;  %v2063_v14 = vpack.c.bf16 %v1230_v4, %v1228_v7  ;;  %v4305_v15 = vpack.i.bf16 %v5022_v10, %v5019_v8  ;;  %v4325_v16 = vpack.i.bf16 %v1230_v4, %v1228_v7 }
  0xdd   : > { %v697_v18 = vmax.f32 %v576_v12, 0.0  ;;  %4045 = vmatmul.msk.bf16.vlgmr.msrb.gmra.mxu3 %vm1866_vm7, %v2063_v14  ;;  %4306 = vrot.lane.b32.xlu1 %v4305_v15, %s4781_s6 }
  0xde   : > { %4326 = vrot.lane.b32.xlu2 %v4325_v16, %s4781_s6  ;;  %4311 = vrot.lane.b32.xlu0 %v4325_v16, %s4780_s30 }
  0xdf   : > { %v5033_v19 = vsel %vm822_vm3, %v697_v18, 0.0 }
  0xe0   : > { %v4330_v28 = vpack.i.bf16 %v5033_v19, %v5002_v53  ;;  %v1054_v49 = vrot.slane %v5033_v19, 1  ;;  %v1231_v50 = vrot.slane %v5033_v19, 2 }
  0xe2   : > { %v578_v21 = vpop.f32.mrf.mxu0 }
  0xe3   : > { %v579_v30 = vadd.f32 %v4895_v35, %v578_v21 }
  0xe5   : > { %3956 = vmatmul.msk.bf16.gmra.mxu0 %vm455_vm2, %v4205_v20  ;;  %4321 = vrot.lane.b32.xlu1 %v4320_v25, %s4782_s13  ;;  %v5045_v31 = vmax.f32 %v579_v30, 0.0 }
  0xe6   : > { %4331 = vrot.lane.b32.xlu2 %v4330_v28, %s4780_s30  ;;  %4316 = vrot.lane.b32.xlu0 %v4305_v15, %s4782_s13  ;;  %v4207_v15 = vld [vmem:[%s4843_s29 + $0x78] sm:$0xff] }
  0xe7   : > { %v1232_v39 = vrot.slane %v5045_v31, 2  ;;  %v1055_v40 = vrot.slane %v5045_v31, 1 }
  0xe9   : > { %v1233_v57 = vsel %vm1215_vm6, %v1231_v50, %v1232_v39  ;;  %v5061_v59 = vsel %vm1038_vm5, %v1054_v49, %v1055_v40 }
  0xea   : > { %v580_v32 = vpop.f32.mrf.mxu0 }
  0xeb   : > { %v581_v33 = vadd.f32 %v4895_v35, %v580_v32  ;;  %v4385_v32 = vpack.i.bf16 %v5045_v31, %v5033_v19 }
  0xed   : > { %v699_v38 = vmax.f32 %v581_v33, 0.0 }
  0xee   : > { %4351 = vrot.lane.b32.xlu2 %v4350_v34, %s4782_s13 }
  0xef   : > { %v947_v44 = vsel %vm881_vm4, %v699_v38, 0.0 }
  0xf0   : > { %v1057_v51 = vrot.slane %v947_v44, 1  ;;  %v1234_v52 = vrot.slane %v947_v44, 2 }
  0xf2   : > { %v583_v55 = vpop.f32.mrf.mxu0  ;;  %v1235_v58 = vsel %vm1215_vm6, %v1232_v39, %v1234_v52  ;;  %v5064_v60 = vsel %vm1038_vm5, %v1055_v40, %v1057_v51 }
  0xf3   : > { %v584_v62 = vadd.f32 %v4895_v35, %v583_v55  ;;  %v2066_v63 = vpack.c.bf16 %v1235_v58, %v1233_v57  ;;  %v4335_v1 = vpack.i.bf16 %v5064_v60, %v5061_v59  ;;  %v4340_v12 = vpack.i.bf16 %v1235_v58, %v1233_v57 }
  0xf5   : > { %v700_v2 = vmax.f32 %v584_v62, 0.0  ;;  %3957 = vmatmul.msk.bf16.gmra.mxu0 %vm455_vm2, %v4206_v54  ;;  %4046 = vmatmul.msk.bf16.gmra.mxu3 %vm1866_vm7, %v2066_v63  ;;  %v5116_v63 = vpop.f32.mrf.mxu3 }
  0xf6   : > { %4336 = vrot.lane.b32.xlu1 %v4335_v1, %s4781_s6 }
  0xf7   : > { %v5074_v4 = vsel %vm822_vm3, %v700_v2, 0.0 }
  0xf8   : > { %v4355_v6 = vpack.i.bf16 %v5074_v4, %v5045_v31  ;;  %v1059_v33 = vrot.slane %v5074_v4, 1  ;;  %v1236_v34 = vrot.slane %v5074_v4, 2 }
  0xfa   : > { %v585_v7 = vpop.f32.mrf.mxu0  ;;  %4356 = vrot.lane.b32.xlu0 %v4355_v6, %s4780_s30 }
  0xfb   : > { %v586_v14 = vadd.f32 %v4895_v35, %v585_v7 }
  0xfd   : > { %v5082_v16 = vmax.f32 %v586_v14, 0.0 }
  0xfe   : > { %4341 = vrot.lane.b32.xlu1 %v4340_v12, %s4780_s30 }
  0xff   : > { %v1237_v25 = vrot.slane %v5082_v16, 2  ;;  %v1060_v28 = vrot.slane %v5082_v16, 1 }
 0x101   : > { %v1238_v44 = vsel %vm1215_vm6, %v1236_v34, %v1237_v25  ;;  %v5100_v50 = vsel %vm1038_vm5, %v1059_v33, %v1060_v28  ;;  %v4227_v33 = vld [vmem:[%s6561_s3 + $0x38] sm:$0xff] }
 0x102   : > { %v588_v18 = vpop.f32.mrf.mxu0  ;;  %4361 = vrot.lane.b32.xlu0 %v4340_v12, %s4781_s6  ;;  %2305 = vmatpush.bf16.msrb.mxu1 %v4227_v33  ;;  %v4223_v33 = vld [vmem:[%s6561_s3 + $0x18] sm:$0xff] }
 0x103   : > { %v589_v20 = vadd.f32 %v4895_v35, %v588_v18 }
 0x105   : > { %v702_v21 = vmax.f32 %v589_v20, 0.0  ;;  %3958 = vmatmul.msk.bf16.gmra.mxu0 %vm455_vm2, %v4207_v15  ;;  %v5128_v20 = vpop.f32.mrf.mxu3 }
 0x106   : > { %4346 = vrot.lane.b32.xlu1 %v4335_v1, %s4782_s13  ;;  %v4208_v1 = vld [vmem:[%s4843_s29 + $0x80] sm:$0xff] }
 0x107   : > { %v950_v30 = vsel %vm881_vm4, %v702_v21, 0.0 }
 0x108   : > { %v1062_v38 = vrot.slane %v950_v30, 1  ;;  %v1239_v39 = vrot.slane %v950_v30, 2 }
 0x10a   : > { %v590_v40 = vpop.f32.mrf.mxu0  ;;  %4386 = vrot.lane.b32.xlu0 %v4385_v32, %s4782_s13  ;;  %v1240_v49 = vsel %vm1215_vm6, %v1237_v25, %v1239_v39  ;;  %v5103_v51 = vsel %vm1038_vm5, %v1060_v28, %v1062_v38 }
 0x10b   : > { %v591_v52 = vadd.f32 %v4895_v35, %v590_v40  ;;  %v2069_v54 = vpack.c.bf16 %v1240_v49, %v1238_v44  ;;  %v4365_v55 = vpack.i.bf16 %v5103_v51, %v5100_v50  ;;  %v4370_v7 = vpack.i.bf16 %v1240_v49, %v1238_v44  ;;  %v4209_v49 = vld [vmem:[%s4843_s29 + $0x88] sm:$0xff] }
 0x10c   : > { %v4415_v44 = vpack.i.bf16 %v5082_v16, %v5074_v4 }
 0x10d   : > { %v703_v57 = vmax.f32 %v591_v52, 0.0  ;;  %4047 = vmatmul.msk.bf16.gmra.mxu3 %vm1866_vm7, %v2069_v54  ;;  %4366 = vrot.lane.b32.xlu2 %v4365_v55, %s4781_s6 }
 0x10f   : > { %v5112_v58 = vsel %vm822_vm3, %v703_v57, 0.0 }
 0x110   : > { %v4375_v62 = vpack.i.bf16 %v5112_v58, %v5082_v16  ;;  %v1241_v14 = vrot.slane %v5112_v58, 2  ;;  %v1064_v38 = vrot.slane %v5112_v58, 1 }
 0x112   : > { %v593_v2 = vpop.f32.mrf.mxu0  ;;  %4376 = vrot.lane.b32.xlu1 %v4375_v62, %s4780_s30  ;;  %v5155_v62 = vpop.f32.mrf.mxu3 }
 0x113   : > { %v594_v6 = vadd.f32 %v4895_v35, %v593_v2 }
 0x115   : > { %v5121_v12 = vmax.f32 %v594_v6, 0.0  ;;  %3959 = vmatmul.msk.bf16.gmra.mxu0 %vm455_vm2, %v4208_v1  ;;  %4371 = vrot.lane.b32.xlu2 %v4370_v7, %s4780_s30  ;;  %v4226_v1 = vld [vmem:[%s6561_s3 + $0x30] sm:$0xff] }
 0x116   : > { %2306 = vmatpush.bf16.msrb.mxu1 %v4226_v1 }
 0x117   : > { %v1242_v15 = vrot.slane %v5121_v12, 2  ;;  %v1065_v32 = vrot.slane %v5121_v12, 1 }
 0x119   : > { %v1243_v18 = vsel %vm1215_vm6, %v1241_v14, %v1242_v15 }
 0x11a   : > { %v595_v21 = vpop.f32.mrf.mxu0  ;;  %4391 = vrot.lane.b32.xlu1 %v4370_v7, %s4781_s6  ;;  %v4395_v25 = vpack.i.bf16 %v5007_v56, %v1243_v18 }
 0x11b   : > { %v596_v28 = vadd.f32 %v4895_v35, %v595_v21 }
 0x11c   : > { %4396 = vrot.lane.b32.xlu0 %v4395_v25, %s4780_s30 }
 0x11d   : > { %v705_v30 = vmax.f32 %v596_v28, 0.0  ;;  %4381 = vrot.lane.b32.xlu2 %v4365_v55, %s4782_s13  ;;  %v5150_v55 = vsel %vm1038_vm5, %v1064_v38, %v1065_v32  ;;  %v680_v28 = vpop.f32.mrf.mxu3  ;;  %v4210_v38 = vld [vmem:[%s4843_s29 + $0x90] sm:$0xff] }
 0x11f   : > { %v953_v34 = vsel %vm881_vm4, %v705_v30, 0.0  ;;  %v4224_v30 = vld [vmem:[%s6561_s3 + $0x20] sm:$0xff] }
 0x120   : > { %v1067_v39 = vrot.slane %v953_v34, 1  ;;  %v1244_v40 = vrot.slane %v953_v34, 2 }
 0x122   : > { %v598_v52 = vpop.f32.mrf.mxu0  ;;  %4416 = vrot.lane.b32.xlu1 %v4415_v44, %s4782_s13  ;;  %v5147_v54 = vsel %vm1215_vm6, %v1242_v15, %v1244_v40  ;;  %v5153_v57 = vsel %vm1038_vm5, %v1065_v32, %v1067_v39  ;;  %v4225_v15 = vld [vmem:[%s6561_s3 + $0x28] sm:$0xff]  ;;  %v4222_v44 = vld [vmem:[%s6561_s3 + $0x10] sm:$0xff] }
 0x123   : > { %v599_v2 = vadd.f32 %v4895_v35, %v598_v52  ;;  %v2072_v6 = vpack.c.bf16 %v5147_v54, %v1243_v18  ;;  %v4400_v7 = vpack.i.bf16 %v5153_v57, %v5150_v55  ;;  %2307 = vmatpush.bf16.msrb.mxu1 %v4225_v15  ;;  %v4420_v1 = vpack.i.bf16 %v5147_v54, %v1243_v18  ;;  %v5202_v18 = vpop.permute.xlu2 %4281 }
 0x124   : > { %6617 = vst [vmem:[#allocation16_spill] sm:$0xff] %v5202_v18 }
 0x125   : > { %v706_v14 = vmax.f32 %v599_v2, 0.0  ;;  %3960 = vmatmul.msk.bf16.gmra.mxu0 %vm455_vm2, %v4209_v49  ;;  %4048 = vmatmul.msk.bf16.gmra.mxu3 %vm1866_vm7, %v2072_v6  ;;  %v683_v40 = vpop.f32.mrf.mxu3  ;;  %v4221_v6 = vld [vmem:[%s6561_s3 + $0x8] sm:$0xff] }
 0x126   : > { %4401 = vrot.lane.b32.xlu2 %v4400_v7, %s4781_s6  ;;  %4411 = vrot.lane.b32.xlu0 %v4400_v7, %s4782_s13  ;;  %v4220_v40 = vld [vmem:[%s6561_s3] sm:$0xff] }
 0x127   : > { %v5173_v21 = vsel %vm822_vm3, %v706_v14, 0.0  ;;  %2308 = vmatpush.bf16.msrb.mxu1 %v4224_v30 }
 0x128   : > { %v4405_v32 = vpack.i.bf16 %v5173_v21, %v5121_v12  ;;  %v1069_v30 = vrot.slane %v5173_v21, 1 }
 0x12a   : > { %v600_v25 = vpop.f32.mrf.mxu0 }
 0x12b   : > { %v601_v34 = vadd.f32 %v4895_v35, %v600_v25  ;;  %2309 = vmatpush.bf16.msrb.mxu1 %v4223_v33 }
 0x12d   : > { %v5189_v49 = vmax.f32 %v601_v34, 0.0 }
 0x12e   : > { %4406 = vrot.lane.b32.xlu2 %v4405_v32, %s4780_s30  ;;  %v1246_v32 = vrot.slane %v5173_v21, 2 }
 0x12f   : > { %2310 = vmatpush.bf16.msrb.mxu1 %v4222_v44  ;;  %v1247_v14 = vrot.slane %v5189_v49, 2  ;;  %v1070_v15 = vrot.slane %v5189_v49, 1 }
 0x131   : > { %v1248_v44 = vsel %vm1215_vm6, %v1246_v32, %v1247_v14  ;;  %v5231_v32 = vpop.permute.xlu2 %4296 }
 0x132   : > { %v603_v39 = vpop.f32.mrf.mxu0 }
 0x133   : > { %v604_v52 = vadd.f32 %v4895_v35, %v603_v39  ;;  %2311 = vmatpush.bf16.msrb.mxu1 %v4221_v6  ;;  %v685_v39 = vpop.f32.mrf.mxu3 }
 0x135   : > { %v708_v2 = vmax.f32 %v604_v52, 0.0  ;;  %3961 = vmatmul.msk.bf16.gmra.mxu0 %vm455_vm2, %v4210_v38  ;;  %v5215_v52 = vsel %vm1038_vm5, %v1069_v30, %v1070_v15 }
 0x136   : > { %4421 = vrot.lane.b32.xlu2 %v4420_v1, %s4781_s6  ;;  %6619 = vst [vmem:[#allocation18_spill] sm:$0xff] %v5215_v52 }
 0x137   : > { %v956_v7 = vsel %vm881_vm4, %v708_v2, 0.0  ;;  %2312 = vmatpush.bf16.msrb.mxu1 %v4220_v40 }
 0x138   : > { %v1072_v25 = vrot.slane %v956_v7, 1  ;;  %v1249_v28 = vrot.slane %v956_v7, 2  ;;  %v4277_v7 = vpop.permute.xlu1 %4276 }
 0x139   : > { %v4278_v26 = vunpack.i.l.bf16 %v4277_v7 }
 0x13a   : > { %v605_v33 = vpop.f32.mrf.mxu0  ;;  %v1250_v34 = vsel %vm1215_vm6, %v1247_v14, %v1249_v28  ;;  %v5208_v38 = vsel %vm1038_vm5, %v1070_v15, %v1072_v25  ;;  %v4440_v25 = vpack.i.bf16 %v5121_v12, %v5112_v58  ;;  %v4272_v28 = vpop.permute.xlu0 %4271  ;;  %v4211_v14 = vld [vmem:[%s4843_s29 + $0x98] sm:$0xff] }
 0x13b   : > { %6618 = vst [vmem:[#allocation17_spill] sm:$0xff] %v5208_v38  ;;  %v606_v1 = vadd.f32 %v4895_v35, %v605_v33  ;;  %v2075_v2 = vpack.c.bf16 %v1250_v34, %v1248_v44  ;;  %v4435_v6 = vpack.i.bf16 %v5208_v38, %v5215_v52  ;;  %v5250_v23 = vpack.i.bf16 %v1250_v34, %v1248_v44 }
 0x13c   : > { %v4273_v41 = vunpack.i.l.bf16 %v4272_v28 }
 0x13d   : > { %v709_v39 = vmax.f32 %v606_v1, 0.0  ;;  %4049 = vmatmul.msk.bf16.gmra.mxu3 %vm1866_vm7, %v2075_v2  ;;  %4436 = vrot.lane.b32.xlu1 %v4435_v6, %s4782_s13 }
 0x13e   : > { %4441 = vrot.lane.b32.xlu2 %v4440_v25, %s4782_s13  ;;  %4426 = vrot.lane.b32.xlu0 %v4435_v6, %s4781_s6 }
 0x13f   : > { %v5229_v15 = vsel %vm822_vm3, %v709_v39, 0.0 }
 0x140   : > { %6620 = vst [vmem:[#allocation19_spill] sm:$0xff] %v5229_v15  ;;  %v4430_v1 = vpack.i.bf16 %v5229_v15, %v5189_v49  ;;  %v5239_v2 = vpop.permute.xlu1 %4301  ;;  %v1074_v43 = vrot.slane %v5229_v15, 1 }
 0x142   : > { %v608_v30 = vpop.f32.mrf.mxu0  ;;  %v5244_v25 = vpop.permute.xlu0 %4286 }
 0x143   : > { %v609_v33 = vadd.f32 %v4895_v35, %v608_v30  ;;  %v5247_v30 = vpop.permute.xlu2 %4326 }
 0x145   : > { %v5234_v40 = vmax.f32 %v609_v33, 0.0  ;;  %3962 = vmatmul.msk.bf16.gmra.mxu0 %vm455_vm2, %v4211_v14 }
 0x146   : > { %4431 = vrot.lane.b32.xlu0 %v4430_v1, %s4780_s30  ;;  %v4274_v1 = vunpack.i.h.bf16 %v4272_v28 }
 0x147   : > { %6621 = vst [vmem:[#allocation20_spill] sm:$0xff] %v5234_v40  ;;  %v4455_v6 = vpack.i.bf16 %v5147_v54, %v5234_v40  ;;  %v1252_v0 = vrot.slane %v5234_v40, 2  ;;  %v1075_v5 = vrot.slane %v5234_v40, 1 }
 0x149   : > { %4456 = vrot.lane.b32.xlu1 %v4455_v6, %s4780_s30 }
 0x14a   : > { %v610_v39 = vpop.f32.mrf.mxu0  ;;  %v5262_v18 = vpop.permute.xlu0 %4291 }
 0x14b   : > { %v611_v33 = vadd.f32 %v4895_v35, %v610_v39  ;;  %v1251_v39 = vrot.slane %v5229_v15, 2  ;;  %6622 = vst [vmem:[#allocation21_spill] sm:$0xff] %v5262_v18  ;;  %v1867_v18 = vsel %vm1866_vm7, 0.0, %v4273_v41  ;;  %v5276_v9 = vpop.permute.xlu2 %4331 }
 0x14d   : > { %v711_v14 = vmax.f32 %v611_v33, 0.0  ;;  %v4279_v33 = vunpack.i.h.bf16 %v4277_v7  ;;  %v1253_v28 = vsel %vm1215_vm6, %v1251_v39, %v1252_v0  ;;  %v1900_v7 = vsel %vm1899_vm8, %v1867_v18, %v4278_v26 }
 0x14e   : > { %4446 = vrot.lane.b32.xlu0 %v5250_v23, %s4781_s6 }
 0x14f   : > { %v959_v54 = vsel %vm881_vm4, %v711_v14, 0.0  ;;  %v5258_v6 = vpop.permute.xlu1 %4306  ;;  %v5267_v14 = vsel %vm1038_vm5, %v1074_v43, %v1075_v5  ;;  %v4235_v43 = vld [vmem:[%s6561_s3 + $0x78] sm:$0xff] }
 0x150   : > { %v1077_v34 = vrot.slane %v959_v54, 1  ;;  %v1254_v44 = vrot.slane %v959_v54, 2  ;;  %6623 = vst [vmem:[#allocation22_spill] sm:$0xff] %v5267_v14  ;;  %v1868_v54 = vsel %vm1866_vm7, 0.0, %v4274_v1  ;;  %2394 = vmatpush.bf16.msra.mxu2 %v4235_v43 }
 0x151   : > { %v1901_v41 = vsel %vm1899_vm8, %v1868_v54, %v4279_v33  ;;  %v4234_v33 = vld [vmem:[%s6561_s3 + $0x70] sm:$0xff] }
 0x152   : > { %v613_v24 = vpop.f32.mrf.mxu0  ;;  %v1255_v29 = vsel %vm1215_vm6, %v1252_v0, %v1254_v44  ;;  %v5270_v45 = vsel %vm1038_vm5, %v1075_v5, %v1077_v34  ;;  %v4450_v0 = vpack.i.bf16 %v5189_v49, %v5173_v21  ;;  %v5290_v34 = vpop.permute.xlu0 %4311 }
 0x153   : > { %6624 = vst [vmem:[#allocation23_spill] sm:$0xff] %v5270_v45  ;;  %v2078_v17 = vpack.c.bf16 %v1255_v29, %v1253_v28  ;;  %v4460_v13 = vpack.i.bf16 %v5270_v45, %v5267_v14  ;;  %v614_v5 = vadd.f32 %v4895_v35, %v613_v24  ;;  %v5298_v18 = vpack.i.bf16 %v1255_v29, %v1253_v28  ;;  %v4352_v28 = vpop.permute.xlu2 %4351 }
 0x154   : > { %2395 = vmatpush.bf16.msra.mxu2 %v4234_v33  ;;  %v4288_v29 = vunpack.i.l.bf16 %v5244_v25  ;;  %v4354_v33 = vunpack.i.h.bf16 %v4352_v28 }
 0x155   : > { %4050 = vmatmul.msk.bf16.gmra.mxu3 %vm1866_vm7, %v2078_v17  ;;  %4461 = vrot.lane.b32.xlu1 %v4460_v13, %s4781_s6  ;;  %v712_v24 = vmax.f32 %v614_v5, 0.0  ;;  %v4289_v5 = vunpack.i.h.bf16 %v5244_v25 }
 0x156   : > { %4466 = vrot.lane.b32.xlu2 %v4460_v13, %s4782_s13  ;;  %4451 = vrot.lane.b32.xlu0 %v4450_v0, %s4782_s13  ;;  %v1869_v25 = vsel %vm1866_vm7, %v4949_v11, %v4288_v29 }
 0x157   : > { %v4322_v17 = vpop.permute.xlu1 %4321  ;;  %v5307_v43 = vsel %vm822_vm3, %v712_v24, 0.0 }
 0x158   : > { %v4324_v1 = vunpack.i.h.bf16 %v4322_v17  ;;  %v4323_v39 = vunpack.i.l.bf16 %v4322_v17  ;;  %6626 = vst [vmem:[#allocation25_spill] sm:$0xff] %v5307_v43 }
 0x15a   : > { %v615_v44 = vpop.f32.mrf.mxu0  ;;  %v1933_v13 = vsel %vm1932_vm9, %v1900_v7, %v4323_v39  ;;  %v1934_v14 = vsel %vm1932_vm9, %v1901_v41, %v4324_v1  ;;  %v4233_v41 = vld [vmem:[%s6561_s3 + $0x68] sm:$0xff]  ;;  %v1870_v7 = vsel %vm1866_vm7, %v4936_v3, %v4289_v5  ;;  %v4232_v1 = vld [vmem:[%s6561_s3 + $0x60] sm:$0xff]  ;;  %v4353_v39 = vunpack.i.l.bf16 %v4352_v28 }
 0x15b   : > { %v616_v26 = vadd.f32 %v4895_v35, %v615_v44  ;;  %v2061_v54 = vpack.c.bf16 %v1934_v14, %v1933_v13  ;;  %2396 = vmatpush.bf16.msra.mxu2 %v4233_v41  ;;  %v4299_v44 = vunpack.i.h.bf16 %v5231_v32  ;;  %v4298_v13 = vunpack.i.l.bf16 %v5231_v32  ;;  %v4231_v41 = vld [vmem:[%s6561_s3 + $0x58] sm:$0xff] }
 0x15c   : > { %v4485_v28 = vpack.i.bf16 %v5234_v40, %v5229_v15 }
 0x15d   : > { %v5300_v0 = vmax.f32 %v616_v26, 0.0  ;;  %4471 = vrot.lane.b32.xlu1 %v5298_v18, %s4781_s6  ;;  %2313 = vmatmul.bf16.vlgmr.msrb.gmra.mxu1 %v2061_v54  ;;  %v5329_v26 = vpop.permute.xlu0 %4316  ;;  %v1902_v5 = vsel %vm1899_vm8, %v1869_v25, %v4298_v13  ;;  %v1903_v11 = vsel %vm1899_vm8, %v1870_v7, %v4299_v44  ;;  %v1079_v13 = vrot.slane %v5307_v43, 1 }
 0x15e   : > { %v1936_v44 = vsel %vm1932_vm9, %v1903_v11, %v4354_v33 }
 0x15f   : > { %6625 = vst [vmem:[#allocation24_spill] sm:$0xff] %v5300_v0  ;;  %v5315_v14 = vpack.i.bf16 %v5300_v0, %v5307_v43  ;;  %2397 = vmatpush.bf16.msra.mxu2 %v4232_v1  ;;  %v1257_v54 = vrot.slane %v5300_v0, 2  ;;  %v1256_v1 = vrot.slane %v5307_v43, 2 }
 0x161   : > { %4481 = vrot.lane.b32.xlu2 %v5315_v14, %s4780_s30  ;;  %v1258_v15 = vsel %vm1215_vm6, %v1256_v1, %v1257_v54  ;;  %v4229_v1 = vld [vmem:[%s6561_s3 + $0x48] sm:$0xff] }
 0x162   : > { %v618_v17 = vpop.f32.mrf.mxu0 }
 0x163   : > { %v619_v24 = vadd.f32 %v4895_v35, %v618_v17  ;;  %v1935_v17 = vsel %vm1932_vm9, %v1902_v5, %v4353_v39  ;;  %2398 = vmatpush.bf16.msra.mxu2 %v4231_v41  ;;  %v4230_v5 = vld [vmem:[%s6561_s3 + $0x50] sm:$0xff] }
 0x164   : > { %v2064_v11 = vpack.c.bf16 %v1936_v44, %v1935_v17  ;;  %v4228_v44 = vld [vmem:[%s6561_s3 + $0x40] sm:$0xff] }
 0x165   : > { %v714_v3 = vmax.f32 %v619_v24, 0.0  ;;  %4476 = vrot.lane.b32.xlu1 %v5250_v23, %s4780_s30  ;;  %v1080_v23 = vrot.slane %v5300_v0, 1 }
 0x167   : > { %v962_v32 = vsel %vm881_vm4, %v714_v3, 0.0  ;;  %v5341_v29 = vpop.permute.xlu2 %4366  ;;  %v5362_v33 = vsel %vm1038_vm5, %v1079_v13, %v1080_v23  ;;  %2399 = vmatpush.bf16.msra.mxu2 %v4230_v5 }
 0x168   : > { %v1082_v25 = vrot.slane %v962_v32, 1  ;;  %v1259_v7 = vrot.slane %v962_v32, 2  ;;  %v5348_v24 = vpop.permute.xlu1 %4336  ;;  %6628 = vst [vmem:[#allocation27_spill] sm:$0xff] %v5362_v33 }
 0x169   : > { %4486 = vrot.lane.b32.xlu2 %v4485_v28, %s4782_s13 }
 0x16a   : > { %v620_v3 = vpop.f32.mrf.mxu0  ;;  %v1260_v0 = vsel %vm1215_vm6, %v1257_v54, %v1259_v7  ;;  %v5356_v39 = vsel %vm1038_vm5, %v1080_v23, %v1082_v25 }
 0x16b   : > { %6627 = vst [vmem:[#allocation26_spill] sm:$0xff] %v5356_v39  ;;  %v2081_v32 = vpack.c.bf16 %v1260_v0, %v1258_v15  ;;  %v4495_v28 = vpack.i.bf16 %v5356_v39, %v5362_v33  ;;  %v621_v54 = vadd.f32 %v4895_v35, %v620_v3  ;;  %2400 = vmatpush.bf16.msra.mxu2 %v4229_v1 }
 0x16c   : > { %v5364_v41 = vpop.permute.xlu0 %4356  ;;  %v5412_v39 = vpack.i.bf16 %v1260_v0, %v1258_v15 }
 0x16d   : > { %4051 = vmatmul.msk.bf16.gmra.mxu3 %vm1866_vm7, %v2081_v32  ;;  %2318 = vmatmul.bf16.gmra.mxu1 %v2064_v11  ;;  %v715_v17 = vmax.f32 %v621_v54, 0.0  ;;  %v4309_v11 = vunpack.i.h.bf16 %v5258_v6 }
 0x16e   : > { %4496 = vrot.lane.b32.xlu0 %v4495_v28, %s4782_s13 }
 0x16f   : > { %v5374_v23 = vpop.permute.xlu2 %4371  ;;  %2401 = vmatpush.bf16.msra.mxu2 %v4228_v44  ;;  %v5389_v32 = vsel %vm822_vm3, %v715_v17, 0.0  ;;  %v4313_v17 = vunpack.i.l.bf16 %v5290_v34 }
 0x170   : > { %v5377_v25 = vpop.permute.xlu1 %4341  ;;  %6630 = vst [vmem:[#allocation29_spill] sm:$0xff] %v5389_v32 }
 0x171   : > { %4491 = vrot.lane.b32.xlu2 %v4495_v28, %s4781_s6  ;;  %v4308_v28 = vunpack.i.l.bf16 %v5258_v6 }
 0x172   : > { %v623_v7 = vpop.f32.mrf.mxu0 }
 0x173   : > { %v624_v13 = vadd.f32 %v4895_v35, %v623_v7  ;;  %v4314_v7 = vunpack.i.h.bf16 %v5290_v34  ;;  %v1871_v6 = vsel %vm1866_vm7, %v5007_v56, %v4308_v28 }
 0x174   : > { %v5383_v3 = vpop.permute.xlu0 %4361  ;;  %v1904_v34 = vsel %vm1899_vm8, %v1871_v6, %v4313_v17 }
 0x175   : > { %v5385_v5 = vmax.f32 %v624_v13, 0.0 }
 0x176   : > { %4501 = vrot.lane.b32.xlu0 %v5298_v18, %s4780_s30  ;;  %v1872_v18 = vsel %vm1866_vm7, %v5002_v53, %v4309_v11 }
 0x177   : > { %6629 = vst [vmem:[#allocation28_spill] sm:$0xff] %v5385_v5  ;;  %v5395_v54 = vpop.permute.xlu2 %4381  ;;  %v5399_v1 = vpack.i.bf16 %v5385_v5, %v5389_v32  ;;  %v1905_v53 = vsel %vm1899_vm8, %v1872_v18, %v4314_v7  ;;  %v1262_v11 = vrot.slane %v5385_v5, 2  ;;  %v1085_v0 = vrot.slane %v5385_v5, 1 }
 0x178   : > { %v5410_v43 = vpop.permute.xlu1 %4346  ;;  %v1084_v7 = vrot.slane %v5389_v32, 1 }
 0x179   : > { %4511 = vrot.lane.b32.xlu1 %v5399_v1, %s4780_s30 }
 0x17a   : > { %v625_v44 = vpop.f32.mrf.mxu0 }
 0x17b   : > { %v626_v13 = vadd.f32 %v4895_v35, %v625_v44 }
 0x17c   : > { %v4387_v33 = vpop.permute.xlu0 %4386 }
 0x17d   : > { %v717_v40 = vmax.f32 %v626_v13, 0.0  ;;  %v4389_v45 = vunpack.i.h.bf16 %v4387_v33  ;;  %v4388_v61 = vunpack.i.l.bf16 %v4387_v33  ;;  %v1261_v33 = vrot.slane %v5389_v32, 2 }
 0x17e   : > { %4506 = vrot.lane.b32.xlu0 %v5412_v39, %s4781_s6  ;;  %v4338_v32 = vunpack.i.l.bf16 %v5348_v24 }
 0x17f   : > { %v965_v56 = vsel %vm881_vm4, %v717_v40, 0.0  ;;  %v1937_v28 = vsel %vm1932_vm9, %v1904_v34, %v4388_v61  ;;  %v1938_v15 = vsel %vm1932_vm9, %v1905_v53, %v4389_v45  ;;  %v1263_v61 = vsel %vm1215_vm6, %v1261_v33, %v1262_v11 }
 0x180   : > { %v1087_v44 = vrot.slane %v965_v56, 1  ;;  %v1264_v13 = vrot.slane %v965_v56, 2  ;;  %v5425_v47 = vpop.permute.xlu2 %4401  ;;  %v2067_v17 = vpack.c.bf16 %v1938_v15, %v1937_v28  ;;  %v5436_v34 = vsel %vm1038_vm5, %v1084_v7, %v1085_v0 }
 0x181   : > { %4516 = vrot.lane.b32.xlu1 %v5315_v14, %s4782_s13  ;;  %6632 = vst [vmem:[#allocation31_spill] sm:$0xff] %v5436_v34  ;;  %v4304_v15 = vunpack.i.h.bf16 %v5239_v2  ;;  %v4333_v7 = vunpack.i.l.bf16 %v5276_v9 }
 0x182   : > { %v628_v18 = vpop.f32.mrf.mxu0  ;;  %2323 = vmatmul.bf16.gmra.mxu1 %v2067_v17  ;;  %v1265_v45 = vsel %vm1215_vm6, %v1262_v11, %v1264_v13  ;;  %v5433_v40 = vsel %vm1038_vm5, %v1085_v0, %v1087_v44  ;;  %v4303_v0 = vunpack.i.l.bf16 %v5239_v2 }
 0x183   : > { %6631 = vst [vmem:[#allocation30_spill] sm:$0xff] %v5433_v40  ;;  %v2084_v6 = vpack.c.bf16 %v1265_v45, %v1263_v61  ;;  %v4525_v56 = vpack.i.bf16 %v5433_v40, %v5436_v34  ;;  %v629_v14 = vadd.f32 %v4895_v35, %v628_v18  ;;  %v5453_v17 = vpack.i.bf16 %v1265_v45, %v1263_v61 }
 0x184   : > { %v5438_v53 = vpop.permute.xlu1 %4376  ;;  %v4319_v18 = vunpack.i.h.bf16 %v5329_v26  ;;  %v1966_v2 = vsel %vm1866_vm7, %v4978_v37, %v4304_v15  ;;  %v4344_v15 = vunpack.i.h.bf16 %v5377_v25 }
 0x185   : > { %4052 = vmatmul.msk.bf16.gmra.mxu3 %vm1866_vm7, %v2084_v6  ;;  %4526 = vrot.lane.b32.xlu2 %v4525_v56, %s4782_s13  ;;  %v718_v33 = vmax.f32 %v629_v14, 0.0  ;;  %v1965_v14 = vsel %vm1866_vm7, %v4975_v36, %v4303_v0  ;;  %v1998_v36 = vsel %vm1899_vm8, %v1966_v2, %v4333_v7  ;;  %v4343_v0 = vunpack.i.l.bf16 %v5377_v25 }
 0x186   : > { %4521 = vrot.lane.b32.xlu0 %v4525_v56, %s4781_s6  ;;  %v1873_v7 = vsel %vm1866_vm7, %v5033_v19, %v4338_v32 }
 0x187   : > { %v5469_v61 = vsel %vm822_vm3, %v718_v33, 0.0 }
 0x188   : > { %v5446_v11 = vpop.permute.xlu2 %4406  ;;  %v1266_v19 = vrot.slane %v5469_v61, 2 }
 0x18a   : > { %v630_v28 = vpop.f32.mrf.mxu0 }
 0x18b   : > { %v631_v44 = vadd.f32 %v4895_v35, %v630_v28  ;;  %v4318_v28 = vunpack.i.l.bf16 %v5329_v26 }
 0x18c   : > { %v5451_v13 = vpop.permute.xlu1 %4391 }
 0x18d   : > { %v5456_v6 = vmax.f32 %v631_v44, 0.0  ;;  %4531 = vrot.lane.b32.xlu2 %v5453_v17, %s4781_s6  ;;  %v4339_v44 = vunpack.i.h.bf16 %v5348_v24  ;;  %v2030_v24 = vsel %vm1932_vm9, %v1998_v36, %v4319_v18  ;;  %v4329_v36 = vunpack.i.h.bf16 %v5247_v30 }
 0x18e   : > { %v5461_v56 = vpop.permute.xlu0 %4396 }
 0x18f   : > { %v4399_v45 = vunpack.i.h.bf16 %v5461_v56  ;;  %v5477_v5 = vpack.i.bf16 %v5456_v6, %v5469_v61  ;;  %v1267_v48 = vrot.slane %v5456_v6, 2 }
 0x190   : > { %v5492_v2 = vpop.permute.xlu2 %4421 }
 0x191   : > { %v1997_v37 = vsel %vm1899_vm8, %v1965_v14, %v4399_v45  ;;  %4541 = vrot.lane.b32.xlu0 %v5477_v5, %s4780_s30  ;;  %v1874_v14 = vsel %vm1866_vm7, %v5045_v31, %v4339_v44  ;;  %v1090_v31 = vrot.slane %v5456_v6, 1 }
 0x192   : > { %v633_v26 = vpop.f32.mrf.mxu0  ;;  %v2029_v33 = vsel %vm1932_vm9, %v1997_v37, %v4318_v28  ;;  %v1907_v18 = vsel %vm1899_vm8, %v1874_v14, %v4344_v15  ;;  %v1268_v15 = vsel %vm1215_vm6, %v1266_v19, %v1267_v48  ;;  %v4358_v14 = vunpack.i.l.bf16 %v5364_v41 }
 0x193   : > { %v634_v34 = vadd.f32 %v4895_v35, %v633_v26  ;;  %v2062_v40 = vpack.c.bf16 %v2030_v24, %v2029_v33  ;;  %v1906_v35 = vsel %vm1899_vm8, %v1873_v7, %v4343_v0  ;;  %v4328_v0 = vunpack.i.l.bf16 %v5247_v30 }
 0x194   : > { %v4417_v25 = vpop.permute.xlu1 %4416  ;;  %v4334_v24 = vunpack.i.h.bf16 %v5276_v9 }
 0x195   : > { %v720_v45 = vmax.f32 %v634_v34, 0.0  ;;  %v4419_v52 = vunpack.i.h.bf16 %v4417_v25  ;;  %v4418_v38 = vunpack.i.l.bf16 %v4417_v25  ;;  %2402 = vmatmul.bf16.vlgmr.msra.gmra.mxu2 %v2062_v40  ;;  %4536 = vrot.lane.b32.xlu2 %v5412_v39, %s4780_s30  ;;  %v1089_v40 = vrot.slane %v5469_v61, 1 }
 0x196   : > { %v1968_v25 = vsel %vm1866_vm7, %v5022_v10, %v4329_v36  ;;  %v1967_v9 = vsel %vm1866_vm7, %v5019_v8, %v4328_v0  ;;  %v4374_v10 = vunpack.i.h.bf16 %v5374_v23  ;;  %v4373_v8 = vunpack.i.l.bf16 %v5374_v23 }
 0x197   : > { %v968_v32 = vsel %vm881_vm4, %v720_v45, 0.0  ;;  %v1939_v34 = vsel %vm1932_vm9, %v1906_v35, %v4418_v38  ;;  %v1940_v28 = vsel %vm1932_vm9, %v1907_v18, %v4419_v52  ;;  %v5513_v38 = vsel %vm1038_vm5, %v1089_v40, %v1090_v31  ;;  %v5534_v18 = vld [vmem:[%s6560_s2] ss:$0 sm:$0xff] }
 0x198   : > { %v1092_v44 = vrot.slane %v968_v32, 1  ;;  %v1269_v37 = vrot.slane %v968_v32, 2  ;;  %v2070_v39 = vpack.c.bf16 %v1940_v28, %v1939_v34  ;;  %v4369_v45 = vunpack.i.h.bf16 %v5341_v29  ;;  %v4442_v35 = vpop.permute.xlu2 %4441 }
 0x199   : > { %4546 = vrot.lane.b32.xlu0 %v5399_v1, %s4782_s13  ;;  %v4348_v1 = vunpack.i.l.bf16 %v5410_v43  ;;  %v1999_v19 = vsel %vm1899_vm8, %v1967_v9, %v4334_v24  ;;  %v2000_v32 = vsel %vm1899_vm8, %v1968_v25, %v4358_v14  ;;  %v4444_v40 = vunpack.i.h.bf16 %v4442_v35 }
 0x19a   : > { %v1270_v26 = vsel %vm1215_vm6, %v1267_v48, %v1269_v37  ;;  %v635_v33 = vpop.f32.mrf.mxu0  ;;  %2328 = vmatmul.bf16.gmra.mxu1 %v2070_v39  ;;  %v5516_v52 = vsel %vm1038_vm5, %v1090_v31, %v1092_v44  ;;  %v4349_v48 = vunpack.i.h.bf16 %v5410_v43  ;;  %v4368_v31 = vunpack.i.l.bf16 %v5341_v29 }
 0x19b   : > { %v2087_v7 = vpack.c.bf16 %v1270_v26, %v1268_v15  ;;  %v4550_v30 = vpack.i.bf16 %v5516_v52, %v5513_v38  ;;  %v636_v43 = vadd.f32 %v5534_v18, %v635_v33  ;;  %v2031_v34 = vsel %vm1932_vm9, %v1999_v19, %v4348_v1 }
 0x19c   : > { %v2032_v28 = vsel %vm1932_vm9, %v2000_v32, %v4349_v48  ;;  %v4443_v44 = vunpack.i.l.bf16 %v4442_v35  ;;  %v1876_v37 = vsel %vm1866_vm7, %v5082_v16, %v4369_v45  ;;  %v1875_v29 = vsel %vm1866_vm7, %v5074_v4, %v4368_v31  ;;  %v5566_v45 = vpop.permute.xlu0 %4411 }
 0x19d   : > { %4053 = vmatmul.msk.bf16.gmra.mxu3 %vm1866_vm7, %v2087_v7  ;;  %4551 = vrot.lane.b32.xlu1 %v4550_v30, %s4781_s6  ;;  %v721_v39 = vmax.f32 %v636_v43, 0.0  ;;  %v2065_v33 = vpack.c.bf16 %v2032_v28, %v2031_v34  ;;  %v1908_v24 = vsel %vm1899_vm8, %v1875_v29, %v4373_v8  ;;  %v1909_v23 = vsel %vm1899_vm8, %v1876_v37, %v4374_v10 }
 0x19e   : > { %v1941_v7 = vsel %vm1932_vm9, %v1908_v24, %v4443_v44  ;;  %v1942_v16 = vsel %vm1932_vm9, %v1909_v23, %v4444_v40  ;;  %v4363_v1 = vunpack.i.l.bf16 %v5383_v3  ;;  %v4364_v9 = vunpack.i.h.bf16 %v5383_v3 }
 0x19f   : > { %v5558_v48 = vsel %vm822_vm3, %v721_v39, 0.0  ;;  %v2073_v25 = vpack.c.bf16 %v1942_v16, %v1941_v7  ;;  %v5572_v31 = vpack.i.bf16 %v1270_v26, %v1268_v15  ;;  %v4359_v32 = vunpack.i.h.bf16 %v5364_v41 }
 0x1a0   : > { %v1969_v19 = vsel %vm1866_vm7, %v5061_v59, %v4363_v1  ;;  %v1970_v3 = vsel %vm1866_vm7, %v5064_v60, %v4364_v9  ;;  %v4384_v8 = vunpack.i.h.bf16 %v5395_v54  ;;  %v4383_v26 = vunpack.i.l.bf16 %v5395_v54 }
 0x1a1   : > { %v2001_v41 = vsel %vm1899_vm8, %v1969_v19, %v4359_v32  ;;  %v1094_v60 = vrot.slane %v5558_v48, 1  ;;  %v1271_v40 = vrot.slane %v5558_v48, 2  ;;  %v4394_v9 = vunpack.i.h.bf16 %v5451_v13 }
 0x1a2   : > { %v638_v36 = vpop.f32.mrf.mxu0  ;;  %v2033_v16 = vsel %vm1932_vm9, %v2001_v41, %v4383_v26  ;;  %v4408_v26 = vunpack.i.l.bf16 %v5446_v11 }
 0x1a3   : > { %v639_v0 = vadd.f32 %v5534_v18, %v638_v36 }
 0x1a5   : > { %v5551_v14 = vmax.f32 %v639_v0, 0.0  ;;  %4556 = vrot.lane.b32.xlu1 %v4550_v30, %s4782_s13  ;;  %2407 = vmatmul.bf16.gmra.mxu2 %v2065_v33  ;;  %v4378_v30 = vunpack.i.l.bf16 %v5438_v53 }
 0x1a7   : > { %v5562_v4 = vpack.i.bf16 %v5551_v14, %v5558_v48  ;;  %v1272_v34 = vrot.slane %v5551_v14, 2  ;;  %v1095_v28 = vrot.slane %v5551_v14, 1  ;;  %v2002_v15 = vsel %vm1899_vm8, %v1970_v3, %v4378_v30 }
 0x1a8   : > { %v2034_v36 = vsel %vm1932_vm9, %v2002_v15, %v4384_v8  ;;  %v4393_v30 = vunpack.i.l.bf16 %v5451_v13  ;;  %v4414_v8 = vunpack.i.h.bf16 %v5566_v45  ;;  %v4413_v13 = vunpack.i.l.bf16 %v5566_v45 }
 0x1a9   : > { %4571 = vrot.lane.b32.xlu2 %v5562_v4, %s4780_s30  ;;  %v1273_v0 = vsel %vm1215_vm6, %v1271_v40, %v1272_v34  ;;  %v5599_v33 = vsel %vm1038_vm5, %v1094_v60, %v1095_v28  ;;  %v4379_v15 = vunpack.i.h.bf16 %v5438_v53  ;;  %v654_v53 = vadd.f32 %v5534_v18, %v4872_v22 }
 0x1aa   : > { %v640_v35 = vpop.f32.mrf.mxu0  ;;  %2333 = vmatmul.bf16.gmra.mxu1 %v2073_v25  ;;  %v4403_v22 = vunpack.i.l.bf16 %v5425_v47 }
 0x1ab   : > { %v641_v43 = vadd.f32 %v5534_v18, %v640_v35 }
 0x1ad   : > { %v723_v10 = vmax.f32 %v641_v43, 0.0  ;;  %4561 = vrot.lane.b32.xlu1 %v5572_v31, %s4781_s6 }
 0x1af   : > { %v971_v59 = vsel %vm881_vm4, %v723_v10, 0.0  ;;  %v5612_v25 = vpop.permute.xlu1 %4436  ;;  %v1971_v10 = vsel %vm1866_vm7, %v5100_v50, %v4393_v30  ;;  %v4398_v30 = vunpack.i.l.bf16 %v5461_v56  ;;  %v4423_v56 = vunpack.i.l.bf16 %v5492_v2 }
 0x1b0   : > { %v1097_v44 = vrot.slane %v971_v59, 1  ;;  %v1274_v37 = vrot.slane %v971_v59, 2  ;;  %v5591_v39 = vpop.permute.xlu0 %4426  ;;  %v2003_v59 = vsel %vm1899_vm8, %v1971_v10, %v4379_v15 }
 0x1b1   : > { %4576 = vrot.lane.b32.xlu2 %v5477_v5, %s4782_s13  ;;  %v2068_v5 = vpack.c.bf16 %v2034_v36, %v2033_v16  ;;  %v2035_v60 = vsel %vm1932_vm9, %v2003_v59, %v4413_v13  ;;  %v4424_v13 = vunpack.i.h.bf16 %v5492_v2 }
 0x1b2   : > { %v1275_v54 = vsel %vm1215_vm6, %v1272_v34, %v1274_v37  ;;  %v643_v29 = vpop.f32.mrf.mxu0  ;;  %v5602_v24 = vsel %vm1038_vm5, %v1095_v28, %v1097_v44  ;;  %v656_v28 = vadd.f32 %v5534_v18, %v4879_v27  ;;  %v4404_v37 = vunpack.i.h.bf16 %v5425_v47 }
 0x1b3   : > { %v2090_v23 = vpack.c.bf16 %v1275_v54, %v1273_v0  ;;  %v4585_v7 = vpack.i.bf16 %v5602_v24, %v5599_v33  ;;  %v644_v1 = vadd.f32 %v5534_v18, %v643_v29  ;;  %v5622_v3 = vpack.i.bf16 %v1275_v54, %v1273_v0  ;;  %v5658_v29 = vpop.permute.xlu2 %4466 }
 0x1b4   : > { %v729_v44 = vmax.f32 %v656_v28, 0.0 }
 0x1b5   : > { %4054 = vmatmul.msk.bf16.gmra.mxu3 %vm1866_vm7, %v2090_v23  ;;  %4566 = vrot.lane.b32.xlu1 %v5453_v17, %s4780_s30  ;;  %v724_v43 = vmax.f32 %v644_v1, 0.0  ;;  %v1972_v17 = vsel %vm1866_vm7, %v5103_v51, %v4394_v9  ;;  %v5660_v23 = vmax.f32 %v654_v53, 0.0 }
 0x1b6   : > { %4586 = vrot.lane.b32.xlu0 %v4585_v7, %s4782_s13  ;;  %2412 = vmatmul.bf16.gmra.mxu2 %v2068_v5  ;;  %v2004_v27 = vsel %vm1899_vm8, %v1972_v17, %v4408_v26  ;;  %v5665_v16 = vsel %vm881_vm4, %v729_v44, 0.0  ;;  %v1878_v5 = vsel %vm1866_vm7, %v5121_v12, %v4404_v37 }
 0x1b7   : > { %v5636_v51 = vsel %vm822_vm3, %v724_v43, 0.0  ;;  %v2036_v40 = vsel %vm1932_vm9, %v2004_v27, %v4414_v8  ;;  %v1877_v8 = vsel %vm1866_vm7, %v5112_v58, %v4403_v22 }
 0x1b8   : > { %v5616_v35 = vpop.permute.xlu0 %4431  ;;  %v2071_v0 = vpack.c.bf16 %v2036_v40, %v2035_v60  ;;  %v1099_v43 = vrot.slane %v5636_v51, 1 }
 0x1b9   : > { %4581 = vrot.lane.b32.xlu2 %v4585_v7, %s4781_s6  ;;  %v4433_v28 = vunpack.i.l.bf16 %v5616_v35 }
 0x1ba   : > { %v645_v19 = vpop.f32.mrf.mxu0 }
 0x1bb   : > { %v646_v32 = vadd.f32 %v5534_v18, %v645_v19  ;;  %v5640_v50 = vpop.permute.xlu1 %4456  ;;  %v5695_v37 = vpop.permute.xlu2 %4481 }
 0x1bc   : > { %v4459_v17 = vunpack.i.h.bf16 %v5640_v50 }
 0x1bd   : > { %v5628_v34 = vmax.f32 %v646_v32, 0.0  ;;  %v1276_v32 = vrot.slane %v5636_v51, 2 }
 0x1be   : > { %4591 = vrot.lane.b32.xlu0 %v5622_v3, %s4781_s6 }
 0x1bf   : > { %v5644_v45 = vpack.i.bf16 %v5628_v34, %v5636_v51  ;;  %v1277_v1 = vrot.slane %v5628_v34, 2  ;;  %v1100_v9 = vrot.slane %v5628_v34, 1 }
 0x1c0   : > { %v5650_v41 = vpop.permute.xlu0 %4446 }
 0x1c1   : > { %4596 = vrot.lane.b32.xlu1 %v5644_v45, %s4780_s30  ;;  %v1278_v53 = vsel %vm1215_vm6, %v1276_v32, %v1277_v1  ;;  %v5689_v60 = vsel %vm1038_vm5, %v1099_v43, %v1100_v9 }
 0x1c2   : > { %v648_v36 = vpop.f32.mrf.mxu0 }
 0x1c3   : > { %v649_v54 = vadd.f32 %v5534_v18, %v648_v36  ;;  %v1910_v36 = vsel %vm1899_vm8, %v1877_v8, %v4398_v30  ;;  %v1105_v30 = vrot.slane %v5660_v23, 1 }
 0x1c5   : > { %v726_v7 = vmax.f32 %v649_v54, 0.0  ;;  %v1911_v54 = vsel %vm1899_vm8, %v1878_v5, %v4459_v17  ;;  %v674_v5 = vadd.f32 %v5534_v18, %v5116_v63  ;;  %v1282_v63 = vrot.slane %v5660_v23, 2 }
 0x1c6   : > { %2417 = vmatmul.bf16.gmra.mxu2 %v2071_v0 }
 0x1c7   : > { %v974_v47 = vsel %vm881_vm4, %v726_v7, 0.0  ;;  %v5675_v19 = vpop.permute.xlu1 %4461 }
 0x1c8   : > { %v1102_v10 = vrot.slane %v974_v47, 1  ;;  %v1279_v12 = vrot.slane %v974_v47, 2  ;;  %v4452_v15 = vpop.permute.xlu0 %4451 }
 0x1c9   : > { %4616 = vrot.lane.b32.xlu1 %v5562_v4, %s4782_s13  ;;  %v4454_v59 = vunpack.i.h.bf16 %v4452_v15  ;;  %v4453_v58 = vunpack.i.l.bf16 %v4452_v15  ;;  %v4409_v15 = vunpack.i.h.bf16 %v5446_v11 }
 0x1ca   : > { %v1280_v26 = vsel %vm1215_vm6, %v1277_v1, %v1279_v12  ;;  %v650_v27 = vpop.f32.mrf.mxu0  ;;  %v5693_v2 = vsel %vm1038_vm5, %v1100_v9, %v1102_v10  ;;  %v1107_v1 = vrot.slane %v5665_v16, 1  ;;  %v1974_v9 = vsel %vm1866_vm7, %v5153_v57, %v4424_v13 }
 0x1cb   : > { %v651_v40 = vadd.f32 %v5534_v18, %v650_v27  ;;  %v2093_v44 = vpack.c.bf16 %v1280_v26, %v1278_v53  ;;  %v4605_v4 = vpack.i.bf16 %v5693_v2, %v5689_v60  ;;  %v1943_v22 = vsel %vm1932_vm9, %v1910_v36, %v4453_v58 }
 0x1cc   : > { %v1944_v7 = vsel %vm1932_vm9, %v1911_v54, %v4454_v59  ;;  %v2006_v17 = vsel %vm1899_vm8, %v1974_v9, %v4433_v28  ;;  %v1973_v57 = vsel %vm1866_vm7, %v5150_v55, %v4423_v56  ;;  %v4439_v10 = vunpack.i.h.bf16 %v5612_v25 }
 0x1cd   : > { %v727_v0 = vmax.f32 %v651_v40, 0.0  ;;  %4055 = vmatmul.msk.bf16.gmra.mxu3 %vm1866_vm7, %v2093_v44  ;;  %4606 = vrot.lane.b32.xlu2 %v4605_v4, %s4782_s13  ;;  %v2076_v43 = vpack.c.bf16 %v1944_v7, %v1943_v22  ;;  %v4438_v12 = vunpack.i.l.bf16 %v5612_v25  ;;  %v1284_v13 = vrot.slane %v5665_v16, 2 }
 0x1ce   : > { %4601 = vrot.lane.b32.xlu0 %v4605_v4, %s4781_s6  ;;  %v679_v59 = vadd.f32 %v5534_v18, %v5155_v62  ;;  %v5733_v55 = vsel %vm1038_vm5, %v1105_v30, %v1107_v1  ;;  %v2038_v25 = vsel %vm1932_vm9, %v2006_v17, %v4439_v10  ;;  %v736_v56 = vmax.f32 %v674_v5, 0.0 }
 0x1cf   : > { %v5714_v47 = vsel %vm822_vm3, %v727_v0, 0.0  ;;  %v5716_v32 = vpop.permute.xlu1 %4471  ;;  %2338 = vmatmul.bf16.gmra.mxu1 %v2076_v43  ;;  %6634 = vst [vmem:[#allocation33_spill] sm:$0xff] %v5733_v55  ;;  %v676_v27 = vadd.f32 %v5534_v18, %v5128_v20  ;;  %v2005_v11 = vsel %vm1899_vm8, %v1973_v57, %v4409_v15  ;;  %v5742_v62 = vpack.i.bf16 %v1280_v26, %v1278_v53  ;;  %v4487_v20 = vpop.permute.xlu2 %4486 }
 0x1d0   : > { %v1104_v8 = vrot.slane %v5714_v47, 1  ;;  %v1281_v58 = vrot.slane %v5714_v47, 2  ;;  %v2037_v40 = vsel %vm1932_vm9, %v2005_v11, %v4438_v12  ;;  %v4429_v44 = vunpack.i.h.bf16 %v5591_v39  ;;  %v5780_v15 = vpop.f32.mrf.mxu3 }
 0x1d1   : > { %v4428_v4 = vunpack.i.l.bf16 %v5591_v39  ;;  %v2074_v36 = vpack.c.bf16 %v2038_v25, %v2037_v40  ;;  %v738_v54 = vmax.f32 %v679_v59, 0.0  ;;  %v5754_v18 = vsel %vm822_vm3, %v736_v56, 0.0 }
 0x1d2   : > { %v5730_v28 = vsel %vm1038_vm5, %v1104_v8, %v1105_v30  ;;  %v5756_v26 = vmax.f32 %v676_v27, 0.0  ;;  %v4449_v53 = vunpack.i.h.bf16 %v5650_v41  ;;  %v1285_v0 = vsel %vm1215_vm6, %v1282_v63, %v1284_v13  ;;  %v6635_v8 = vld [vmem:[#allocation17_spill] sm:$0xff] }
 0x1d3   : > { %6633 = vst [vmem:[#allocation32_spill] sm:$0xff] %v5730_v28  ;;  %v4630_v16 = vpack.i.bf16 %v5733_v55, %v5730_v28  ;;  %v4448_v22 = vunpack.i.l.bf16 %v5650_v41  ;;  %v1283_v9 = vsel %vm1215_vm6, %v1281_v58, %v1282_v63  ;;  %v1879_v42 = vsel %vm1866_vm7, %v5173_v21, %v4428_v4  ;;  %v6636_v63 = vld [vmem:[#allocation18_spill] sm:$0xff] }
 0x1d4   : > { %v4489_v43 = vunpack.i.h.bf16 %v4487_v20  ;;  %v4488_v30 = vunpack.i.l.bf16 %v4487_v20  ;;  %v5768_v5 = vsel %vm881_vm4, %v738_v54, 0.0  ;;  %v2096_v57 = vpack.c.bf16 %v1285_v0, %v1283_v9  ;;  %v6637_v20 = vld [vmem:[#allocation5_spill] sm:$0xff] }
 0x1d5   : > { %4631 = vrot.lane.b32.xlu1 %v4630_v16, %s4781_s6  ;;  %4621 = vrot.lane.b32.xlu2 %v5742_v62, %s4781_s6  ;;  %v1975_v21 = vsel %vm1866_vm7, %v6636_v63, %v4448_v22  ;;  %v4625_v46 = vpack.i.bf16 %v5660_v23, %v5714_v47  ;;  %v4434_v59 = vunpack.i.h.bf16 %v5616_v35  ;;  %v4458_v25 = vunpack.i.l.bf16 %v5640_v50 }
 0x1d6   : > { %4611 = vrot.lane.b32.xlu0 %v5572_v31, %s4780_s30  ;;  %2422 = vmatmul.bf16.gmra.mxu2 %v2074_v36  ;;  %v1880_v31 = vsel %vm1866_vm7, %v5189_v49, %v4429_v44  ;;  %v1976_v49 = vsel %vm1866_vm7, %v6635_v8, %v4449_v53  ;;  %v1528_v56 = vrot.slane %v5754_v18, 2  ;;  %v1529_v27 = vrot.slane %v5756_v26, 2 }
 0x1d7   : > { %v4477_v39 = vpop.permute.xlu1 %4476  ;;  %v1531_v11 = vrot.slane %v5768_v5, 2  ;;  %v2007_v35 = vsel %vm1899_vm8, %v1975_v21, %v4434_v59  ;;  %v2008_v50 = vsel %vm1899_vm8, %v1976_v49, %v4458_v25  ;;  %v4469_v40 = vunpack.i.h.bf16 %v5658_v29 }
 0x1d8   : > { %v4479_v7 = vunpack.i.h.bf16 %v4477_v39  ;;  %v4478_v1 = vunpack.i.l.bf16 %v4477_v39  ;;  %v1286_v53 = vrot.slane %v6637_v20, 2  ;;  %v6638_v39 = vld [vmem:[#allocation4_spill] sm:$0xff]  ;;  %v4473_v8 = vunpack.i.l.bf16 %v5716_v32 }
 0x1d9   : > { %v2040_v36 = vsel %vm1932_vm9, %v2008_v50, %v4469_v40  ;;  %v5804_v54 = vsel %vm1215_vm6, %v1529_v27, %v1531_v11  ;;  %v1287_v22 = vrot.slane %v6638_v39, 2  ;;  %v4484_v11 = vunpack.i.h.bf16 %v5695_v37 }
 0x1da   : > { %v1912_v17 = vsel %vm1899_vm8, %v1879_v42, %v4478_v1  ;;  %v1913_v41 = vsel %vm1899_vm8, %v1880_v31, %v4479_v7  ;;  %v5792_v58 = vpop.f32.mrf.mxu1  ;;  %v6639_v7 = vld [vmem:[#allocation6_spill] sm:$0xff]  ;;  %v5809_v31 = vpack.i.bf16 %v1285_v0, %v1283_v9  ;;  %v5825_v0 = vpop.f32.mrf.mxu3  ;;  %v4463_v50 = vunpack.i.l.bf16 %v5675_v19 }
 0x1db   : > { %v1945_v10 = vsel %vm1932_vm9, %v1912_v17, %v4488_v30  ;;  %v1946_v12 = vsel %vm1932_vm9, %v1913_v41, %v4489_v43  ;;  %v1289_v1 = vrot.slane %v6639_v7, 2  ;;  %v5828_v17 = vpop.permute.xlu2 %4491 }
 0x1dc   : > { %v2079_v13 = vpack.c.bf16 %v1946_v12, %v1945_v10  ;;  %v4474_v12 = vunpack.i.h.bf16 %v5716_v32  ;;  %v6642_v32 = vld [vmem:[#allocation9_spill] sm:$0xff] }
 0x1dd   : > { %4056 = vmatmul.msk.bf16.gmra.mxu3 %vm1866_vm7, %v2096_v57  ;;  %4636 = vrot.lane.b32.xlu1 %v4630_v16, %s4782_s13  ;;  %v4468_v16 = vunpack.i.l.bf16 %v5658_v29  ;;  %v5813_v29 = vpack.i.bf16 %v6638_v39, %v6637_v20  ;;  %v1290_v9 = vsel %vm1215_vm6, %v1287_v22, %v1289_v1  ;;  %v1288_v57 = vsel %vm1215_vm6, %v1286_v53, %v1287_v22  ;;  %v6644_v22 = vld [vmem:[#allocation11_spill] sm:$0xff] }
 0x1de   : > { %4641 = vrot.lane.b32.xlu2 %v5622_v3, %s4780_s30  ;;  %4626 = vrot.lane.b32.xlu0 %v4625_v46, %s4780_s30  ;;  %v5801_v3 = vsel %vm1215_vm6, %v1528_v56, %v1529_v27  ;;  %v2099_v63 = vpack.c.bf16 %v1290_v9, %v1288_v57  ;;  %v1294_v7 = vrot.slane %v6644_v22, 2 }
 0x1df   : > { %2343 = vmatmul.bf16.gmra.mxu1 %v2079_v13  ;;  %v2039_v4 = vsel %vm1932_vm9, %v2007_v35, %v4468_v16  ;;  %v2105_v42 = vpack.c.bf16 %v5804_v54, %v5801_v3  ;;  %v4725_v43 = vpack.i.bf16 %v5804_v54, %v5801_v3  ;;  %v6641_v13 = vld [vmem:[#allocation22_spill] sm:$0xff]  ;;  %v4483_v35 = vunpack.i.l.bf16 %v5695_v37 }
 0x1e0   : > { %v4497_v44 = vpop.permute.xlu0 %4496  ;;  %v2077_v30 = vpack.c.bf16 %v2040_v36, %v2039_v4  ;;  %v1977_v59 = vsel %vm1866_vm7, %v6641_v13, %v4473_v8  ;;  %v6643_v36 = vld [vmem:[#allocation10_spill] sm:$0xff] }
 0x1e1   : > { %v4499_v25 = vunpack.i.h.bf16 %v4497_v44  ;;  %v4498_v56 = vunpack.i.l.bf16 %v4497_v44  ;;  %v2009_v44 = vsel %vm1899_vm8, %v1977_v59, %v4483_v35  ;;  %v1292_v53 = vrot.slane %v6643_v36, 2  ;;  %v6647_v59 = vld [vmem:[#allocation19_spill] sm:$0xff] }
 0x1e2   : > { %v5831_v10 = vpop.f32.mrf.mxu1  ;;  %v5847_v27 = vpop.f32.mrf.mxu3 }
 0x1e3   : > { %v4527_v40 = vpop.permute.xlu2 %4526 }
 0x1e5   : > { %4661 = vrot.lane.b32.xlu1 %v5809_v31, %s4781_s6 }
 0x1e6   : > { %4651 = vrot.lane.b32.xlu2 %v5813_v29, %s4780_s30  ;;  %4646 = vrot.lane.b32.xlu0 %v5644_v45, %s4782_s13  ;;  %v6640_v45 = vld [vmem:[#allocation23_spill] sm:$0xff] }
 0x1e7   : > { %2427 = vmatmul.bf16.gmra.mxu2 %v2077_v30  ;;  %v1978_v21 = vsel %vm1866_vm7, %v6640_v45, %v4474_v12  ;;  %v2041_v30 = vsel %vm1932_vm9, %v2009_v44, %v4498_v56  ;;  %v6645_v12 = vld [vmem:[#allocation12_spill] sm:$0xff]  ;;  %v4675_v45 = vpack.i.bf16 %v1290_v9, %v1288_v57 }
 0x1e8   : > { %v4502_v41 = vpop.permute.xlu0 %4501  ;;  %v1291_v8 = vrot.slane %v6645_v12, 2 }
 0x1e9   : > { %v4504_v16 = vunpack.i.h.bf16 %v4502_v41  ;;  %v4503_v4 = vunpack.i.l.bf16 %v4502_v41  ;;  %v5864_v41 = vpack.i.bf16 %v6643_v36, %v6645_v12 }
 0x1eb   : > { %v5835_v49 = vpop.permute.xlu1 %4511 }
 0x1ed   : > { %4057 = vmatmul.msk.bf16.gmra.mxu3 %vm1866_vm7, %v2099_v63  ;;  %4666 = vrot.lane.b32.xlu1 %v5742_v62, %s4780_s30  ;;  %v4464_v62 = vunpack.i.h.bf16 %v5675_v19  ;;  %v5860_v63 = vpop.f32.mrf.mxu1 }
 0x1ee   : > { %4671 = vrot.lane.b32.xlu2 %v4625_v46, %s4782_s13  ;;  %4656 = vrot.lane.b32.xlu0 %v6642_v32, %s4782_s13  ;;  %v2010_v46 = vsel %vm1899_vm8, %v1978_v21, %v4484_v11  ;;  %v6646_v21 = vld [vmem:[#allocation20_spill] sm:$0xff]  ;;  %v1881_v32 = vsel %vm1866_vm7, %v6647_v59, %v4463_v50 }
 0x1ef   : > { %v2042_v37 = vsel %vm1932_vm9, %v2010_v46, %v4499_v25  ;;  %v1882_v13 = vsel %vm1866_vm7, %v6646_v21, %v4464_v62  ;;  %v1914_v35 = vsel %vm1899_vm8, %v1881_v32, %v4503_v4  ;;  %v6648_v46 = vld [vmem:[#allocation15_spill] sm:$0xff]  ;;  %v5881_v4 = vpop.f32.mrf.mxu3  ;;  %v1494_v21 = vrot.slane %v5768_v5, 1  ;;  %v6649_v32 = vld [vmem:[#allocation26_spill] sm:$0xff] }
 0x1f0   : > { %v4507_v1 = vpop.permute.xlu0 %4506  ;;  %v2080_v25 = vpack.c.bf16 %v2042_v37, %v2041_v30  ;;  %v1915_v44 = vsel %vm1899_vm8, %v1882_v13, %v4504_v16  ;;  %v1295_v30 = vsel %vm1215_vm6, %v1292_v53, %v1294_v7  ;;  %v5883_v16 = vpop.permute.xlu2 %4531  ;;  %v1491_v37 = vrot.slane %v5754_v18, 1 }
 0x1f1   : > { %v4509_v50 = vunpack.i.h.bf16 %v4507_v1  ;;  %v4508_v22 = vunpack.i.l.bf16 %v4507_v1  ;;  %v4514_v7 = vunpack.i.h.bf16 %v5835_v49 }
 0x1f3   : > { %v4517_v19 = vpop.permute.xlu1 %4516 }
 0x1f4   : > { %v4519_v11 = vunpack.i.h.bf16 %v4517_v19  ;;  %v4518_v56 = vunpack.i.l.bf16 %v4517_v19  ;;  %v1293_v19 = vsel %vm1215_vm6, %v1291_v8, %v1292_v53  ;;  %v1492_v53 = vrot.slane %v5756_v26, 1 }
 0x1f5   : > { %4681 = vrot.lane.b32.xlu1 %v5864_v41, %s4780_s30  ;;  %v2102_v13 = vpack.c.bf16 %v1295_v30, %v1293_v19  ;;  %v4700_v59 = vpack.i.bf16 %v1295_v30, %v1293_v19 }
 0x1f6   : > { %4686 = vrot.lane.b32.xlu2 %v6648_v46, %s4782_s13  ;;  %4676 = vrot.lane.b32.xlu0 %v4675_v45, %s4781_s6  ;;  %v1947_v9 = vsel %vm1932_vm9, %v1914_v35, %v4518_v56  ;;  %v1948_v57 = vsel %vm1932_vm9, %v1915_v44, %v4519_v11  ;;  %v1980_v11 = vsel %vm1866_vm7, %v6649_v32, %v4509_v50  ;;  %v6650_v56 = vld [vmem:[#allocation27_spill] sm:$0xff]  ;;  %v5896_v35 = vpop.f32.mrf.mxu1  ;;  %v4529_v46 = vunpack.i.h.bf16 %v4527_v40 }
 0x1f7   : > { %2432 = vmatmul.bf16.gmra.mxu2 %v2080_v25  ;;  %v2082_v62 = vpack.c.bf16 %v1948_v57, %v1947_v9  ;;  %v1979_v1 = vsel %vm1866_vm7, %v6650_v56, %v4508_v22  ;;  %v4513_v25 = vunpack.i.l.bf16 %v5835_v49  ;;  %v2012_v44 = vsel %vm1899_vm8, %v1980_v11, %v4514_v7  ;;  %v6654_v7 = vld [vmem:[#allocation25_spill] sm:$0xff] }
 0x1f8   : > { %v5891_v8 = vpop.permute.xlu0 %4521  ;;  %v4528_v9 = vunpack.i.l.bf16 %v4527_v40  ;;  %v5907_v49 = vsel %vm1038_vm5, %v1491_v37, %v1492_v53  ;;  %v5910_v57 = vsel %vm1038_vm5, %v1492_v53, %v1494_v21  ;;  %v2044_v50 = vsel %vm1932_vm9, %v2012_v44, %v4529_v46  ;;  %v4537_v22 = vpop.permute.xlu2 %4536 }
 0x1f9   : > { %2348 = vmatmul.bf16.gmra.mxu1 %v2082_v62  ;;  %v2011_v5 = vsel %vm1899_vm8, %v1979_v1, %v4513_v25  ;;  %6651 = vst [vmem:[#allocation17_spill] sm:$0xff] %v5907_v49  ;;  %v5912_v62 = vpop.f32.mrf.mxu3  ;;  %v4705_v40 = vpack.i.bf16 %v5756_v26, %v5754_v18  ;;  %v4494_v21 = vunpack.i.h.bf16 %v5828_v17  ;;  %v4539_v32 = vunpack.i.h.bf16 %v4537_v22  ;;  %v6653_v26 = vld [vmem:[#allocation24_spill] sm:$0xff] }
 0x1fa   : > { %6652 = vst [vmem:[#allocation18_spill] sm:$0xff] %v5910_v57  ;;  %v4538_v11 = vunpack.i.l.bf16 %v4537_v22 }
 0x1fb   : > { %v1884_v53 = vsel %vm1866_vm7, %v6653_v26, %v4494_v21  ;;  %v6657_v26 = vld [vmem:[#allocation30_spill] sm:$0xff] }
 0x1fc   : > { %v1917_v46 = vsel %vm1899_vm8, %v1884_v53, %v4539_v32 }
 0x1fd   : > { %4058 = vmatmul.msk.bf16.gmra.mxu3 %vm1866_vm7, %v2102_v13  ;;  %4696 = vrot.lane.b32.xlu1 %v5813_v29, %s4782_s13  ;;  %v2043_v29 = vsel %vm1932_vm9, %v2011_v5, %v4528_v9  ;;  %v4493_v13 = vunpack.i.l.bf16 %v5828_v17  ;;  %v6655_v17 = vmov 0.0  }
 0x1fe   : > { %4701 = vrot.lane.b32.xlu2 %v4700_v59, %s4781_s6  ;;  %4691 = vrot.lane.b32.xlu0 %v5809_v31, %s4780_s30  ;;  %v4710_v31 = vpack.i.bf16 %v5910_v57, %v5907_v49  ;;  %v2083_v37 = vpack.c.bf16 %v2044_v50, %v2043_v29 }
 0x1ff   : > { %v5920_v30 = vpop.f32.mrf.mxu1 }
 0x201   : > { %v5927_v56 = vpop.f32.mrf.mxu3 }
 0x203   : > { %v4542_v19 = vpop.permute.xlu0 %4541  ;;  %v5929_v1 = vpop.permute.xlu2 %4571 }
 0x204   : > { %v4544_v22 = vunpack.i.h.bf16 %v4542_v19 }
 0x205   : > { %4711 = vrot.lane.b32.xlu1 %v4710_v31, %s4782_s13  ;;  %v4533_v31 = vunpack.i.l.bf16 %v5883_v16 }
 0x206   : > { %4716 = vrot.lane.b32.xlu2 %v4675_v45, %s4780_s30  ;;  %4706 = vrot.lane.b32.xlu0 %v4705_v40, %s4780_s30  ;;  %v1883_v45 = vsel %vm1866_vm7, %v6654_v7, %v4493_v13  ;;  %v6656_v13 = vld [vmem:[#allocation3_spill] sm:$0xff] }
 0x207   : > { %2437 = vmatmul.bf16.gmra.mxu2 %v2083_v37  ;;  %v1916_v44 = vsel %vm1899_vm8, %v1883_v45, %v4538_v11  ;;  %v5949_v9 = vpop.f32.mrf.mxu1  ;;  %v4543_v37 = vunpack.i.l.bf16 %v4542_v19 }
 0x209   : > { %v5955_v54 = vpop.f32.mrf.mxu3 }
 0x20b   : > { %v4547_v18 = vpop.permute.xlu0 %4546  ;;  %v5965_v21 = vpop.permute.xlu2 %4576 }
 0x20c   : > { %v4549_v25 = vunpack.i.h.bf16 %v4547_v18  ;;  %v4548_v5 = vunpack.i.l.bf16 %v4547_v18 }
 0x20d   : > { %4059 = vmatmul.msk.bf16.gmra.mxu3 %vm1866_vm7, %v2105_v42  ;;  %4726 = vrot.lane.b32.xlu1 %v4725_v43, %s4781_s6  ;;  %v5960_v43 = vld [vmem:[%s6562_s4] ss:$0 sm:$0xff] }
 0x20e   : > { %4731 = vrot.lane.b32.xlu2 %v6655_v17, %s4780_s30  ;;  %4721 = vrot.lane.b32.xlu0 %v5864_v41, %s4782_s13  ;;  %v1949_v42 = vsel %vm1932_vm9, %v1916_v44, %v4548_v5  ;;  %v1950_v50 = vsel %vm1932_vm9, %v1917_v46, %v4549_v25  ;;  %v4534_v41 = vunpack.i.h.bf16 %v5883_v16  ;;  %v2315_v32 = vadd.f32 %v5960_v43, %v5792_v58  ;;  %v6658_v16 = vld [vmem:[#allocation31_spill] sm:$0xff]  ;;  %v6659_v25 = vld [vmem:[#allocation2_spill] sm:$0xff] }
 0x20f   : > { %v5951_v29 = vpop.permute.xlu1 %4551  ;;  %v2085_v3 = vpack.c.bf16 %v1950_v50, %v1949_v42  ;;  %v1981_v19 = vsel %vm1866_vm7, %v6658_v16, %v4533_v31  ;;  %v6660_v42 = vld [vmem:[#allocation16_spill] sm:$0xff]  ;;  %v6661_v31 = vld [vmem:[#allocation21_spill] sm:$0xff] }
 0x210   : > { %v1982_v53 = vsel %vm1866_vm7, %v6657_v26, %v4534_v41  ;;  %v2013_v17 = vsel %vm1899_vm8, %v1981_v19, %v4543_v37  ;;  %v4284_v50 = vunpack.i.h.bf16 %v6660_v42  ;;  %v4283_v41 = vunpack.i.l.bf16 %v6660_v42 }
 0x211   : > { %2353 = vmatmul.bf16.gmra.mxu1 %v2085_v3  ;;  %v2014_v44 = vsel %vm1899_vm8, %v1982_v53, %v4544_v22  ;;  %v5986_v26 = vpop.f32.mrf.mxu3  ;;  %v4523_v22 = vunpack.i.l.bf16 %v5891_v8 }
 0x212   : > { %v5994_v53 = vsel %vm1866_vm7, %v6638_v39, %v4284_v50  ;;  %v4574_v50 = vunpack.i.h.bf16 %v5929_v1 }
 0x213   : > { %6662 = vst [vmem:[#allocation5_spill] sm:$0xff] %v5994_v53  ;;  %v4582_v39 = vpop.permute.xlu2 %4581 }
 0x215   : > { %4741 = vrot.lane.b32.xlu1 %v4700_v59, %s4780_s30  ;;  %s4191_s30 = sshll.u32 %s6685_s18, 5 }
 0x216   : > { %4746 = vrot.lane.b32.xlu2 %v4705_v40, %s4782_s13  ;;  %4736 = vrot.lane.b32.xlu0 %v6656_v13, %s4782_s13  ;;  %v2108_v40 = vpack.c.bf16 %v6659_v25, %v6659_v25  ;;  %v4294_v13 = vunpack.i.h.bf16 %v6661_v31  ;;  %v2320_v25 = vadd.f32 %v5960_v43, %v5860_v63  ;;  %v4553_v63 = vunpack.i.l.bf16 %v5951_v29  ;;  %s6156_s12 = scalar_lea.vmem %s6563_s5, %s4191_s30 }
 0x217   : > { %v4557_v11 = vpop.permute.xlu1 %4556  ;;  %v2329_v18 = vpop.f32.mrf.mxu1 }
 0x218   : > { %v4559_v7 = vunpack.i.h.bf16 %v4557_v11  ;;  %v4558_v59 = vunpack.i.l.bf16 %v4557_v11  ;;  %v2403_v45 = vpop.f32.mrf.mxu2  ;;  %v4293_v11 = vunpack.i.l.bf16 %v6661_v31 }
 0x219   : > { %v2404_v5 = vadd.f32 %v2403_v45, %v2315_v32  ;;  %v4524_v32 = vunpack.i.h.bf16 %v5891_v8  ;;  %v2317_v8 = vadd.f32 %v5960_v43, %v5831_v10  ;;  %v6026_v10 = vadd.f32 %v5960_v43, %v5920_v30 }
 0x21a   : > { %v2045_v58 = vsel %vm1932_vm9, %v2013_v17, %v4558_v59  ;;  %v2046_v46 = vsel %vm1932_vm9, %v2014_v44, %v4559_v7  ;;  %v6000_v7 = vsel %vm1866_vm7, %v6637_v20, %v4283_v41  ;;  %v6004_v59 = vsel %vm1866_vm7, %v6643_v36, %v4294_v13  ;;  %v6667_v17 = vld [vmem:[#allocation29_spill] sm:$0xff] }
 0x21b   : > { %v2086_v3 = vpack.c.bf16 %v2046_v46, %v2045_v58  ;;  %v2493_v37 = vadd.f32 %v5780_v15, %v2404_v5  ;;  %6663 = vst [vmem:[#allocation4_spill] sm:$0xff] %v6000_v7  ;;  %v6008_v15 = vsel %vm1866_vm7, %v6645_v12, %v4293_v11  ;;  %v6016_v20 = vadd.f32 %v5960_v43, %v5896_v35 }
 0x21c   : > { %6664 = vst [vmem:[#allocation6_spill] sm:$0xff] %v6004_v59  ;;  %v1885_v12 = vsel %vm1866_vm7, %v6667_v17, %v4523_v22  ;;  %v4554_v44 = vunpack.i.h.bf16 %v5951_v29  ;;  %v4584_v46 = vunpack.i.h.bf16 %v4582_v39  ;;  %v4583_v35 = vunpack.i.l.bf16 %v4582_v39 }
 0x21d   : > { %2442 = vmatmul.bf16.gmra.mxu2 %v2086_v3  ;;  %4060 = vmatmul.msk.bf16.gmra.mxu3 %vm1866_vm7, %v2108_v40  ;;  %6665 = vst [vmem:[#allocation23_spill] sm:$0xff] %v6008_v15  ;;  %v6666_v40 = vld [vmem:[#allocation28_spill] sm:$0xff]  ;;  %v6020_v5 = vmax.f32 %v2493_v37, 0.0  ;;  %v4573_v3 = vunpack.i.l.bf16 %v5929_v1  ;;  %v6034_v41 = vadd.f32 %v5960_v43, %v5949_v9  ;;  %v4579_v30 = vunpack.i.h.bf16 %v5965_v21 }
 0x21e   : > { %v1886_v36 = vsel %vm1866_vm7, %v6666_v40, %v4524_v32  ;;  %v4578_v13 = vunpack.i.l.bf16 %v5965_v21  ;;  %v6042_v32 = vsel %vm1866_vm7, %v5456_v6, %v4554_v44  ;;  %v6048_v9 = vsel %vm1866_vm7, %v5469_v61, %v4553_v63 }
 0x21f   : > { %v4562_v16 = vpop.permute.xlu1 %4561  ;;  %v5996_v19 = vpop.f32.mrf.mxu1  ;;  %v2636_v11 = vrot.slane %v6020_v5, 2  ;;  %v2637_v37 = vrot.slane %v6020_v5, 4  ;;  %v2638_v1 = vrot.slane %v6020_v5, 6  ;;  %v6056_v21 = vsel %vm1866_vm7, %v5558_v48, %v4583_v35 }
 0x220   : > { %v2405_v45 = vpop.f32.mrf.mxu2  ;;  %v4563_v42 = vunpack.i.l.bf16 %v4562_v16  ;;  %v4564_v29 = vunpack.i.h.bf16 %v4562_v16  ;;  %v6061_v39 = vadd.f32 %v5960_v43, %v2329_v18 }
 0x221   : > { %v2406_v58 = vadd.f32 %v2405_v45, %v2317_v8  ;;  %v4061_v45 = vrot.slane %v6020_v5, 9  ;;  %v4062_v44 = vrot.slane %v2636_v11, 9  ;;  %v4064_v35 = vrot.slane %v2638_v1, 9 }
 0x222   : > { %v1983_v6 = vsel %vm1866_vm7, %v5513_v38, %v4563_v42  ;;  %v1984_v48 = vsel %vm1866_vm7, %v5516_v52, %v4564_v29  ;;  %v4063_v38 = vrot.slane %v2637_v37, 9 }
 0x223   : > { %v2495_v31 = vadd.f32 %v5825_v0, %v2406_v58  ;;  %v6052_v0 = vsel %vm1866_vm7, %v5551_v14, %v4584_v46  ;;  %v2015_v18 = vsel %vm1899_vm8, %v1983_v6, %v4573_v3  ;;  %v2016_v28 = vsel %vm1899_vm8, %v1984_v48, %v4574_v50 }
 0x224   : > { %v6077_v3 = vadd.f32 %v5960_v43, %v5996_v19  ;;  %v3214_v48 = vmax.f32 %v2637_v37, %v4063_v38 }
 0x225   : > { %v2573_v22 = vmax.f32 %v2495_v31, 0.0 }
 0x227   : > { %v4567_v16 = vpop.permute.xlu1 %4566  ;;  %v2334_v8 = vpop.f32.mrf.mxu1  ;;  %v2639_v61 = vrot.slane %v2573_v22, 2  ;;  %v2640_v40 = vrot.slane %v2573_v22, 4  ;;  %v2641_v42 = vrot.slane %v2573_v22, 6  ;;  %v4065_v57 = vrot.slane %v2573_v22, 9 }
 0x228   : > { %v6064_v17 = vpop.permute.xlu2 %4606  ;;  %v4587_v14 = vpop.permute.xlu0 %4586  ;;  %v4569_v58 = vunpack.i.h.bf16 %v4567_v16  ;;  %v4568_v63 = vunpack.i.l.bf16 %v4567_v16 }
 0x229   : > { %v2408_v46 = vpop.f32.mrf.mxu2  ;;  %v4589_v15 = vunpack.i.h.bf16 %v4587_v14  ;;  %v4588_v49 = vunpack.i.l.bf16 %v4587_v14  ;;  %v4066_v7 = vrot.slane %v2639_v61, 9  ;;  %v4067_v53 = vrot.slane %v2640_v40, 9 }
 0x22a   : > { %v1918_v31 = vsel %vm1899_vm8, %v1885_v12, %v4568_v63  ;;  %v1919_v59 = vsel %vm1899_vm8, %v1886_v36, %v4569_v58  ;;  %v2409_v52 = vadd.f32 %v2408_v46, %v2320_v25  ;;  %v4068_v12 = vrot.slane %v2641_v42, 9 }
 0x22b   : > { %v2047_v29 = vsel %vm1932_vm9, %v2015_v18, %v4588_v49  ;;  %v2048_v16 = vsel %vm1932_vm9, %v2016_v28, %v4589_v15  ;;  %v1951_v55 = vsel %vm1932_vm9, %v1918_v31, %v4578_v13  ;;  %v1952_v6 = vsel %vm1932_vm9, %v1919_v59, %v4579_v30 }
 0x22c   : > { %v2089_v36 = vpack.c.bf16 %v2048_v16, %v2047_v29  ;;  %v3212_v14 = vmax.f32 %v6020_v5, %v4061_v45  ;;  %v3213_v58 = vmax.f32 %v2636_v11, %v4062_v44  ;;  %v2498_v50 = vadd.f32 %v5847_v27, %v2409_v52 }
 0x22d   : > { %v2088_v25 = vpack.c.bf16 %v1952_v6, %v1951_v55  ;;  %v3215_v49 = vmax.f32 %v2638_v1, %v4064_v35  ;;  %v4609_v28 = vunpack.i.h.bf16 %v6064_v17  ;;  %v4608_v15 = vunpack.i.l.bf16 %v6064_v17 }
 0x22e   : > { %2447 = vmatmul.bf16.gmra.mxu2 %v2089_v36  ;;  %v6084_v63 = vmax.f32 %v2573_v22, %v4065_v57  ;;  %v6086_v46 = vmax.f32 %v2639_v61, %v4066_v7  ;;  %v6088_v59 = vmax.f32 %v2640_v40, %v4067_v53  ;;  %v2574_v5 = vmax.f32 %v2498_v50, 0.0 }
 0x22f   : > { %v2336_v19 = vpop.f32.mrf.mxu1  ;;  %2358 = vmatmul.bf16.gmra.mxu1 %v2088_v25  ;;  %v6090_v55 = vmax.f32 %v2641_v42, %v4068_v12  ;;  %v6096_v7 = vadd.f32 %v5960_v43, %v2334_v8 }
 0x230   : > { %v4622_v13 = vpop.permute.xlu2 %4621  ;;  %v4592_v30 = vpop.permute.xlu0 %4591  ;;  %v2642_v45 = vrot.slane %v2574_v5, 2  ;;  %v2643_v44 = vrot.slane %v2574_v5, 4  ;;  %v2644_v38 = vrot.slane %v2574_v5, 6  ;;  %v4069_v35 = vrot.slane %v2574_v5, 9 }
 0x231   : > { %v2410_v27 = vpop.f32.mrf.mxu2  ;;  %v4624_v11 = vunpack.i.h.bf16 %v4622_v13  ;;  %v4623_v37 = vunpack.i.l.bf16 %v4622_v13  ;;  %v4594_v53 = vunpack.i.h.bf16 %v4592_v30  ;;  %v4593_v22 = vunpack.i.l.bf16 %v4592_v30 }
 0x232   : > { %v2411_v1 = vadd.f32 %v2410_v27, %v6016_v20  ;;  %v6099_v61 = vadd.f32 %v5960_v43, %v2336_v19  ;;  %v4070_v40 = vrot.slane %v2642_v45, 9  ;;  %v4071_v42 = vrot.slane %v2643_v44, 9 }
 0x233   : > { %v6093_v57 = vpop.permute.xlu1 %4596  ;;  %v4072_v18 = vrot.slane %v2644_v38, 9  ;;  %v3220_v31 = vmax.f32 %v2574_v5, %v4069_v35  ;;  %v6103_v20 = vsel %vm1866_vm7, %v5693_v2, %v4624_v11  ;;  %v6107_v52 = vsel %vm1866_vm7, %v5689_v60, %v4623_v37 }
 0x234   : > { %v2500_v8 = vadd.f32 %v5881_v4, %v2411_v1  ;;  %v4598_v29 = vunpack.i.l.bf16 %v6093_v57  ;;  %v3221_v16 = vmax.f32 %v2642_v45, %v4070_v40  ;;  %v3222_v12 = vmax.f32 %v2643_v44, %v4071_v42 }
 0x235   : > { %v3223_v36 = vmax.f32 %v2644_v38, %v4072_v18  ;;  %v3340_v6 = vmax.f32 %v3212_v14, %v3220_v31  ;;  %v1986_v50 = vsel %vm1866_vm7, %v5602_v24, %v4594_v53  ;;  %v1985_v2 = vsel %vm1866_vm7, %v5599_v33, %v4593_v22 }
 0x236   : > { %v2575_v25 = vmax.f32 %v2500_v8, 0.0  ;;  %v4599_v13 = vunpack.i.h.bf16 %v6093_v57  ;;  %v3341_v19 = vmax.f32 %v3213_v58, %v3221_v16  ;;  %v3342_v5 = vmax.f32 %v3214_v48, %v3222_v12 }
 0x237   : > { %v3343_v4 = vmax.f32 %v3215_v49, %v3223_v36  ;;  %v3404_v30 = vpack.c.bf16 %v3340_v6, %v3340_v6  ;;  %v2017_v38 = vsel %vm1899_vm8, %v1985_v2, %v4598_v29 }
 0x238   : > { %v4642_v60 = vpop.permute.xlu2 %4641  ;;  %v2645_v11 = vrot.slane %v2575_v25, 2  ;;  %v2646_v37 = vrot.slane %v2575_v25, 4  ;;  %v2647_v14 = vrot.slane %v2575_v25, 6  ;;  %v4073_v1 = vrot.slane %v2575_v25, 9 }
 0x239   : > { %v2413_v27 = vpop.f32.mrf.mxu2  ;;  %v3405_v45 = vpack.c.bf16 %v3341_v19, %v3341_v19  ;;  %v3406_v44 = vpack.c.bf16 %v3342_v5, %v3342_v5  ;;  %v3407_v24 = vpack.c.bf16 %v3343_v4, %v3343_v4  ;;  %v3532_v58 = vunpack.c.l.b16 %v3404_v30 }
 0x23a   : > { %v4074_v33 = vrot.slane %v2645_v11, 9  ;;  %v4075_v35 = vrot.slane %v2646_v37, 9  ;;  %v4076_v53 = vrot.slane %v2647_v14, 9  ;;  %v3224_v57 = vmax.f32 %v2575_v25, %v4073_v1 }
 0x23b   : > { %v3533_v48 = vunpack.c.l.b16 %v3405_v45  ;;  %v3534_v49 = vunpack.c.l.b16 %v3406_v44  ;;  %v3535_v22 = vunpack.c.l.b16 %v3407_v24  ;;  %v4644_v29 = vunpack.i.h.bf16 %v4642_v60  ;;  %v6118_v36 = vpop.permute.xlu1 %4616 }
 0x23c   : > { %v3225_v40 = vmax.f32 %v2645_v11, %v4074_v33  ;;  %v3226_v42 = vmax.f32 %v2646_v37, %v4075_v35  ;;  %v3227_v18 = vmax.f32 %v2647_v14, %v4076_v53  ;;  %v3344_v31 = vmax.f32 %v6084_v63, %v3224_v57 }
 0x23d   : > { %v3596_v8 = vrot.slane %v3533_v48, 7  ;;  %v3599_v16 = vrot.slane %v3534_v49, 6  ;;  %v4643_v12 = vunpack.i.l.bf16 %v4642_v60  ;;  %v3602_v30 = vrot.slane %v3535_v22, 5 }
 0x23e   : > { %v3345_v6 = vmax.f32 %v6086_v46, %v3225_v40  ;;  %v3346_v2 = vmax.f32 %v6088_v59, %v3226_v42  ;;  %v3347_v25 = vmax.f32 %v6090_v55, %v3227_v18  ;;  %v3408_v19 = vpack.c.bf16 %v3344_v31, %v3344_v31 }
 0x23f   : > { %v3598_v63 = vsel %vm3597_vm10, %v3596_v8, %v3532_v58  ;;  %v2414_v11 = vadd.f32 %v2413_v27, %v6026_v10  ;;  %v2018_v37 = vsel %vm1899_vm8, %v1986_v50, %v4599_v13  ;;  %v6131_v55 = vsel %vm1899_vm8, %v6056_v21, %v4643_v12 }
 0x240   : > { %v6123_v5 = vpop.permute.xlu2 %4651  ;;  %v4602_v4 = vpop.permute.xlu0 %4601  ;;  %v3601_v14 = vsel %vm3600_vm11, %v3599_v16, %v3598_v63  ;;  %v3409_v1 = vpack.c.bf16 %v3345_v6, %v3345_v6  ;;  %v3410_v46 = vpack.c.bf16 %v3346_v2, %v3346_v2  ;;  %v3411_v45 = vpack.c.bf16 %v3347_v25, %v3347_v25 }
 0x241   : > { %v2415_v60 = vpop.f32.mrf.mxu2  ;;  %v3536_v59 = vunpack.c.l.b16 %v3408_v19  ;;  %v6135_v44 = vsel %vm1899_vm8, %v6052_v0, %v4644_v29  ;;  %v2503_v10 = vadd.f32 %v5912_v62, %v2414_v11  ;;  %v3604_v50 = vsel %vm3603_vm12, %v3602_v30, %v3601_v14 }
 0x242   : > { %v3537_v13 = vunpack.c.l.b16 %v3409_v1  ;;  %v3538_v27 = vunpack.c.l.b16 %v3410_v46  ;;  %v3539_v24 = vunpack.c.l.b16 %v3411_v45  ;;  %v2049_v53 = vsel %vm1932_vm9, %v2017_v38, %v4608_v15 }
 0x243   : > { %v3605_v33 = vrot.slane %v3536_v59, 4  ;;  %v2576_v35 = vmax.f32 %v2503_v10, 0.0  ;;  %v2050_v21 = vsel %vm1932_vm9, %v2018_v37, %v4609_v28  ;;  %v4619_v58 = vunpack.i.h.bf16 %v6118_v36 }
 0x244   : > { %v3608_v57 = vrot.slane %v3537_v13, 3  ;;  %v3611_v0 = vrot.slane %v3538_v27, 2  ;;  %v2092_v62 = vpack.c.bf16 %v2050_v21, %v2049_v53  ;;  %v3614_v31 = vrot.slane %v3539_v24, 1 }
 0x245   : > { %v3607_v48 = vsel %vm3606_vm13, %v3605_v33, %v3604_v50  ;;  %v2648_v49 = vrot.slane %v2576_v35, 2  ;;  %v2649_v22 = vrot.slane %v2576_v35, 4  ;;  %v2650_v40 = vrot.slane %v2576_v35, 6 }
 0x246   : > { %v3610_v18 = vsel %vm3609_vm14, %v3608_v57, %v3607_v48  ;;  %v4077_v15 = vrot.slane %v2576_v35, 9  ;;  %v4618_v17 = vunpack.i.l.bf16 %v6118_v36  ;;  %2452 = vmatmul.bf16.gmra.mxu2 %v2092_v62  ;;  %v4654_v36 = vunpack.i.h.bf16 %v6123_v5 }
 0x247   : > { %v4632_v42 = vpop.permute.xlu1 %4631  ;;  %v3613_v8 = vsel %vm3612_vm15, %v3611_v0, %v3610_v18  ;;  %v4078_v16 = vrot.slane %v2648_v49, 9  ;;  %v4079_v29 = vrot.slane %v2649_v22, 9  ;;  %v4080_v12 = vrot.slane %v2650_v40, 9 }
 0x248   : > { %v6150_v28 = vpop.permute.xlu2 %4671  ;;  %v4612_v38 = vpop.permute.xlu0 %4611  ;;  %v3616_v2 = vsel %vm3615_vm0, %v3614_v31, %v3613_v8  ;;  %v4604_v25 = vunpack.i.h.bf16 %v4602_v4  ;;  %v4603_v19 = vunpack.i.l.bf16 %v4602_v4  ;;  %v6160_v30 = vmax.f32 %v2576_v35, %v4077_v15 }
 0x249   : > { %v2418_v6 = vpop.f32.mrf.mxu2  ;;  %v3715_v63 = vpack.c.b16 %v3616_v2, %v3616_v2  ;;  %v6162_v11 = vmax.f32 %v2648_v49, %v4078_v16  ;;  %v4653_v37 = vunpack.i.l.bf16 %v6123_v5  ;;  %v6165_v14 = vmax.f32 %v2649_v22, %v4079_v29 }
 0x24a   : > { %v6167_v1 = vmax.f32 %v2650_v40, %v4080_v12  ;;  %v2416_v46 = vadd.f32 %v2415_v60, %v6034_v41  ;;  %v4634_v45 = vunpack.i.h.bf16 %v4632_v42  ;;  %v6174_v59 = vsel %vm1866_vm7, %v5628_v34, %v4604_v25 }
 0x24b   : > { %3732 = vst.msk [vmem:[%s6156_s12] sm:$0xf] %vm3731_vm1, %v3715_v63  ;;  %v6178_v4 = vsel %vm1866_vm7, %v5636_v51, %v4603_v19  ;;  %v4633_v10 = vunpack.i.l.bf16 %v4632_v42  ;;  %v4614_v50 = vunpack.i.h.bf16 %v4612_v38  ;;  %v4674_v27 = vunpack.i.h.bf16 %v6150_v28 }
 0x24c   : > { %v2505_v13 = vadd.f32 %v5927_v56, %v2416_v46  ;;  %v4613_v24 = vunpack.i.l.bf16 %v4612_v38  ;;  %v2419_v41 = vadd.f32 %v2418_v6, %v6061_v39  ;;  %v2339_v60 = vpop.f32.mrf.mxu1  ;;  %v6185_v33 = vsel %vm1866_vm7, %v5660_v23, %v4634_v45 }
 0x24d   : > { %v6189_v34 = vsel %vm1866_vm7, %v5714_v47, %v4633_v10  ;;  %v4673_v51 = vunpack.i.l.bf16 %v6150_v28  ;;  %v1921_v35 = vsel %vm1899_vm8, %v6042_v32, %v4614_v50  ;;  %v6201_v47 = vadd.f32 %v5960_v43, %v2339_v60 }
 0x24e   : > { %v2577_v53 = vmax.f32 %v2505_v13, 0.0  ;;  %v1920_v21 = vsel %vm1899_vm8, %v6048_v9, %v4613_v24  ;;  %v2508_v39 = vadd.f32 %v5955_v54, %v2419_v41  ;;  %v1954_v57 = vsel %vm1932_vm9, %v1921_v35, %v4619_v58 }
 0x24f   : > { %v4637_v56 = vpop.permute.xlu1 %4636  ;;  %v1953_v62 = vsel %vm1932_vm9, %v1920_v21, %v4618_v17 }
 0x250   : > { %v6198_v23 = vpop.permute.xlu2 %4686  ;;  %v4627_v0 = vpop.permute.xlu0 %4626  ;;  %v4639_v48 = vunpack.i.h.bf16 %v4637_v56  ;;  %v4638_v49 = vunpack.i.l.bf16 %v4637_v56  ;;  %v2651_v22 = vrot.slane %v2577_v53, 2  ;;  %v2652_v40 = vrot.slane %v2577_v53, 4 }
 0x251   : > { %v2420_v32 = vpop.f32.mrf.mxu2  ;;  %v2653_v42 = vrot.slane %v2577_v53, 6  ;;  %v4081_v18 = vrot.slane %v2577_v53, 9  ;;  %v2578_v9 = vmax.f32 %v2508_v39, 0.0  ;;  %v2091_v31 = vpack.c.bf16 %v1954_v57, %v1953_v62 }
 0x252   : > { %v4689_v54 = vunpack.i.h.bf16 %v6198_v23  ;;  %v4688_v58 = vunpack.i.l.bf16 %v6198_v23  ;;  %v4082_v15 = vrot.slane %v2651_v22, 9  ;;  %v4083_v38 = vrot.slane %v2652_v40, 9 }
 0x253   : > { %v4084_v8 = vrot.slane %v2653_v42, 9  ;;  %v4629_v16 = vunpack.i.h.bf16 %v4627_v0  ;;  %v2654_v29 = vrot.slane %v2578_v9, 2  ;;  %v2655_v12 = vrot.slane %v2578_v9, 4  ;;  %2363 = vmatmul.bf16.gmra.mxu1 %v2091_v31 }
 0x254   : > { %v2656_v17 = vrot.slane %v2578_v9, 6  ;;  %v4085_v6 = vrot.slane %v2578_v9, 9  ;;  %v3232_v2 = vmax.f32 %v2577_v53, %v4081_v18  ;;  %v6206_v25 = vmax.f32 %v2651_v22, %v4082_v15  ;;  %v2341_v62 = vpop.f32.mrf.mxu1  ;;  %v6220_v22 = vpop.f32.mrf.mxu3 }
 0x255   : > { %v6208_v19 = vmax.f32 %v2652_v40, %v4083_v38  ;;  %v4628_v63 = vunpack.i.l.bf16 %v4627_v0  ;;  %v4086_v46 = vrot.slane %v2654_v29, 9  ;;  %v4087_v45 = vrot.slane %v2655_v12, 9 }
 0x256   : > { %v4088_v10 = vrot.slane %v2656_v17, 9  ;;  %v3236_v50 = vmax.f32 %v2578_v9, %v4085_v6  ;;  %v3235_v24 = vmax.f32 %v2653_v42, %v4084_v8  ;;  %v2421_v41 = vadd.f32 %v2420_v32, %v6077_v3  ;;  %v6668_v8 = vld [vmem:[#allocation33_spill] sm:$0xff] }
 0x257   : > { %v4662_v13 = vpop.permute.xlu1 %4661  ;;  %v2019_v60 = vsel %vm1899_vm8, %v6107_v52, %v4628_v63  ;;  %v2020_v35 = vsel %vm1899_vm8, %v6103_v20, %v4629_v16  ;;  %v3237_v21 = vmax.f32 %v2654_v29, %v4086_v46  ;;  %v3238_v39 = vmax.f32 %v2655_v12, %v4087_v45 }
 0x258   : > { %v6215_v56 = vpop.permute.xlu2 %4701  ;;  %v6217_v53 = vpop.permute.xlu0 %4646  ;;  %v3239_v57 = vmax.f32 %v2656_v17, %v4088_v10  ;;  %v3348_v0 = vmax.f32 %v6160_v30, %v3236_v50  ;;  %v2510_v3 = vadd.f32 %v5986_v26, %v2421_v41  ;;  %v2051_v32 = vsel %vm1932_vm9, %v2019_v60, %v4638_v49 }
 0x259   : > { %v2052_v52 = vsel %vm1932_vm9, %v2020_v35, %v4639_v48  ;;  %v4664_v40 = vunpack.i.h.bf16 %v4662_v13  ;;  %v2423_v20 = vpop.f32.mrf.mxu2  ;;  %v3349_v42 = vmax.f32 %v6162_v11, %v3237_v21  ;;  %v3350_v18 = vmax.f32 %v6165_v14, %v3238_v39  ;;  %v6669_v39 = vld [vmem:[#allocation32_spill] sm:$0xff] }
 0x25a   : > { %v3351_v9 = vmax.f32 %v6167_v1, %v3239_v57  ;;  %v3412_v31 = vpack.c.bf16 %v3348_v0, %v3348_v0  ;;  %v2579_v15 = vmax.f32 %v2510_v3, 0.0  ;;  %v6229_v30 = vadd.f32 %v5960_v43, %v2341_v62 }
 0x25b   : > { %v2095_v38 = vpack.c.bf16 %v2052_v52, %v2051_v32  ;;  %v6233_v26 = vsel %vm1866_vm7, %v6668_v8, %v4664_v40  ;;  %v3413_v49 = vpack.c.bf16 %v3349_v42, %v3349_v42  ;;  %v3414_v48 = vpack.c.bf16 %v3350_v18, %v3350_v18 }
 0x25c   : > { %v3415_v16 = vpack.c.bf16 %v3351_v9, %v3351_v9  ;;  %v4663_v29 = vunpack.i.l.bf16 %v4662_v13  ;;  %v2657_v12 = vrot.slane %v2579_v15, 2  ;;  %v2658_v11 = vrot.slane %v2579_v15, 4 }
 0x25d   : > { %v2659_v17 = vrot.slane %v2579_v15, 6  ;;  %v4089_v14 = vrot.slane %v2579_v15, 9  ;;  %2457 = vmatmul.bf16.gmra.mxu2 %v2095_v38  ;;  %v3540_v1 = vunpack.c.l.b16 %v3412_v31  ;;  %v3541_v6 = vunpack.c.l.b16 %v3413_v49  ;;  %v6251_v38 = vpop.f32.mrf.mxu3 }
 0x25e   : > { %v3542_v63 = vunpack.c.l.b16 %v3414_v48  ;;  %v3543_v46 = vunpack.c.l.b16 %v3415_v16  ;;  %v4090_v10 = vrot.slane %v2657_v12, 9  ;;  %v4091_v50 = vrot.slane %v2658_v11, 9 }
 0x25f   : > { %v6235_v45 = vpop.permute.xlu1 %4666  ;;  %v4092_v41 = vrot.slane %v2659_v17, 9  ;;  %v3240_v60 = vmax.f32 %v2579_v15, %v4089_v14  ;;  %v3617_v35 = vrot.slane %v3541_v6, 7  ;;  %v6239_v13 = vsel %vm1866_vm7, %v6669_v39, %v4663_v29 }
 0x260   : > { %v3619_v21 = vrot.slane %v3542_v63, 6  ;;  %v4704_v57 = vunpack.i.h.bf16 %v6215_v56  ;;  %v6242_v0 = vpop.permute.xlu2 %4716  ;;  %v6244_v62 = vpop.permute.xlu0 %4656  ;;  %v3241_v3 = vmax.f32 %v2657_v12, %v4090_v10  ;;  %v3242_v32 = vmax.f32 %v2658_v11, %v4091_v50  ;;  %v6670_v12 = vld [vmem:[#allocation14_spill] sm:$0xff] }
 0x261   : > { %v3243_v52 = vmax.f32 %v2659_v17, %v4092_v41  ;;  %v3352_v40 = vmax.f32 %v3232_v2, %v3240_v60  ;;  %v6246_v42 = vpop.f32.mrf.mxu2  ;;  %v3618_v18 = vsel %vm3597_vm10, %v3617_v35, %v3540_v1  ;;  %v3621_v9 = vrot.slane %v3543_v46, 5  ;;  %v2344_v17 = vpop.f32.mrf.mxu1 }
 0x262   : > { %v4703_v31 = vunpack.i.l.bf16 %v6215_v56  ;;  %v4649_v15 = vunpack.i.h.bf16 %v6217_v53  ;;  %v3620_v8 = vsel %vm3600_vm11, %v3619_v21, %v3618_v18  ;;  %v3353_v49 = vmax.f32 %v6206_v25, %v3241_v3  ;;  %v6671_v25 = vld [vmem:[#allocation13_spill] sm:$0xff] }
 0x263   : > { %v3354_v48 = vmax.f32 %v6208_v19, %v3242_v32  ;;  %v3355_v16 = vmax.f32 %v3235_v24, %v3243_v52  ;;  %v3622_v2 = vsel %vm3603_vm12, %v3621_v9, %v3620_v8  ;;  %v3416_v29 = vpack.c.bf16 %v3352_v40, %v3352_v40 }
 0x264   : > { %v6259_v11 = vsel %vm1866_vm7, %v6670_v12, %v4704_v57  ;;  %v4648_v56 = vunpack.i.l.bf16 %v6217_v53  ;;  %v3417_v14 = vpack.c.bf16 %v3353_v49, %v3353_v49  ;;  %v2424_v63 = vadd.f32 %v2423_v20, %v6096_v7 }
 0x265   : > { %v3418_v1 = vpack.c.bf16 %v3354_v48, %v3354_v48  ;;  %v3419_v6 = vpack.c.bf16 %v3355_v16, %v3355_v16  ;;  %v3544_v46 = vunpack.c.l.b16 %v3416_v29  ;;  %v6265_v19 = vsel %vm1866_vm7, %v6671_v25, %v4703_v31 }
 0x266   : > { %v1955_v24 = vsel %vm1932_vm9, %v6131_v55, %v4648_v56  ;;  %v1956_v10 = vsel %vm1932_vm9, %v6135_v44, %v4649_v15  ;;  %v3545_v50 = vunpack.c.l.b16 %v3417_v14  ;;  %v2513_v60 = vadd.f32 %v6220_v22, %v2424_v63  ;;  %v6672_v63 = vld [vmem:[#allocation5_spill] sm:$0xff] }
 0x267   : > { %v3546_v41 = vunpack.c.l.b16 %v3418_v1  ;;  %v3547_v53 = vunpack.c.l.b16 %v3419_v6  ;;  %v6272_v35 = vpop.permute.xlu1 %4681  ;;  %v3623_v21 = vrot.slane %v3544_v46, 4  ;;  %v2094_v7 = vpack.c.bf16 %v1956_v10, %v1955_v24 }
 0x268   : > { %v4669_v20 = vunpack.i.h.bf16 %v6235_v45  ;;  %v4668_v39 = vunpack.i.l.bf16 %v6235_v45  ;;  %v3625_v57 = vrot.slane %v3545_v50, 3  ;;  %v2580_v32 = vmax.f32 %v2513_v60, 0.0  ;;  %v6283_v9 = vpop.permute.xlu2 %4731  ;;  %v4677_v31 = vpop.permute.xlu0 %4676 }
 0x269   : > { %v3627_v3 = vrot.slane %v3546_v41, 2  ;;  %v6277_v55 = vadd.f32 %v5960_v43, %v2344_v17  ;;  %v3624_v52 = vsel %vm3606_vm13, %v3623_v21, %v3622_v2  ;;  %v3629_v40 = vrot.slane %v3547_v53, 1  ;;  %2368 = vmatmul.bf16.gmra.mxu1 %v2094_v7  ;;  %v2517_v45 = vpop.f32.mrf.mxu3  ;;  %v2346_v24 = vpop.f32.mrf.mxu1 }
 0x26a   : > { %v2428_v44 = vpop.f32.mrf.mxu2  ;;  %v1924_v22 = vsel %vm1899_vm8, %v6178_v4, %v4668_v39  ;;  %v4719_v18 = vunpack.i.h.bf16 %v6242_v0  ;;  %v3626_v15 = vsel %vm3609_vm14, %v3625_v57, %v3624_v52  ;;  %v2660_v8 = vrot.slane %v2580_v32, 2 }
 0x26b   : > { %v2661_v49 = vrot.slane %v2580_v32, 4  ;;  %v2662_v48 = vrot.slane %v2580_v32, 6  ;;  %v3628_v16 = vsel %vm3612_vm15, %v3627_v3, %v3626_v15  ;;  %v4093_v29 = vrot.slane %v2580_v32, 9 }
 0x26c   : > { %v1925_v2 = vsel %vm1899_vm8, %v6174_v59, %v4669_v20  ;;  %v4718_v4 = vunpack.i.l.bf16 %v6242_v0  ;;  %v3630_v12 = vsel %vm3615_vm0, %v3629_v40, %v3628_v16  ;;  %v4094_v56 = vrot.slane %v2660_v8, 9  ;;  %v6673_v0 = vld [vmem:[#allocation4_spill] sm:$0xff] }
 0x26d   : > { %v4095_v17 = vrot.slane %v2661_v49, 9  ;;  %v4096_v14 = vrot.slane %v2662_v48, 9  ;;  %v3716_v1 = vpack.c.b16 %v3630_v12, %v3630_v12  ;;  %v6291_v6 = vmax.f32 %v2580_v32, %v4093_v29  ;;  %v6674_v16 = vld [vmem:[#allocation8_spill] sm:$0xff] }
 0x26e   : > { %v6295_v46 = vsel %vm1899_vm8, %v6672_v63, %v4719_v18  ;;  %v4659_v25 = vunpack.i.h.bf16 %v6244_v62  ;;  %v6298_v10 = vmax.f32 %v2660_v8, %v4094_v56  ;;  %v6304_v50 = vsel %vm1899_vm8, %v6673_v0, %v4718_v4 }
 0x26f   : > { %v6300_v59 = vmax.f32 %v2661_v49, %v4095_v17  ;;  %v4658_v41 = vunpack.i.l.bf16 %v6244_v62  ;;  %3733 = vst.msk [vmem:[%s6156_s12 + $0x4] sm:$0xf] %vm3731_vm1, %v3716_v1  ;;  %v6309_v53 = vmax.f32 %v2662_v48, %v4096_v14  ;;  %v2426_v60 = vadd.f32 %v6246_v42, %v6099_v61  ;;  %v6327_v61 = vpop.permute.xlu1 %4696 }
 0x270   : > { %v2021_v21 = vsel %vm1899_vm8, %v6239_v13, %v4653_v37  ;;  %v2022_v7 = vsel %vm1899_vm8, %v6233_v26, %v4654_v36  ;;  %v6322_v20 = vadd.f32 %v5960_v43, %v2346_v24  ;;  %v4684_v57 = vunpack.i.h.bf16 %v6272_v35  ;;  %v6341_v8 = vpop.permute.xlu2 %4746  ;;  %v4692_v49 = vpop.permute.xlu0 %4691 }
 0x271   : > { %v2053_v62 = vsel %vm1932_vm9, %v2021_v21, %v4658_v41  ;;  %v2054_v39 = vsel %vm1932_vm9, %v2022_v7, %v4659_v25  ;;  %v2515_v3 = vadd.f32 %v6251_v38, %v2426_v60  ;;  %v4683_v5 = vunpack.i.l.bf16 %v6272_v35  ;;  %v2519_v48 = vpop.f32.mrf.mxu3 }
 0x272   : > { %v2430_v42 = vpop.f32.mrf.mxu2  ;;  %v2098_v37 = vpack.c.bf16 %v2054_v39, %v2053_v62  ;;  %v4734_v13 = vunpack.i.h.bf16 %v6283_v9  ;;  %v4733_v36 = vunpack.i.l.bf16 %v6283_v9  ;;  %v4679_v26 = vunpack.i.h.bf16 %v4677_v31 }
 0x273   : > { %v4678_v32 = vunpack.i.l.bf16 %v4677_v31  ;;  %v2429_v52 = vadd.f32 %v2428_v44, %v6201_v47  ;;  %v2581_v40 = vmax.f32 %v2515_v3, 0.0  ;;  %v1957_v18 = vsel %vm1932_vm9, %v1924_v22, %v4673_v51  ;;  %v6675_v47 = vld [vmem:[#allocation7_spill] sm:$0xff] }
 0x274   : > { %2462 = vmatmul.bf16.gmra.mxu2 %v2098_v37  ;;  %v1958_v38 = vsel %vm1932_vm9, %v1925_v2, %v4674_v27  ;;  %v4699_v15 = vunpack.i.h.bf16 %v6327_v61  ;;  %v1992_v31 = vsel %vm1866_vm7, %v6674_v16, %v4679_v26  ;;  %v4698_v4 = vunpack.i.l.bf16 %v6327_v61 }
 0x275   : > { %v1991_v44 = vsel %vm1866_vm7, %v6675_v47, %v4678_v32  ;;  %v2518_v29 = vadd.f32 %v2517_v45, %v2429_v52  ;;  %v2663_v51 = vrot.slane %v2581_v40, 2  ;;  %v2664_v22 = vrot.slane %v2581_v40, 4 }
 0x276   : > { %v2665_v28 = vrot.slane %v2581_v40, 6  ;;  %v4097_v12 = vrot.slane %v2581_v40, 9  ;;  %v2097_v2 = vpack.c.bf16 %v1958_v38, %v1957_v18  ;;  %v4749_v56 = vunpack.i.h.bf16 %v6341_v8  ;;  %v2349_v52 = vpop.f32.mrf.mxu1 }
 0x277   : > { %v2582_v27 = vmax.f32 %v2518_v29, 0.0  ;;  %v4748_v17 = vunpack.i.l.bf16 %v6341_v8  ;;  %v4098_v14 = vrot.slane %v2663_v51, 9  ;;  %v4099_v1 = vrot.slane %v2664_v22, 9 }
 0x278   : > { %v4100_v63 = vrot.slane %v2665_v28, 9  ;;  %v4694_v25 = vunpack.i.h.bf16 %v4692_v49  ;;  %v3248_v21 = vmax.f32 %v2581_v40, %v4097_v12  ;;  %v4693_v38 = vunpack.i.l.bf16 %v4692_v49  ;;  %v6365_v12 = vpop.permute.xlu1 %4711 }
 0x279   : > { %v2666_v24 = vrot.slane %v2582_v27, 2  ;;  %v2667_v0 = vrot.slane %v2582_v27, 4  ;;  %v2668_v41 = vrot.slane %v2582_v27, 6  ;;  %v4101_v45 = vrot.slane %v2582_v27, 9  ;;  %2373 = vmatmul.bf16.gmra.mxu1 %v2097_v2  ;;  %v2522_v47 = vpop.f32.mrf.mxu3 }
 0x27a   : > { %v6350_v60 = vpop.f32.mrf.mxu2  ;;  %v6352_v7 = vmax.f32 %v2663_v51, %v4098_v14  ;;  %v6354_v62 = vmax.f32 %v2664_v22, %v4099_v1  ;;  %v6356_v39 = vmax.f32 %v2665_v28, %v4100_v63  ;;  %v6360_v18 = vsel %vm1899_vm8, %v6185_v33, %v4694_v25 }
 0x27b   : > { %v4102_v3 = vrot.slane %v2666_v24, 9  ;;  %v4103_v37 = vrot.slane %v2667_v0, 9  ;;  %v4104_v26 = vrot.slane %v2668_v41, 9  ;;  %v3252_v32 = vmax.f32 %v2582_v27, %v4101_v45 }
 0x27c   : > { %v2431_v16 = vadd.f32 %v2430_v42, %v6229_v30  ;;  %v2023_v40 = vsel %vm1899_vm8, %v1991_v44, %v4683_v5  ;;  %v6369_v27 = vsel %vm1899_vm8, %v6189_v34, %v4693_v38  ;;  %v6372_v33 = vadd.f32 %v5960_v43, %v2349_v52  ;;  %v4707_v42 = vpop.permute.xlu0 %4706 }
 0x27d   : > { %v3253_v29 = vmax.f32 %v2666_v24, %v4102_v3  ;;  %v3254_v51 = vmax.f32 %v2667_v0, %v4103_v37  ;;  %v3255_v22 = vmax.f32 %v2668_v41, %v4104_v26  ;;  %v3356_v28 = vmax.f32 %v6291_v6, %v3252_v32 }
 0x27e   : > { %v2520_v2 = vadd.f32 %v2519_v48, %v2431_v16  ;;  %v2024_v30 = vsel %vm1899_vm8, %v1992_v31, %v4684_v57  ;;  %v2055_v34 = vsel %vm1932_vm9, %v2023_v40, %v4688_v58  ;;  %v4714_v35 = vunpack.i.h.bf16 %v6365_v12 }
 0x27f   : > { %v3357_v5 = vmax.f32 %v6298_v10, %v3253_v29  ;;  %v3358_v49 = vmax.f32 %v6300_v59, %v3254_v51  ;;  %v3359_v6 = vmax.f32 %v6309_v53, %v3255_v22  ;;  %v3420_v44 = vpack.c.bf16 %v3356_v28, %v3356_v28  ;;  %v2351_v51 = vpop.f32.mrf.mxu1 }
 0x280   : > { %v2583_v48 = vmax.f32 %v2520_v2, 0.0  ;;  %v2056_v43 = vsel %vm1932_vm9, %v2024_v30, %v4689_v54  ;;  %v4713_v10 = vunpack.i.l.bf16 %v6365_v12  ;;  %v4709_v52 = vunpack.i.h.bf16 %v4707_v42 }
 0x281   : > { %v3421_v57 = vpack.c.bf16 %v3357_v5, %v3357_v5  ;;  %v3422_v31 = vpack.c.bf16 %v3358_v49, %v3358_v49  ;;  %v3423_v14 = vpack.c.bf16 %v3359_v6, %v3359_v6  ;;  %v2101_v41 = vpack.c.bf16 %v2056_v43, %v2055_v34  ;;  %v6390_v22 = vpop.f32.mrf.mxu3  ;;  %v4727_v49 = vpop.permute.xlu1 %4726 }
 0x282   : > { %v6388_v59 = vpop.f32.mrf.mxu2  ;;  %v2669_v53 = vrot.slane %v2583_v48, 2  ;;  %v2670_v1 = vrot.slane %v2583_v48, 4  ;;  %v2671_v63 = vrot.slane %v2583_v48, 6  ;;  %v4105_v25 = vrot.slane %v2583_v48, 9 }
 0x283   : > { %v3549_v58 = vunpack.c.l.b16 %v3421_v57  ;;  %v3550_v24 = vunpack.c.l.b16 %v3422_v31  ;;  %v3551_v0 = vunpack.c.l.b16 %v3423_v14  ;;  %v3548_v37 = vunpack.c.l.b16 %v3420_v44 }
 0x284   : > { %v4106_v23 = vrot.slane %v2669_v53, 9  ;;  %v4107_v45 = vrot.slane %v2670_v1, 9  ;;  %v4108_v54 = vrot.slane %v2671_v63, 9  ;;  %v3256_v3 = vmax.f32 %v2583_v48, %v4105_v25  ;;  %2467 = vmatmul.bf16.gmra.mxu2 %v2101_v41 }
 0x285   : > { %v3631_v26 = vrot.slane %v3549_v58, 7  ;;  %v3633_v32 = vrot.slane %v3550_v24, 6  ;;  %v3635_v2 = vrot.slane %v3551_v0, 5  ;;  %v4708_v30 = vunpack.i.l.bf16 %v4707_v42 }
 0x286   : > { %v3257_v38 = vmax.f32 %v2669_v53, %v4106_v23  ;;  %v3258_v16 = vmax.f32 %v2670_v1, %v4107_v45  ;;  %v3259_v40 = vmax.f32 %v2671_v63, %v4108_v54  ;;  %v3360_v29 = vmax.f32 %v3248_v21, %v3256_v3  ;;  %v6399_v21 = vpop.permute.xlu0 %4721 }
 0x287   : > { %v3632_v28 = vsel %vm3597_vm10, %v3631_v26, %v3548_v37  ;;  %v2434_v5 = vadd.f32 %v6350_v60, %v6277_v55  ;;  %v2026_v42 = vsel %vm1899_vm8, %v6259_v11, %v4709_v52  ;;  %v2025_v53 = vsel %vm1899_vm8, %v6265_v19, %v4708_v30 }
 0x288   : > { %v3634_v6 = vsel %vm3600_vm11, %v3633_v32, %v3632_v28  ;;  %v3361_v34 = vmax.f32 %v6352_v7, %v3257_v38  ;;  %v3362_v44 = vmax.f32 %v6354_v62, %v3258_v16  ;;  %v3363_v48 = vmax.f32 %v6356_v39, %v3259_v40 }
 0x289   : > { %v3636_v43 = vsel %vm3603_vm12, %v3635_v2, %v3634_v6  ;;  %v3424_v57 = vpack.c.bf16 %v3360_v29, %v3360_v29  ;;  %v2523_v31 = vadd.f32 %v2522_v47, %v2434_v5  ;;  %v1959_v39 = vsel %vm1932_vm9, %v6369_v27, %v4698_v4  ;;  %v6417_v4 = vld [vmem:[%s6562_s4] ss:$0 sm:$0xff]  ;;  %v4742_v2 = vpop.permute.xlu1 %4741 }
 0x28a   : > { %v3425_v14 = vpack.c.bf16 %v3361_v34, %v3361_v34  ;;  %v3426_v55 = vpack.c.bf16 %v3362_v44, %v3362_v44  ;;  %v3427_v60 = vpack.c.bf16 %v3363_v48, %v3363_v48  ;;  %v2438_v7 = vpop.f32.mrf.mxu2  ;;  %v1960_v11 = vsel %vm1932_vm9, %v6360_v18, %v4699_v15  ;;  %v2527_v18 = vpop.f32.mrf.mxu3  ;;  %v6676_v6 = vld [vmem:[#allocation18_spill] sm:$0xff] }
 0x28b   : > { %v3552_v1 = vunpack.c.l.b16 %v3424_v57  ;;  %v2584_v62 = vmax.f32 %v2523_v31, 0.0  ;;  %v2100_v58 = vpack.c.bf16 %v1960_v11, %v1959_v39  ;;  %v2352_v61 = vadd.f32 %v6417_v4, %v2351_v51 }
 0x28c   : > { %v3553_v47 = vunpack.c.l.b16 %v3425_v14  ;;  %v3554_v63 = vunpack.c.l.b16 %v3426_v55  ;;  %v3555_v25 = vunpack.c.l.b16 %v3427_v60  ;;  %v4729_v38 = vunpack.i.h.bf16 %v4727_v49  ;;  %v6677_v14 = vld [vmem:[#allocation17_spill] sm:$0xff] }
 0x28d   : > { %v3637_v24 = vrot.slane %v3552_v1, 4  ;;  %v2672_v0 = vrot.slane %v2584_v62, 2  ;;  %v2673_v19 = vrot.slane %v2584_v62, 4  ;;  %v2674_v41 = vrot.slane %v2584_v62, 6  ;;  %2378 = vmatmul.bf16.gmra.mxu1 %v2100_v58 }
 0x28e   : > { %v3639_v23 = vrot.slane %v3553_v47, 3  ;;  %v3641_v45 = vrot.slane %v3554_v63, 2  ;;  %v4109_v54 = vrot.slane %v2584_v62, 9  ;;  %v2354_v15 = vpop.f32.mrf.mxu1  ;;  %v3643_v52 = vrot.slane %v3555_v25, 1  ;;  %v6678_v47 = vld [vmem:[#allocation23_spill] sm:$0xff] }
 0x28f   : > { %v3638_v27 = vsel %vm3606_vm13, %v3637_v24, %v3636_v43  ;;  %v4110_v3 = vrot.slane %v2672_v0, 9  ;;  %v4111_v37 = vrot.slane %v2673_v19, 9  ;;  %v4112_v26 = vrot.slane %v2674_v41, 9 }
 0x290   : > { %v3640_v32 = vsel %vm3609_vm14, %v3639_v23, %v3638_v27  ;;  %v4728_v16 = vunpack.i.l.bf16 %v4727_v49  ;;  %v6423_v29 = vmax.f32 %v2584_v62, %v4109_v54  ;;  %v1996_v34 = vsel %vm1866_vm7, %v6676_v6, %v4729_v38  ;;  %v4737_v49 = vpop.permute.xlu0 %4736 }
 0x291   : > { %v3642_v40 = vsel %vm3612_vm15, %v3641_v45, %v3640_v32  ;;  %v6425_v28 = vmax.f32 %v2672_v0, %v4110_v3  ;;  %v6427_v51 = vmax.f32 %v2673_v19, %v4111_v37  ;;  %v6430_v5 = vmax.f32 %v2674_v41, %v4112_v26 }
 0x292   : > { %v3644_v30 = vsel %vm3615_vm0, %v3643_v52, %v3642_v40  ;;  %v4724_v44 = vunpack.i.h.bf16 %v6399_v21  ;;  %v4723_v43 = vunpack.i.l.bf16 %v6399_v21  ;;  %v2436_v57 = vadd.f32 %v6388_v59, %v6322_v20  ;;  %v2440_v39 = vpop.f32.mrf.mxu2 }
 0x293   : > { %v3717_v48 = vpack.c.b16 %v3644_v30, %v3644_v30  ;;  %v2057_v31 = vsel %vm1932_vm9, %v2025_v53, %v4713_v10  ;;  %v1995_v55 = vsel %vm1866_vm7, %v6677_v14, %v4728_v16  ;;  %v2058_v60 = vsel %vm1932_vm9, %v2026_v42, %v4714_v35  ;;  %v6679_v53 = vld [vmem:[#allocation6_spill] sm:$0xff] }
 0x294   : > { %v4744_v1 = vunpack.i.h.bf16 %v4742_v2  ;;  %v4743_v62 = vunpack.i.l.bf16 %v4742_v2  ;;  %v2525_v21 = vadd.f32 %v6390_v22, %v2436_v57  ;;  %v2104_v11 = vpack.c.bf16 %v2058_v60, %v2057_v31 }
 0x295   : > { %3734 = vst.msk [vmem:[%s6156_s12 + $0x8] sm:$0xf] %vm3731_vm1, %v3717_v48  ;;  %v4739_v20 = vunpack.i.h.bf16 %v4737_v49  ;;  %v2439_v59 = vadd.f32 %v2438_v7, %v6372_v33  ;;  %v4738_v35 = vunpack.i.l.bf16 %v4737_v49  ;;  %v1961_v42 = vsel %vm1932_vm9, %v6304_v50, %v4723_v43  ;;  %v2529_v50 = vpop.f32.mrf.mxu3 }
 0x296   : > { %v6452_v10 = vsel %vm1899_vm8, %v6678_v47, %v4743_v62  ;;  %v6456_v12 = vsel %vm1899_vm8, %v6679_v53, %v4744_v1  ;;  %v2356_v63 = vpop.f32.mrf.mxu1  ;;  %v2585_v25 = vmax.f32 %v2525_v21, 0.0  ;;  %2472 = vmatmul.bf16.gmra.mxu2 %v2104_v11  ;;  %v1962_v58 = vsel %vm1932_vm9, %v6295_v46, %v4724_v44 }
 0x297   : > { %v2528_v22 = vadd.f32 %v2527_v18, %v2439_v59  ;;  %v2441_v33 = vadd.f32 %v2440_v39, %v2352_v61  ;;  %v6463_v7 = vadd.f32 %v6417_v4, %v2354_v15  ;;  %v2103_v24 = vpack.c.bf16 %v1962_v58, %v1961_v42 }
 0x298   : > { %v6466_v0 = vadd.f32 %v6417_v4, %v2356_v63  ;;  %v2027_v19 = vsel %vm1899_vm8, %v1995_v55, %v4733_v36  ;;  %v2675_v41 = vrot.slane %v2585_v25, 2  ;;  %v2676_v23 = vrot.slane %v2585_v25, 4 }
 0x299   : > { %v2677_v45 = vrot.slane %v2585_v25, 6  ;;  %v4113_v54 = vrot.slane %v2585_v25, 9  ;;  %v2586_v18 = vmax.f32 %v2528_v22, 0.0  ;;  %v2530_v27 = vadd.f32 %v2529_v50, %v2441_v33 }
 0x29a   : > { %v2028_v46 = vsel %vm1899_vm8, %v1996_v34, %v4734_v13  ;;  %v2059_v61 = vsel %vm1932_vm9, %v2027_v19, %v4738_v35  ;;  %v4114_v15 = vrot.slane %v2675_v41, 9  ;;  %v4115_v3 = vrot.slane %v2676_v23, 9 }
 0x29b   : > { %v4116_v37 = vrot.slane %v2677_v45, 9  ;;  %v2060_v26 = vsel %vm1932_vm9, %v2028_v46, %v4739_v20  ;;  %v2678_v32 = vrot.slane %v2586_v18, 2  ;;  %v2679_v36 = vrot.slane %v2586_v18, 4 }
 0x29c   : > { %v2680_v52 = vrot.slane %v2586_v18, 6  ;;  %v4117_v38 = vrot.slane %v2586_v18, 9  ;;  %v3264_v16 = vmax.f32 %v2585_v25, %v4113_v54  ;;  %v3265_v40 = vmax.f32 %v2675_v41, %v4114_v15 }
 0x29d   : > { %v3266_v2 = vmax.f32 %v2676_v23, %v4115_v3  ;;  %v2587_v30 = vmax.f32 %v2530_v27, 0.0  ;;  %v4118_v6 = vrot.slane %v2678_v32, 9  ;;  %v4119_v44 = vrot.slane %v2679_v36, 9  ;;  %2383 = vmatmul.bf16.gmra.mxu1 %v2103_v24  ;;  %v2532_v1 = vpop.f32.mrf.mxu3 }
 0x29e   : > { %v4120_v9 = vrot.slane %v2680_v52, 9  ;;  %v3268_v49 = vmax.f32 %v2586_v18, %v4117_v38  ;;  %v3267_v20 = vmax.f32 %v2677_v45, %v4116_v37 }
 0x29f   : > { %v2681_v13 = vrot.slane %v2587_v30, 2  ;;  %v2682_v34 = vrot.slane %v2587_v30, 4  ;;  %v2683_v48 = vrot.slane %v2587_v30, 6  ;;  %v4121_v43 = vrot.slane %v2587_v30, 9 }
 0x2a0   : > { %v2443_v57 = vpop.f32.mrf.mxu2  ;;  %v3269_v31 = vmax.f32 %v2678_v32, %v4118_v6  ;;  %v3270_v14 = vmax.f32 %v2679_v36, %v4119_v44  ;;  %v3271_v55 = vmax.f32 %v2680_v52, %v4120_v9  ;;  %v3364_v60 = vmax.f32 %v6423_v29, %v3268_v49 }
 0x2a1   : > { %v4122_v62 = vrot.slane %v2681_v13, 9  ;;  %v4123_v39 = vrot.slane %v2682_v34, 9  ;;  %v4124_v21 = vrot.slane %v2683_v48, 9  ;;  %v3272_v11 = vmax.f32 %v2587_v30, %v4121_v43 }
 0x2a2   : > { %v3365_v59 = vmax.f32 %v6425_v28, %v3269_v31  ;;  %v3366_v47 = vmax.f32 %v6427_v51, %v3270_v14  ;;  %v3367_v53 = vmax.f32 %v6430_v5, %v3271_v55  ;;  %v3428_v22 = vpack.c.bf16 %v3364_v60, %v3364_v60 }
 0x2a3   : > { %v3273_v35 = vmax.f32 %v2681_v13, %v4122_v62  ;;  %v3274_v42 = vmax.f32 %v2682_v34, %v4123_v39  ;;  %v3275_v63 = vmax.f32 %v2683_v48, %v4124_v21  ;;  %v3368_v25 = vmax.f32 %v3264_v16, %v3272_v11 }
 0x2a4   : > { %v3429_v58 = vpack.c.bf16 %v3365_v59, %v3365_v59  ;;  %v3430_v33 = vpack.c.bf16 %v3366_v47, %v3366_v47  ;;  %v3431_v29 = vpack.c.bf16 %v3367_v53, %v3367_v53  ;;  %v2107_v28 = vpack.c.bf16 %v2060_v26, %v2059_v61 }
 0x2a5   : > { %v3369_v24 = vmax.f32 %v3265_v40, %v3273_v35  ;;  %v3370_v19 = vmax.f32 %v3266_v2, %v3274_v42  ;;  %v3371_v50 = vmax.f32 %v3267_v20, %v3275_v63  ;;  %v3432_v41 = vpack.c.bf16 %v3368_v25, %v3368_v25  ;;  %v2534_v30 = vpop.f32.mrf.mxu3 }
 0x2a6   : > { %v3557_v23 = vunpack.c.l.b16 %v3429_v58  ;;  %v3558_v45 = vunpack.c.l.b16 %v3430_v33  ;;  %v3559_v54 = vunpack.c.l.b16 %v3431_v29  ;;  %v3556_v46 = vunpack.c.l.b16 %v3428_v22  ;;  %2477 = vmatmul.bf16.gmra.mxu2 %v2107_v28 }
 0x2a7   : > { %v3433_v18 = vpack.c.bf16 %v3369_v24, %v3369_v24  ;;  %v3434_v51 = vpack.c.bf16 %v3370_v19, %v3370_v19  ;;  %v3435_v27 = vpack.c.bf16 %v3371_v50, %v3371_v50  ;;  %v3560_v5 = vunpack.c.l.b16 %v3432_v41 }
 0x2a8   : > { %v3645_v15 = vrot.slane %v3557_v23, 7  ;;  %v3647_v3 = vrot.slane %v3558_v45, 6  ;;  %v3649_v37 = vrot.slane %v3559_v54, 5  ;;  %v2445_v32 = vpop.f32.mrf.mxu2  ;;  %v1963_v16 = vsel %vm1932_vm9, %v6452_v10, %v4748_v17 }
 0x2a9   : > { %v3561_v36 = vunpack.c.l.b16 %v3433_v18  ;;  %v3562_v52 = vunpack.c.l.b16 %v3434_v51  ;;  %v3651_v38 = vrot.slane %v3560_v5, 4  ;;  %v3563_v26 = vunpack.c.l.b16 %v3435_v27 }
 0x2aa   : > { %v3646_v61 = vsel %vm3597_vm10, %v3645_v15, %v3556_v46  ;;  %v1964_v40 = vsel %vm1932_vm9, %v6456_v12, %v4749_v56  ;;  %v2444_v2 = vadd.f32 %v2443_v57, %v6463_v7  ;;  %v2446_v17 = vadd.f32 %v2445_v32, %v6466_v0 }
 0x2ab   : > { %v3648_v6 = vsel %vm3600_vm11, %v3647_v3, %v3646_v61  ;;  %v3653_v44 = vrot.slane %v3561_v36, 3  ;;  %v3655_v9 = vrot.slane %v3562_v52, 2  ;;  %v2106_v13 = vpack.c.bf16 %v1964_v40, %v1963_v16 }
 0x2ac   : > { %v3650_v49 = vsel %vm3603_vm12, %v3649_v37, %v3648_v6  ;;  %v2533_v34 = vadd.f32 %v2532_v1, %v2444_v2  ;;  %v2359_v8 = vpop.f32.mrf.mxu1  ;;  %v3657_v56 = vrot.slane %v3563_v26, 1  ;;  %v2535_v43 = vadd.f32 %v2534_v30, %v2446_v17 }
 0x2ad   : > { %v3652_v10 = vsel %vm3606_vm13, %v3651_v38, %v3650_v49  ;;  %2388 = vmatmul.bf16.gmra.mxu1 %v2106_v13  ;;  %v2537_v55 = vpop.f32.mrf.mxu3  ;;  %v2360_v0 = vadd.f32 %v6417_v4, %v2359_v8 }
 0x2ae   : > { %v3654_v48 = vsel %vm3609_vm14, %v3653_v44, %v3652_v10  ;;  %v2588_v31 = vmax.f32 %v2533_v34, 0.0  ;;  %v2589_v60 = vmax.f32 %v2535_v43, 0.0 }
 0x2af   : > { %v3656_v12 = vsel %vm3612_vm15, %v3655_v9, %v3654_v48 }
 0x2b0   : > { %v3658_v7 = vsel %vm3615_vm0, %v3657_v56, %v3656_v12  ;;  %v2684_v1 = vrot.slane %v2588_v31, 2  ;;  %v2685_v39 = vrot.slane %v2588_v31, 4  ;;  %v2686_v21 = vrot.slane %v2588_v31, 6 }
 0x2b1   : > { %v3718_v57 = vpack.c.b16 %v3658_v7, %v3658_v7  ;;  %v2448_v14 = vpop.f32.mrf.mxu2  ;;  %v4125_v59 = vrot.slane %v2588_v31, 9  ;;  %v2687_v47 = vrot.slane %v2589_v60, 2  ;;  %v2688_v35 = vrot.slane %v2589_v60, 4 }
 0x2b2   : > { %v2449_v62 = vadd.f32 %v2448_v14, %v2360_v0  ;;  %v4126_v53 = vrot.slane %v2684_v1, 9  ;;  %v4127_v63 = vrot.slane %v2685_v39, 9  ;;  %v4128_v25 = vrot.slane %v2686_v21, 9 }
 0x2b3   : > { %3735 = vst.msk [vmem:[%s6156_s12 + $0xc] sm:$0xf] %vm3731_vm1, %v3718_v57  ;;  %v2689_v22 = vrot.slane %v2589_v60, 6  ;;  %v3276_v41 = vmax.f32 %v2588_v31, %v4125_v59  ;;  %v4129_v23 = vrot.slane %v2589_v60, 9  ;;  %v4130_v45 = vrot.slane %v2687_v47, 9 }
 0x2b4   : > { %v2538_v11 = vadd.f32 %v2537_v55, %v2449_v62  ;;  %v2361_v20 = vpop.f32.mrf.mxu1  ;;  %v3277_v46 = vmax.f32 %v2684_v1, %v4126_v53  ;;  %v3278_v15 = vmax.f32 %v2685_v39, %v4127_v63  ;;  %v3279_v3 = vmax.f32 %v2686_v21, %v4128_v25 }
 0x2b5   : > { %v2362_v58 = vadd.f32 %v6417_v4, %v2361_v20  ;;  %v2539_v28 = vpop.f32.mrf.mxu3  ;;  %v4131_v16 = vrot.slane %v2688_v35, 9  ;;  %v4132_v61 = vrot.slane %v2689_v22, 9  ;;  %v3280_v26 = vmax.f32 %v2589_v60, %v4129_v23 }
 0x2b6   : > { %v2590_v42 = vmax.f32 %v2538_v11, 0.0  ;;  %v3281_v2 = vmax.f32 %v2687_v47, %v4130_v45 }
 0x2b7   : > { %v3282_v57 = vmax.f32 %v2688_v35, %v4131_v16  ;;  %v3283_v31 = vmax.f32 %v2689_v22, %v4132_v61 }
 0x2b8   : > { %v2690_v29 = vrot.slane %v2590_v42, 2  ;;  %v2691_v24 = vrot.slane %v2590_v42, 4  ;;  %v2692_v19 = vrot.slane %v2590_v42, 6  ;;  %v4133_v50 = vrot.slane %v2590_v42, 9 }
 0x2b9   : > { %v2450_v33 = vpop.f32.mrf.mxu2 }
 0x2ba   : > { %v2451_v54 = vadd.f32 %v2450_v33, %v2362_v58  ;;  %v4134_v18 = vrot.slane %v2690_v29, 9  ;;  %v4135_v51 = vrot.slane %v2691_v24, 9  ;;  %v4136_v27 = vrot.slane %v2692_v19, 9 }
 0x2bb   : > { %v3284_v5 = vmax.f32 %v2590_v42, %v4133_v50 }
 0x2bc   : > { %v2540_v37 = vadd.f32 %v2539_v28, %v2451_v54  ;;  %v3285_v32 = vmax.f32 %v2690_v29, %v4134_v18  ;;  %v3286_v36 = vmax.f32 %v2691_v24, %v4135_v51  ;;  %v3287_v52 = vmax.f32 %v2692_v19, %v4136_v27 }
 0x2bd   : > { %v3372_v38 = vmax.f32 %v3276_v41, %v3284_v5  ;;  %v2542_v29 = vpop.f32.mrf.mxu3 }
 0x2be   : > { %v2591_v40 = vmax.f32 %v2540_v37, 0.0  ;;  %v3373_v30 = vmax.f32 %v3277_v46, %v3285_v32  ;;  %v3374_v6 = vmax.f32 %v3278_v15, %v3286_v36  ;;  %v3375_v44 = vmax.f32 %v3279_v3, %v3287_v52 }
 0x2bf   : > { %v3436_v10 = vpack.c.bf16 %v3372_v38, %v3372_v38 }
 0x2c0   : > { %v2693_v9 = vrot.slane %v2591_v40, 2  ;;  %v2694_v49 = vrot.slane %v2591_v40, 4  ;;  %v2695_v13 = vrot.slane %v2591_v40, 6  ;;  %v4137_v17 = vrot.slane %v2591_v40, 9 }
 0x2c1   : > { %v3437_v34 = vpack.c.bf16 %v3373_v30, %v3373_v30  ;;  %v3438_v8 = vpack.c.bf16 %v3374_v6, %v3374_v6  ;;  %v3439_v48 = vpack.c.bf16 %v3375_v44, %v3375_v44  ;;  %v3564_v39 = vunpack.c.l.b16 %v3436_v10 }
 0x2c2   : > { %v4138_v56 = vrot.slane %v2693_v9, 9  ;;  %v4139_v12 = vrot.slane %v2694_v49, 9  ;;  %v4140_v7 = vrot.slane %v2695_v13, 9  ;;  %v3288_v43 = vmax.f32 %v2591_v40, %v4137_v17 }
 0x2c3   : > { %v3565_v14 = vunpack.c.l.b16 %v3437_v34  ;;  %v3566_v55 = vunpack.c.l.b16 %v3438_v8  ;;  %v3567_v21 = vunpack.c.l.b16 %v3439_v48 }
 0x2c4   : > { %v3289_v0 = vmax.f32 %v2693_v9, %v4138_v56  ;;  %v3290_v60 = vmax.f32 %v2694_v49, %v4139_v12  ;;  %v3291_v1 = vmax.f32 %v2695_v13, %v4140_v7  ;;  %v3376_v62 = vmax.f32 %v3280_v26, %v3288_v43 }
 0x2c5   : > { %v3659_v11 = vrot.slane %v3565_v14, 7  ;;  %v3661_v20 = vrot.slane %v3566_v55, 6  ;;  %v3663_v24 = vrot.slane %v3567_v21, 5  ;;  %v2544_v32 = vpop.f32.mrf.mxu3 }
 0x2c6   : > { %v3377_v59 = vmax.f32 %v3281_v2, %v3289_v0  ;;  %v3378_v47 = vmax.f32 %v3282_v57, %v3290_v60  ;;  %v3379_v53 = vmax.f32 %v3283_v31, %v3291_v1  ;;  %v3440_v42 = vpack.c.bf16 %v3376_v62, %v3376_v62 }
 0x2c7   : > { %v3660_v63 = vsel %vm3597_vm10, %v3659_v11, %v3564_v39 }
 0x2c8   : > { %v3441_v25 = vpack.c.bf16 %v3377_v59, %v3377_v59  ;;  %v3442_v58 = vpack.c.bf16 %v3378_v47, %v3378_v47  ;;  %v3443_v35 = vpack.c.bf16 %v3379_v53, %v3379_v53  ;;  %v3662_v22 = vsel %vm3600_vm11, %v3661_v20, %v3660_v63 }
 0x2c9   : > { %v3568_v33 = vunpack.c.l.b16 %v3440_v42  ;;  %v3664_v45 = vsel %vm3603_vm12, %v3663_v24, %v3662_v22  ;;  %v2453_v46 = vpop.f32.mrf.mxu2 }
 0x2ca   : > { %v3569_v19 = vunpack.c.l.b16 %v3441_v25  ;;  %v3570_v50 = vunpack.c.l.b16 %v3442_v58  ;;  %v3571_v41 = vunpack.c.l.b16 %v3443_v35 }
 0x2cb   : > { %v3665_v23 = vrot.slane %v3568_v33, 4 }
 0x2cc   : > { %v3667_v54 = vrot.slane %v3569_v19, 3  ;;  %v3669_v28 = vrot.slane %v3570_v50, 2  ;;  %v3671_v27 = vrot.slane %v3571_v41, 1 }
 0x2cd   : > { %v3666_v18 = vsel %vm3606_vm13, %v3665_v23, %v3664_v45  ;;  %v2547_v40 = vpop.f32.mrf.mxu3 }
 0x2ce   : > { %v3668_v51 = vsel %vm3609_vm14, %v3667_v54, %v3666_v18 }
 0x2cf   : > { %v3670_v5 = vsel %vm3612_vm15, %v3669_v28, %v3668_v51 }
 0x2d0   : > { %v3672_v15 = vsel %vm3615_vm0, %v3671_v27, %v3670_v5  ;;  %v2364_v3 = vpop.f32.mrf.mxu1 }
 0x2d1   : > { %v3719_v37 = vpack.c.b16 %v3672_v15, %v3672_v15  ;;  %v2365_v36 = vadd.f32 %v6417_v4, %v2364_v3  ;;  %v2455_v52 = vpop.f32.mrf.mxu2 }
 0x2d3   : > { %3736 = vst.msk [vmem:[%s6156_s12 + $0x10] sm:$0xf] %vm3731_vm1, %v3719_v37  ;;  %v2454_v38 = vadd.f32 %v2453_v46, %v2365_v36 }
 0x2d5   : > { %v2543_v61 = vadd.f32 %v2542_v29, %v2454_v38  ;;  %v2549_v34 = vpop.f32.mrf.mxu3 }
 0x2d7   : > { %v2592_v2 = vmax.f32 %v2543_v61, 0.0 }
 0x2d8   : > { %v2366_v16 = vpop.f32.mrf.mxu1 }
 0x2d9   : > { %v2367_v26 = vadd.f32 %v6417_v4, %v2366_v16  ;;  %v2696_v44 = vrot.slane %v2592_v2, 2  ;;  %v2697_v17 = vrot.slane %v2592_v2, 4  ;;  %v2698_v10 = vrot.slane %v2592_v2, 6 }
 0x2da   : > { %v4141_v48 = vrot.slane %v2592_v2, 9 }
 0x2db   : > { %v2456_v30 = vadd.f32 %v2455_v52, %v2367_v26  ;;  %v4142_v56 = vrot.slane %v2696_v44, 9  ;;  %v4143_v43 = vrot.slane %v2697_v17, 9  ;;  %v4144_v57 = vrot.slane %v2698_v10, 9 }
 0x2dc   : > { %v3292_v55 = vmax.f32 %v2592_v2, %v4141_v48 }
 0x2dd   : > { %v2545_v9 = vadd.f32 %v2544_v32, %v2456_v30  ;;  %v3293_v0 = vmax.f32 %v2696_v44, %v4142_v56  ;;  %v3294_v20 = vmax.f32 %v2697_v17, %v4143_v43  ;;  %v3295_v59 = vmax.f32 %v2698_v10, %v4144_v57  ;;  %v2552_v24 = vpop.f32.mrf.mxu3 }
 0x2df   : > { %v2593_v12 = vmax.f32 %v2545_v9, 0.0 }
 0x2e0   : > { %v2458_v6 = vpop.f32.mrf.mxu2 }
 0x2e1   : > { %v2699_v60 = vrot.slane %v2593_v12, 2  ;;  %v2700_v47 = vrot.slane %v2593_v12, 4  ;;  %v2701_v35 = vrot.slane %v2593_v12, 6  ;;  %v4145_v22 = vrot.slane %v2593_v12, 9 }
 0x2e3   : > { %v4146_v33 = vrot.slane %v2699_v60, 9  ;;  %v4147_v51 = vrot.slane %v2700_v47, 9  ;;  %v4148_v27 = vrot.slane %v2701_v35, 9  ;;  %v3296_v5 = vmax.f32 %v2593_v12, %v4145_v22 }
 0x2e5   : > { %v3297_v37 = vmax.f32 %v2699_v60, %v4146_v33  ;;  %v3298_v17 = vmax.f32 %v2700_v47, %v4147_v51  ;;  %v3299_v10 = vmax.f32 %v2701_v35, %v4148_v27  ;;  %v2554_v43 = vpop.f32.mrf.mxu3 }
 0x2e6   : > { %v2369_v49 = vpop.f32.mrf.mxu1 }
 0x2e7   : > { %v2370_v13 = vadd.f32 %v6417_v4, %v2369_v49 }
 0x2e8   : > { %v2460_v31 = vpop.f32.mrf.mxu2 }
 0x2e9   : > { %v2459_v8 = vadd.f32 %v2458_v6, %v2370_v13 }
 0x2eb   : > { %v2548_v7 = vadd.f32 %v2547_v40, %v2459_v8 }
 0x2ed   : > { %v2594_v14 = vmax.f32 %v2548_v7, 0.0 }
 0x2ee   : > { %v2371_v1 = vpop.f32.mrf.mxu1 }
 0x2ef   : > { %v2702_v62 = vrot.slane %v2594_v14, 2  ;;  %v2703_v39 = vrot.slane %v2594_v14, 4  ;;  %v2704_v21 = vrot.slane %v2594_v14, 6  ;;  %v4149_v11 = vrot.slane %v2594_v14, 9 }
 0x2f0   : > { %v2372_v53 = vadd.f32 %v6417_v4, %v2371_v1 }
 0x2f1   : > { %v4150_v42 = vrot.slane %v2702_v62, 9  ;;  %v4151_v63 = vrot.slane %v2703_v39, 9  ;;  %v4152_v25 = vrot.slane %v2704_v21, 9  ;;  %v3300_v58 = vmax.f32 %v2594_v14, %v4149_v11 }
 0x2f2   : > { %v2461_v29 = vadd.f32 %v2460_v31, %v2372_v53 }
 0x2f3   : > { %v3301_v19 = vmax.f32 %v2702_v62, %v4150_v42  ;;  %v3302_v50 = vmax.f32 %v2703_v39, %v4151_v63  ;;  %v3303_v41 = vmax.f32 %v2704_v21, %v4152_v25  ;;  %v3380_v23 = vmax.f32 %v3292_v55, %v3300_v58 }
 0x2f4   : > { %v2550_v45 = vadd.f32 %v2549_v34, %v2461_v29 }
 0x2f5   : > { %v3381_v54 = vmax.f32 %v3293_v0, %v3301_v19  ;;  %v3382_v28 = vmax.f32 %v3294_v20, %v3302_v50  ;;  %v3383_v18 = vmax.f32 %v3295_v59, %v3303_v41  ;;  %v3444_v32 = vpack.c.bf16 %v3380_v23, %v3380_v23 }
 0x2f6   : > { %v2595_v46 = vmax.f32 %v2550_v45, 0.0  ;;  %v2374_v3 = vpop.f32.mrf.mxu1 }
 0x2f7   : > { %v2463_v15 = vpop.f32.mrf.mxu2  ;;  %v3445_v36 = vpack.c.bf16 %v3381_v54, %v3381_v54  ;;  %v3446_v52 = vpack.c.bf16 %v3382_v28, %v3382_v28  ;;  %v3447_v40 = vpack.c.bf16 %v3383_v18, %v3383_v18  ;;  %v2375_v6 = vadd.f32 %v6417_v4, %v2374_v3  ;;  %v2557_v18 = vpop.f32.mrf.mxu3 }
 0x2f8   : > { %v2705_v38 = vrot.slane %v2595_v46, 2  ;;  %v2706_v16 = vrot.slane %v2595_v46, 4  ;;  %v2707_v61 = vrot.slane %v2595_v46, 6  ;;  %v4153_v26 = vrot.slane %v2595_v46, 9 }
 0x2f9   : > { %v3573_v2 = vunpack.c.l.b16 %v3445_v36  ;;  %v3574_v30 = vunpack.c.l.b16 %v3446_v52  ;;  %v3572_v34 = vunpack.c.l.b16 %v3444_v32  ;;  %v3575_v57 = vunpack.c.l.b16 %v3447_v40 }
 0x2fa   : > { %v4154_v44 = vrot.slane %v2705_v38, 9  ;;  %v4155_v9 = vrot.slane %v2706_v16, 9  ;;  %v4156_v49 = vrot.slane %v2707_v61, 9  ;;  %v3304_v13 = vmax.f32 %v2595_v46, %v4153_v26 }
 0x2fb   : > { %v3673_v8 = vrot.slane %v3573_v2, 7  ;;  %v3675_v31 = vrot.slane %v3574_v30, 6  ;;  %v2464_v14 = vadd.f32 %v2463_v15, %v2375_v6  ;;  %v3677_v53 = vrot.slane %v3575_v57, 5 }
 0x2fc   : > { %v3305_v48 = vmax.f32 %v2705_v38, %v4154_v44  ;;  %v3306_v56 = vmax.f32 %v2706_v16, %v4155_v9  ;;  %v3307_v12 = vmax.f32 %v2707_v61, %v4156_v49  ;;  %v3384_v7 = vmax.f32 %v3296_v5, %v3304_v13 }
 0x2fd   : > { %v3674_v55 = vsel %vm3597_vm10, %v3673_v8, %v3572_v34  ;;  %v2553_v63 = vadd.f32 %v2552_v24, %v2464_v14 }
 0x2fe   : > { %v3385_v0 = vmax.f32 %v3297_v37, %v3305_v48  ;;  %v3386_v60 = vmax.f32 %v3298_v17, %v3306_v56  ;;  %v3387_v1 = vmax.f32 %v3299_v10, %v3307_v12  ;;  %v3448_v39 = vpack.c.bf16 %v3384_v7, %v3384_v7  ;;  %v2376_v21 = vpop.f32.mrf.mxu1 }
 0x2ff   : > { %v2465_v62 = vpop.f32.mrf.mxu2  ;;  %v3676_v47 = vsel %vm3600_vm11, %v3675_v31, %v3674_v55  ;;  %v2377_v22 = vadd.f32 %v6417_v4, %v2376_v21  ;;  %v2596_v54 = vmax.f32 %v2553_v63, 0.0  ;;  %v2559_v6 = vpop.f32.mrf.mxu3 }
 0x300   : > { %v3449_v11 = vpack.c.bf16 %v3385_v0, %v3385_v0  ;;  %v3450_v20 = vpack.c.bf16 %v3386_v60, %v3386_v60  ;;  %v3451_v59 = vpack.c.bf16 %v3387_v1, %v3387_v1  ;;  %v3576_v42 = vunpack.c.l.b16 %v3448_v39 }
 0x301   : > { %v3678_v29 = vsel %vm3603_vm12, %v3677_v53, %v3676_v47  ;;  %v2466_v28 = vadd.f32 %v2465_v62, %v2377_v22  ;;  %v2708_v46 = vrot.slane %v2596_v54, 2  ;;  %v2709_v32 = vrot.slane %v2596_v54, 4 }
 0x302   : > { %v3577_v25 = vunpack.c.l.b16 %v3449_v11  ;;  %v3578_v58 = vunpack.c.l.b16 %v3450_v20  ;;  %v3579_v35 = vunpack.c.l.b16 %v3451_v59  ;;  %v3679_v33 = vrot.slane %v3576_v42, 4 }
 0x303   : > { %v2555_v15 = vadd.f32 %v2554_v43, %v2466_v28  ;;  %v2710_v36 = vrot.slane %v2596_v54, 6  ;;  %v4157_v38 = vrot.slane %v2596_v54, 9  ;;  %v4158_v16 = vrot.slane %v2708_v46, 9 }
 0x304   : > { %v3681_v19 = vrot.slane %v3577_v25, 3  ;;  %v3683_v50 = vrot.slane %v3578_v58, 2  ;;  %v3680_v41 = vsel %vm3606_vm13, %v3679_v33, %v3678_v29  ;;  %v3685_v45 = vrot.slane %v3579_v35, 1 }
 0x305   : > { %v2597_v61 = vmax.f32 %v2555_v15, 0.0  ;;  %v4159_v2 = vrot.slane %v2709_v32, 9  ;;  %v4160_v30 = vrot.slane %v2710_v36, 9  ;;  %v3308_v9 = vmax.f32 %v2596_v54, %v4157_v38 }
 0x306   : > { %v3682_v23 = vsel %vm3609_vm14, %v3681_v19, %v3680_v41  ;;  %v3309_v49 = vmax.f32 %v2708_v46, %v4158_v16 }
 0x307   : > { %v3684_v24 = vsel %vm3612_vm15, %v3683_v50, %v3682_v23  ;;  %v2468_v51 = vpop.f32.mrf.mxu2  ;;  %v2711_v13 = vrot.slane %v2597_v61, 2  ;;  %v2712_v17 = vrot.slane %v2597_v61, 4  ;;  %v3310_v12 = vmax.f32 %v2709_v32, %v4159_v2  ;;  %v2562_v19 = vpop.f32.mrf.mxu3 }
 0x308   : > { %v3686_v27 = vsel %vm3615_vm0, %v3685_v45, %v3684_v24  ;;  %v3311_v7 = vmax.f32 %v2710_v36, %v4160_v30  ;;  %v2713_v43 = vrot.slane %v2597_v61, 6  ;;  %v4161_v60 = vrot.slane %v2597_v61, 9 }
 0x309   : > { %v3720_v5 = vpack.c.b16 %v3686_v27, %v3686_v27  ;;  %v4162_v1 = vrot.slane %v2711_v13, 9  ;;  %v4163_v62 = vrot.slane %v2712_v17, 9 }
 0x30a   : > { %v2379_v3 = vpop.f32.mrf.mxu1  ;;  %v4164_v58 = vrot.slane %v2713_v43, 9  ;;  %v3312_v35 = vmax.f32 %v2597_v61, %v4161_v60 }
 0x30b   : > { %3737 = vst.msk [vmem:[%s6156_s12 + $0x14] sm:$0xf] %vm3731_vm1, %v3720_v5  ;;  %v2380_v37 = vadd.f32 %v6417_v4, %v2379_v3  ;;  %v3313_v22 = vmax.f32 %v2711_v13, %v4162_v1  ;;  %v3314_v50 = vmax.f32 %v2712_v17, %v4163_v62 }
 0x30c   : > { %v3315_v36 = vmax.f32 %v2713_v43, %v4164_v58 }
 0x30d   : > { %v2469_v52 = vadd.f32 %v2468_v51, %v2380_v37 }
 0x30f   : > { %v2558_v26 = vadd.f32 %v2557_v18, %v2469_v52  ;;  %v2470_v40 = vpop.f32.mrf.mxu2 }
 0x311   : > { %v2598_v44 = vmax.f32 %v2558_v26, 0.0 }
 0x312   : > { %v2381_v10 = vpop.f32.mrf.mxu1 }
 0x313   : > { %v2714_v34 = vrot.slane %v2598_v44, 2  ;;  %v2715_v8 = vrot.slane %v2598_v44, 4  ;;  %v2716_v48 = vrot.slane %v2598_v44, 6  ;;  %v4165_v56 = vrot.slane %v2598_v44, 9 }
 0x314   : > { %v2382_v57 = vadd.f32 %v6417_v4, %v2381_v10 }
 0x315   : > { %v4166_v31 = vrot.slane %v2714_v34, 9  ;;  %v4167_v14 = vrot.slane %v2715_v8, 9  ;;  %v4168_v55 = vrot.slane %v2716_v48, 9  ;;  %v3316_v0 = vmax.f32 %v2598_v44, %v4165_v56 }
 0x316   : > { %v2471_v39 = vadd.f32 %v2470_v40, %v2382_v57 }
 0x317   : > { %v3317_v21 = vmax.f32 %v2714_v34, %v4166_v31  ;;  %v3318_v11 = vmax.f32 %v2715_v8, %v4167_v14  ;;  %v3319_v20 = vmax.f32 %v2716_v48, %v4168_v55  ;;  %v3388_v59 = vmax.f32 %v3308_v9, %v3316_v0 }
 0x318   : > { %v2560_v47 = vadd.f32 %v2559_v6, %v2471_v39 }
 0x319   : > { %v3389_v53 = vmax.f32 %v3309_v49, %v3317_v21  ;;  %v3390_v42 = vmax.f32 %v3310_v12, %v3318_v11  ;;  %v3391_v63 = vmax.f32 %v3311_v7, %v3319_v20  ;;  %v2473_v25 = vpop.f32.mrf.mxu2  ;;  %v3452_v41 = vpack.c.bf16 %v3388_v59, %v3388_v59  ;;  %v2564_v7 = vpop.f32.mrf.mxu3 }
 0x31a   : > { %v2599_v33 = vmax.f32 %v2560_v47, 0.0  ;;  %v2384_v29 = vpop.f32.mrf.mxu1 }
 0x31b   : > { %v3453_v23 = vpack.c.bf16 %v3389_v53, %v3389_v53  ;;  %v3454_v45 = vpack.c.bf16 %v3390_v42, %v3390_v42  ;;  %v3455_v51 = vpack.c.bf16 %v3391_v63, %v3391_v63  ;;  %v2385_v46 = vadd.f32 %v6417_v4, %v2384_v29 }
 0x31c   : > { %v2717_v54 = vrot.slane %v2599_v33, 2  ;;  %v2718_v28 = vrot.slane %v2599_v33, 4  ;;  %v2719_v18 = vrot.slane %v2599_v33, 6  ;;  %v4169_v24 = vrot.slane %v2599_v33, 9 }
 0x31d   : > { %v3581_v27 = vunpack.c.l.b16 %v3453_v23  ;;  %v3582_v5 = vunpack.c.l.b16 %v3454_v45  ;;  %v3580_v52 = vunpack.c.l.b16 %v3452_v41  ;;  %v2474_v16 = vadd.f32 %v2473_v25, %v2385_v46 }
 0x31e   : > { %v4170_v15 = vrot.slane %v2717_v54, 9  ;;  %v4171_v3 = vrot.slane %v2718_v28, 9  ;;  %v4172_v37 = vrot.slane %v2719_v18, 9  ;;  %v3320_v32 = vmax.f32 %v2599_v33, %v4169_v24 }
 0x31f   : > { %v3687_v38 = vrot.slane %v3581_v27, 7  ;;  %v3583_v30 = vunpack.c.l.b16 %v3455_v51  ;;  %v3689_v6 = vrot.slane %v3582_v5, 6  ;;  %v2563_v44 = vadd.f32 %v2562_v19, %v2474_v16 }
 0x320   : > { %v3321_v61 = vmax.f32 %v2717_v54, %v4170_v15  ;;  %v3322_v26 = vmax.f32 %v2718_v28, %v4171_v3  ;;  %v3323_v40 = vmax.f32 %v2719_v18, %v4172_v37  ;;  %v3392_v2 = vmax.f32 %v3312_v35, %v3320_v32 }
 0x321   : > { %v2475_v9 = vpop.f32.mrf.mxu2  ;;  %v3688_v49 = vsel %vm3597_vm10, %v3687_v38, %v3580_v52  ;;  %v3691_v57 = vrot.slane %v3583_v30, 5  ;;  %v2600_v14 = vmax.f32 %v2563_v44, 0.0  ;;  %v2567_v41 = vpop.f32.mrf.mxu3 }
 0x322   : > { %v3393_v13 = vmax.f32 %v3313_v22, %v3321_v61  ;;  %v3394_v17 = vmax.f32 %v3314_v50, %v3322_v26  ;;  %v3395_v10 = vmax.f32 %v3315_v36, %v3323_v40  ;;  %v2386_v34 = vpop.f32.mrf.mxu1  ;;  %v3456_v8 = vpack.c.bf16 %v3392_v2, %v3392_v2 }
 0x323   : > { %v3690_v43 = vsel %vm3600_vm11, %v3689_v6, %v3688_v49  ;;  %v2387_v1 = vadd.f32 %v6417_v4, %v2386_v34  ;;  %v2720_v53 = vrot.slane %v2600_v14, 2  ;;  %v2721_v33 = vrot.slane %v2600_v14, 4 }
 0x324   : > { %v3457_v48 = vpack.c.bf16 %v3393_v13, %v3393_v13  ;;  %v3458_v56 = vpack.c.bf16 %v3394_v17, %v3394_v17  ;;  %v3459_v12 = vpack.c.bf16 %v3395_v10, %v3395_v10  ;;  %v3584_v31 = vunpack.c.l.b16 %v3456_v8 }
 0x325   : > { %v3692_v39 = vsel %vm3603_vm12, %v3691_v57, %v3690_v43  ;;  %v2476_v42 = vadd.f32 %v2475_v9, %v2387_v1  ;;  %v2722_v29 = vrot.slane %v2600_v14, 6  ;;  %v4173_v45 = vrot.slane %v2600_v14, 9 }
 0x326   : > { %v3585_v55 = vunpack.c.l.b16 %v3457_v48  ;;  %v3586_v0 = vunpack.c.l.b16 %v3458_v56  ;;  %v3587_v60 = vunpack.c.l.b16 %v3459_v12  ;;  %v3693_v62 = vrot.slane %v3584_v31, 4 }
 0x327   : > { %v2565_v19 = vadd.f32 %v2564_v7, %v2476_v42  ;;  %v4174_v54 = vrot.slane %v2720_v53, 9  ;;  %v4175_v18 = vrot.slane %v2721_v33, 9  ;;  %v4176_v24 = vrot.slane %v2722_v29, 9 }
 0x328   : > { %v3695_v21 = vrot.slane %v3585_v55, 3  ;;  %v3697_v11 = vrot.slane %v3586_v0, 2  ;;  %v3694_v20 = vsel %vm3606_vm13, %v3693_v62, %v3692_v39  ;;  %v3699_v47 = vrot.slane %v3587_v60, 1 }
 0x329   : > { %v2478_v58 = vpop.f32.mrf.mxu2  ;;  %v2601_v51 = vmax.f32 %v2565_v19, 0.0  ;;  %v3324_v5 = vmax.f32 %v2600_v14, %v4173_v45  ;;  %v3325_v46 = vmax.f32 %v2720_v53, %v4174_v54  ;;  %v3326_v52 = vmax.f32 %v2721_v33, %v4175_v18  ;;  %v2569_v48 = vpop.f32.mrf.mxu3 }
 0x32a   : > { %v3696_v59 = vsel %vm3609_vm14, %v3695_v21, %v3694_v20  ;;  %v2389_v63 = vpop.f32.mrf.mxu1  ;;  %v3327_v38 = vmax.f32 %v2722_v29, %v4176_v24 }
 0x32b   : > { %v3698_v25 = vsel %vm3612_vm15, %v3697_v11, %v3696_v59  ;;  %v2390_v35 = vadd.f32 %v6417_v4, %v2389_v63  ;;  %v2723_v16 = vrot.slane %v2601_v51, 2  ;;  %v2724_v44 = vrot.slane %v2601_v51, 4 }
 0x32c   : > { %v3700_v22 = vsel %vm3615_vm0, %v3699_v47, %v3698_v25  ;;  %v2725_v9 = vrot.slane %v2601_v51, 6  ;;  %v4177_v49 = vrot.slane %v2601_v51, 9 }
 0x32d   : > { %v3721_v50 = vpack.c.b16 %v3700_v22, %v3700_v22  ;;  %v2479_v23 = vadd.f32 %v2478_v58, %v2390_v35  ;;  %v4178_v12 = vrot.slane %v2723_v16, 9 }
 0x32e   : > { %v4180_v31 = vrot.slane %v2725_v9, 9  ;;  %v3328_v55 = vmax.f32 %v2601_v51, %v4177_v49 }
 0x32f   : > { %3738 = vst.msk [vmem:[%s6156_s12 + $0x18] sm:$0xf] %vm3731_vm1, %v3721_v50  ;;  %v2568_v28 = vadd.f32 %v2567_v41, %v2479_v23  ;;  %v3329_v20 = vmax.f32 %v2723_v16, %v4178_v12 }
 0x330   : > { %v3331_v22 = vmax.f32 %v2725_v9, %v4180_v31 }
 0x331   : > { %v2602_v27 = vmax.f32 %v2568_v28, 0.0  ;;  %v2480_v6 = vpop.f32.mrf.mxu2 }
 0x332   : > { %v2391_v15 = vpop.f32.mrf.mxu1 }
 0x333   : > { %v2726_v3 = vrot.slane %v2602_v27, 2  ;;  %v2727_v37 = vrot.slane %v2602_v27, 4  ;;  %v2728_v32 = vrot.slane %v2602_v27, 6  ;;  %v4181_v36 = vrot.slane %v2602_v27, 9 }
 0x334   : > { %v2392_v61 = vadd.f32 %v6417_v4, %v2391_v15  ;;  %v4179_v4 = vrot.slane %v2724_v44, 9 }
 0x335   : > { %v4182_v26 = vrot.slane %v2726_v3, 9  ;;  %v4183_v40 = vrot.slane %v2727_v37, 9  ;;  %v4184_v2 = vrot.slane %v2728_v32, 9  ;;  %v3332_v30 = vmax.f32 %v2602_v27, %v4181_v36 }
 0x336   : > { %v2481_v13 = vadd.f32 %v2480_v6, %v2392_v61  ;;  %v3330_v35 = vmax.f32 %v2724_v44, %v4179_v4 }
 0x337   : > { %v3333_v17 = vmax.f32 %v2726_v3, %v4182_v26  ;;  %v3334_v10 = vmax.f32 %v2727_v37, %v4183_v40  ;;  %v3335_v34 = vmax.f32 %v2728_v32, %v4184_v2  ;;  %v3396_v8 = vmax.f32 %v3324_v5, %v3332_v30 }
 0x338   : > { %v2570_v56 = vadd.f32 %v2569_v48, %v2481_v13 }
 0x339   : > { %v3397_v7 = vmax.f32 %v3325_v46, %v3333_v17  ;;  %v3398_v43 = vmax.f32 %v3326_v52, %v3334_v10  ;;  %v3399_v57 = vmax.f32 %v3327_v38, %v3335_v34  ;;  %v3460_v0 = vpack.c.bf16 %v3396_v8, %v3396_v8 }
 0x33a   : > { %v2603_v14 = vmax.f32 %v2570_v56, 0.0 }
 0x33b   : > { %v3461_v60 = vpack.c.bf16 %v3397_v7, %v3397_v7  ;;  %v3462_v1 = vpack.c.bf16 %v3398_v43, %v3398_v43  ;;  %v3463_v59 = vpack.c.bf16 %v3399_v57, %v3399_v57  ;;  %v3588_v33 = vunpack.c.l.b16 %v3460_v0 }
 0x33c   : > { %v2729_v62 = vrot.slane %v2603_v14, 2  ;;  %v2730_v39 = vrot.slane %v2603_v14, 4  ;;  %v2731_v21 = vrot.slane %v2603_v14, 6  ;;  %v4185_v11 = vrot.slane %v2603_v14, 9 }
 0x33d   : > { %v3589_v47 = vunpack.c.l.b16 %v3461_v60  ;;  %v3590_v53 = vunpack.c.l.b16 %v3462_v1  ;;  %v3591_v45 = vunpack.c.l.b16 %v3463_v59 }
 0x33e   : > { %v4186_v42 = vrot.slane %v2729_v62, 9  ;;  %v4187_v63 = vrot.slane %v2730_v39, 9  ;;  %v4188_v25 = vrot.slane %v2731_v21, 9  ;;  %v3336_v58 = vmax.f32 %v2603_v14, %v4185_v11 }
 0x33f   : > { %v3701_v29 = vrot.slane %v3589_v47, 7  ;;  %v3703_v54 = vrot.slane %v3590_v53, 6  ;;  %v3705_v32 = vrot.slane %v3591_v45, 5 }
 0x340   : > { %v3337_v19 = vmax.f32 %v2729_v62, %v4186_v42  ;;  %v3338_v50 = vmax.f32 %v2730_v39, %v4187_v63  ;;  %v3339_v41 = vmax.f32 %v2731_v21, %v4188_v25  ;;  %v3400_v23 = vmax.f32 %v3328_v55, %v3336_v58 }
 0x341   : > { %v3702_v28 = vsel %vm3597_vm10, %v3701_v29, %v3588_v33 }
 0x342   : > { %v3401_v18 = vmax.f32 %v3329_v20, %v3337_v19  ;;  %v3402_v24 = vmax.f32 %v3330_v35, %v3338_v50  ;;  %v3403_v51 = vmax.f32 %v3331_v22, %v3339_v41  ;;  %v3464_v27 = vpack.c.bf16 %v3400_v23, %v3400_v23 }
 0x343   : > { %v3704_v3 = vsel %vm3600_vm11, %v3703_v54, %v3702_v28 }
 0x344   : > { %v3465_v5 = vpack.c.bf16 %v3401_v18, %v3401_v18  ;;  %v3466_v46 = vpack.c.bf16 %v3402_v24, %v3402_v24  ;;  %v3467_v15 = vpack.c.bf16 %v3403_v51, %v3403_v51  ;;  %v3592_v37 = vunpack.c.l.b16 %v3464_v27 }
 0x345   : > { %v3706_v61 = vsel %vm3603_vm12, %v3705_v32, %v3704_v3 }
 0x346   : > { %v3593_v36 = vunpack.c.l.b16 %v3465_v5  ;;  %v3594_v52 = vunpack.c.l.b16 %v3466_v46  ;;  %v3595_v38 = vunpack.c.l.b16 %v3467_v15  ;;  %v3707_v16 = vrot.slane %v3592_v37, 4 }
 0x348   : > { %v3709_v26 = vrot.slane %v3593_v36, 3  ;;  %v3711_v40 = vrot.slane %v3594_v52, 2  ;;  %v3708_v2 = vsel %vm3606_vm13, %v3707_v16, %v3706_v61  ;;  %v3713_v6 = vrot.slane %v3595_v38, 1 }
 0x34a   : > { %v3710_v30 = vsel %vm3609_vm14, %v3709_v26, %v3708_v2 }
 0x34b   : > { %v3712_v44 = vsel %vm3612_vm15, %v3711_v40, %v3710_v30 }
 0x34c   : > { %v3714_v9 = vsel %vm3615_vm0, %v3713_v6, %v3712_v44 }
 0x34d   : > { %v3722_v49 = vpack.c.b16 %v3714_v9, %v3714_v9 }
 0x34f   : > { %3739 = vst.msk [vmem:[%s6156_s12 + $0x1c] sm:$0xf] %vm3731_vm1, %v3722_v49 }
 0x350 PF: > { %s15_s20 = sadd.s32 1, %s4776_s20   ;;  %s6680_s18 = smov %s4772_s19 }
 0x351   : > { %p12_p5 = scmp.ge.s32.totalorder %s15_s20, 4   ;;  %s6681_s19 = smov %s6683_s21 }
 0x353   :  { %14 = sbr.rel (!%p12_p5) target bundleno = 2 (0x2), region = 71 }

</bundles_post_ra>
